<compile_context>
chip_gen: v5e
topology: v5e:2x2
jax: 0.10.0
libtpu: 0.0.40
codegen_flags: <defaults>
</compile_context>

<pallas_src>
import jax
import jax.numpy as jnp
from jax import lax
from jax.experimental import pallas as pl
from jax.experimental.pallas import tpu as pltpu


def _round_up(x, m):
    return (x + m - 1) // m * m


# ----------------------------------------------------------------------------
# Pallas kernel 1: transposed conv GEMM with fused bias + ReLU
#   o(OC, TM) = relu( W(OC, K) @ Xt(K, TM) + b(OC, 1) )
# ----------------------------------------------------------------------------
def _conv_gemm_kernel(w_ref, xt_ref, b_ref, o_ref):
    acc = jnp.dot(w_ref[...], xt_ref[...], preferred_element_type=jnp.float32)
    o_ref[...] = jnp.maximum(acc + b_ref[...], 0.0).astype(o_ref.dtype)


def conv_gemm_relu(w_mat, xt, b_col):
    """w_mat: (OC, K), xt: (K, Mp) with Mp % 128 == 0, b_col: (OC, 1)."""
    oc, k = w_mat.shape
    mp = xt.shape[1]
    # Up to 2 lane-aligned M tiles: overlaps the Xt DMA with compute and gives
    # v7x's two TensorCores a parallel axis to split.
    if mp >= 256 and mp % 256 == 0:
        tm, n_tiles = mp // 2, 2
    else:
        tm, n_tiles = mp, 1
    return pl.pallas_call(
        _conv_gemm_kernel,
        out_shape=jax.ShapeDtypeStruct((oc, mp), jnp.float32),
        grid=(n_tiles,),
        in_specs=[
            pl.BlockSpec((oc, k), lambda m: (0, 0)),   # weights resident
            pl.BlockSpec((k, tm), lambda m: (0, m)),   # Xt tile (lane dim M)
            pl.BlockSpec((oc, 1), lambda m: (0, 0)),   # bias column
        ],
        out_specs=pl.BlockSpec((oc, tm), lambda m: (0, m)),
        compiler_params=pltpu.CompilerParams(
            dimension_semantics=("parallel",)),
    )(w_mat, xt, b_col)


# ----------------------------------------------------------------------------
# Pallas kernel 2: fused  out = relu(x @ W1 + b1) @ W2 + b2
# K-tiled over the fc1 reduction with a VMEM f32 accumulator.
# ----------------------------------------------------------------------------
def _fc_fused_kernel(x_ref, w1_ref, b1_ref, w2_ref, b2_ref, o_ref, acc_ref):
    k = pl.program_id(0)

    @pl.when(k == 0)
    def _():
        acc_ref[...] = jnp.zeros_like(acc_ref)

    acc_ref[...] += jnp.dot(x_ref[...], w1_ref[...],
                            preferred_element_type=jnp.float32)

    @pl.when(k == pl.num_programs(0) - 1)
    def _():
        h = jnp.maximum(acc_ref[...] + b1_ref[...], 0.0)
        o_ref[...] = (jnp.dot(h, w2_ref[...], preferred_element_type=jnp.float32)
                      + b2_ref[...]).astype(o_ref.dtype)


def fc1_relu_fc2(x, w1, b1_row, w2, b2_row, *, tk=1024):
    """x: (B, K), w1: (K, H), b1: (1, H), w2: (H, N), b2: (1, N) -> (B, N)."""
    m, k = x.shape
    h = w1.shape[1]
    n = w2.shape[1]
    if k % tk:
        tk = k
    return pl.pallas_call(
        _fc_fused_kernel,
        out_shape=jax.ShapeDtypeStruct((m, n), jnp.float32),
        grid=(k // tk,),
        in_specs=[
            pl.BlockSpec((m, tk), lambda kk: (0, kk)),
            pl.BlockSpec((tk, h), lambda kk: (kk, 0)),
            pl.BlockSpec((1, h), lambda kk: (0, 0)),
            pl.BlockSpec((h, n), lambda kk: (0, 0)),
            pl.BlockSpec((1, n), lambda kk: (0, 0)),
        ],
        out_specs=pl.BlockSpec((m, n), lambda kk: (0, 0)),
        scratch_shapes=[pltpu.VMEM((m, h), jnp.float32)],
        compiler_params=pltpu.CompilerParams(
            dimension_semantics=("arbitrary",)),
    )(x, w1, b1_row, w2, b2_row)


# ----------------------------------------------------------------------------
# Glue: channel-first im2col (no big transposes) + conv wrapper
# ----------------------------------------------------------------------------
def _im2col_T(x_cbhw, kh, kw, stride):
    """x: (C, B, H, W) -> Xt (C*KH*KW, B*OH*OW), oh, ow."""
    C, B, H, W = x_cbhw.shape
    oh = (H - kh) // stride + 1
    ow = (W - kw) // stride + 1
    cols = []
    for i in range(kh):
        for j in range(kw):
            cols.append(
                x_cbhw[:, :, i:i + stride * oh:stride, j:j + stride * ow:stride])
    p = jnp.stack(cols, axis=1)                     # (C, KH*KW, B, OH, OW)
    return p.reshape(C * kh * kw, B * oh * ow), oh, ow


def conv2d_relu_T(x_cbhw, w_mat, b_col, kh, kw, stride):
    """Channel-first conv: x (C, B, H, W) -> relu(conv + b) as (OC, B, OH, OW)."""
    C, B, H, W = x_cbhw.shape
    xt, oh, ow = _im2col_T(x_cbhw, kh, kw, stride)
    m = xt.shape[1]
    mp = _round_up(m, 256) if m > 128 else _round_up(m, 128)
    if mp != m:
        xt = jnp.pad(xt, ((0, 0), (0, mp - m)))     # zero-pad lane (M) dim
    y = conv_gemm_relu(w_mat, xt, b_col)            # (OC, Mp)
    oc = w_mat.shape[0]
    return y[:, :m].reshape(oc, B, oh, ow)          # free reshape, no transpose


# ----------------------------------------------------------------------------
# Parameters (deterministic, PyTorch-default-style uniform(+-1/sqrt(fan_in)))
# ----------------------------------------------------------------------------
def _conv_out(s, k, st):
    return (s - k) // st + 1


def init_cnn_params(key, history_length, output_classes):
    def uniform(k, shape, fan_in):
        bound = 1.0 / float(fan_in) ** 0.5
        return jax.random.uniform(k, shape, jnp.float32, -bound, bound)

    # linear_size derived exactly as _conv_to_linear_size (96x96 input):
    h = _conv_out(_conv_out(_conv_out(96, 8, 4), 4, 2), 3, 1)   # -> 8
    linear_size = 64 * h * h                                    # -> 4096

    c = history_length
    ks = jax.random.split(key, 10)
    return {
        "conv1_w": uniform(ks[0], (32, c, 8, 8), c * 8 * 8),
        "conv1_b": uniform(ks[1], (32,), c * 8 * 8),
        "conv2_w": uniform(ks[2], (64, 32, 4, 4), 32 * 4 * 4),
        "conv2_b": uniform(ks[3], (64,), 32 * 4 * 4),
        "conv3_w": uniform(ks[4], (64, 64, 3, 3), 64 * 3 * 3),
        "conv3_b": uniform(ks[5], (64,), 64 * 3 * 3),
        "fc1_w": uniform(ks[6], (linear_size, 512), linear_size),
        "fc1_b": uniform(ks[7], (512,), linear_size),
        "fc2_w": uniform(ks[8], (512, output_classes), 512),
        "fc2_b": uniform(ks[9], (output_classes,), 512),
    }


def prepare_params(params):
    """One-time layout prep: GEMM-ready weights so forward does no reshapes."""
    def cmat(w):                                    # (OC,C,KH,KW) -> (OC, C*KH*KW)
        return w.reshape(w.shape[0], -1)

    return {
        "c1_w": cmat(params["conv1_w"]), "c1_b": params["conv1_b"].reshape(-1, 1),
        "c2_w": cmat(params["conv2_w"]), "c2_b": params["conv2_b"].reshape(-1, 1),
        "c3_w": cmat(params["conv3_w"]), "c3_b": params["conv3_b"].reshape(-1, 1),
        "fc1_w": params["fc1_w"], "fc1_b": params["fc1_b"].reshape(1, -1),
        "fc2_w": params["fc2_w"], "fc2_b": params["fc2_b"].reshape(1, -1),
    }


# ----------------------------------------------------------------------------
# Forward pass (mirrors CNN.forward; NCHW in, logits out)
# ----------------------------------------------------------------------------
@jax.jit
def cnn_forward(prep, x):
    # One layout change at the top: NCHW -> channel-first "CBHW". All conv
    # GEMMs then run transposed (lane-dense outputs) with no inter-layer
    # transposes.
    xc = jnp.transpose(x, (1, 0, 2, 3))
    xc = conv2d_relu_T(xc, prep["c1_w"], prep["c1_b"], 8, 8, 4)
    xc = conv2d_relu_T(xc, prep["c2_w"], prep["c2_b"], 4, 4, 2)
    xc = conv2d_relu_T(xc, prep["c3_w"], prep["c3_b"], 3, 3, 1)
    oc, b, oh, ow = xc.shape
    # nn.Flatten over (C, H, W): a tiny (64, B, 8, 8) transpose back to batch-major.
    flat = jnp.transpose(xc, (1, 0, 2, 3)).reshape(b, oc * oh * ow)
    return fc1_relu_fc2(flat, prep["fc1_w"], prep["fc1_b"],
                        prep["fc2_w"], prep["fc2_b"])


# Pure-JAX reference (independent code path: lax conv) for a sanity check.
def cnn_forward_ref(params, x):
    def conv(x, w, b, s):
        y = lax.conv_general_dilated(
            x, w, window_strides=(s, s), padding="VALID",
            dimension_numbers=("NCHW", "OIHW", "NCHW"))
        return jnp.maximum(y + b.reshape(1, -1, 1, 1), 0.0)

    x = conv(x, params["conv1_w"], params["conv1_b"], 4)
    x = conv(x, params["conv2_w"], params["conv2_b"], 2)
    x = conv(x, params["conv3_w"], params["conv3_b"], 1)
    x = x.reshape(x.shape[0], -1)
    x = jnp.maximum(x @ params["fc1_w"] + params["fc1_b"], 0.0)
    return x @ params["fc2_w"] + params["fc2_b"]


if __name__ == "__main__":
    history_length = 4      # -> num_channels = 4
    output_classes = 5
    batch_size = 2

    key = jax.random.PRNGKey(0)
    kp, kx = jax.random.split(key)
    params = init_cnn_params(kp, history_length, output_classes)
    prep = prepare_params(params)
    # 96x96 spatial is fixed by the module's _conv_to_linear_size().
    x = jax.random.normal(kx, (batch_size, history_length, 96, 96), jnp.float32)

    out = jax.block_until_ready(cnn_forward(prep, x))
    assert out.shape == (batch_size, output_classes), out.shape
    assert bool(jnp.all(jnp.isfinite(out)))

    ref = jax.block_until_ready(cnn_forward_ref(params, x))
    assert bool(jnp.allclose(out, ref, rtol=1e-2, atol=1e-2)), (out, ref)

    print("KERNEL_OK")
</pallas_src>

<mosaic_0001>
module attributes {stable_mosaic.version = 11 : i64} {
  func.func @_conv_gemm_kernel(%arg0: i32, %arg1: memref<32x256xf32, #tpu.memory_space<vmem>>, %arg2: memref<256x640xf32, #tpu.memory_space<vmem>>, %arg3: memref<32x1xf32, #tpu.memory_space<vmem>>, %arg4: memref<32x640xf32, #tpu.memory_space<vmem>>) attributes {dimension_semantics = [#tpu.dimension_semantics<parallel>], iteration_bounds = array<i64: 2>, scalar_prefetch = 0 : i64, scratch_operands = 0 : i64, tpu.core_type = #tpu.core_type<tc>, window_params = [{pipeline_mode = #tpu.pipeline_mode<synchronous>, transform_indices = @transform_0, window_bounds = array<i64: 32, 256>}, {transform_indices = @transform_1, window_bounds = array<i64: 256, 640>}, {pipeline_mode = #tpu.pipeline_mode<synchronous>, transform_indices = @transform_2, window_bounds = array<i64: 32, 1>}, {transform_indices = @transform_3, window_bounds = array<i64: 32, 640>}]} {
    %c0 = arith.constant 0 : index
    %c0_0 = arith.constant 0 : index
    %0 = vector.load %arg1[%c0, %c0_0] : memref<32x256xf32, #tpu.memory_space<vmem>>, vector<32x256xf32>
    %c0_1 = arith.constant 0 : index
    %c0_2 = arith.constant 0 : index
    %1 = vector.load %arg2[%c0_1, %c0_2] : memref<256x640xf32, #tpu.memory_space<vmem>>, vector<256x640xf32>
    %cst = arith.constant dense<0.000000e+00> : vector<32x640xf32>
    %2 = tpu.matmul %0, %1, %cst {dimension_numbers = #tpu.dot_dimension_numbers<[1], [0], [0], [1], [0, 0, 1, 1], [], []>} : vector<32x256xf32>, vector<256x640xf32>, vector<32x640xf32> -> vector<32x640xf32>
    %c0_3 = arith.constant 0 : index
    %c0_4 = arith.constant 0 : index
    %3 = vector.load %arg3[%c0_3, %c0_4] : memref<32x1xf32, #tpu.memory_space<vmem>>, vector<32x1xf32>
    %4 = vector.broadcast %3 : vector<32x1xf32> to vector<32x640xf32>
    %5 = arith.addf %2, %4 : vector<32x640xf32>
    %cst_5 = arith.constant 0.000000e+00 : f32
    %6 = vector.broadcast %cst_5 : f32 to vector<32x640xf32>
    %7 = arith.maximumf %5, %6 : vector<32x640xf32>
    %c0_6 = arith.constant 0 : index
    %c0_7 = arith.constant 0 : index
    %8 = vector.load %arg4[%c0_6, %c0_7] : memref<32x640xf32, #tpu.memory_space<vmem>>, vector<32x640xf32>
    tpu.vector_store %arg4[%c0_6, %c0_7], %7 {strides = array<i32>} : memref<32x640xf32, #tpu.memory_space<vmem>>, vector<32x640xf32>,
    return
  }
  func.func @transform_0(%arg0: i32) -> (i32, i32) {
    %c0_i32 = arith.constant 0 : i32
    %c0_i32_0 = arith.constant 0 : i32
    %c0_i32_1 = arith.constant 0 : i32
    return %c0_i32, %c0_i32_0 : i32, i32
  }
  func.func @transform_1(%arg0: i32) -> (i32, i32) {
    %c0_i32 = arith.constant 0 : i32
    %c0_i32_0 = arith.constant 0 : i32
    return %c0_i32, %arg0 : i32, i32
  }
  func.func @transform_2(%arg0: i32) -> (i32, i32) {
    %c0_i32 = arith.constant 0 : i32
    %c0_i32_0 = arith.constant 0 : i32
    %c0_i32_1 = arith.constant 0 : i32
    return %c0_i32, %c0_i32_0 : i32, i32
  }
  func.func @transform_3(%arg0: i32) -> (i32, i32) {
    %c0_i32 = arith.constant 0 : i32
    %c0_i32_0 = arith.constant 0 : i32
    return %c0_i32, %arg0 : i32, i32
  }
}

module attributes {stable_mosaic.version = 11 : i64} {
  func.func @_conv_gemm_kernel(%arg0: i32, %arg1: memref<64x512xf32, #tpu.memory_space<vmem>>, %arg2: memref<512x128xf32, #tpu.memory_space<vmem>>, %arg3: memref<64x1xf32, #tpu.memory_space<vmem>>, %arg4: memref<64x128xf32, #tpu.memory_space<vmem>>) attributes {dimension_semantics = [#tpu.dimension_semantics<parallel>], iteration_bounds = array<i64: 2>, scalar_prefetch = 0 : i64, scratch_operands = 0 : i64, tpu.core_type = #tpu.core_type<tc>, window_params = [{pipeline_mode = #tpu.pipeline_mode<synchronous>, transform_indices = @transform_0, window_bounds = array<i64: 64, 512>}, {transform_indices = @transform_1, window_bounds = array<i64: 512, 128>}, {pipeline_mode = #tpu.pipeline_mode<synchronous>, transform_indices = @transform_2, window_bounds = array<i64: 64, 1>}, {transform_indices = @transform_3, window_bounds = array<i64: 64, 128>}]} {
    %c0 = arith.constant 0 : index
    %c0_0 = arith.constant 0 : index
    %0 = vector.load %arg1[%c0, %c0_0] : memref<64x512xf32, #tpu.memory_space<vmem>>, vector<64x512xf32>
    %c0_1 = arith.constant 0 : index
    %c0_2 = arith.constant 0 : index
    %1 = vector.load %arg2[%c0_1, %c0_2] : memref<512x128xf32, #tpu.memory_space<vmem>>, vector<512x128xf32>
    %cst = arith.constant dense<0.000000e+00> : vector<64x128xf32>
    %2 = tpu.matmul %0, %1, %cst {dimension_numbers = #tpu.dot_dimension_numbers<[1], [0], [0], [1], [0, 0, 1, 1], [], []>} : vector<64x512xf32>, vector<512x128xf32>, vector<64x128xf32> -> vector<64x128xf32>
    %c0_3 = arith.constant 0 : index
    %c0_4 = arith.constant 0 : index
    %3 = vector.load %arg3[%c0_3, %c0_4] : memref<64x1xf32, #tpu.memory_space<vmem>>, vector<64x1xf32>
    %4 = vector.broadcast %3 : vector<64x1xf32> to vector<64x128xf32>
    %5 = arith.addf %2, %4 : vector<64x128xf32>
    %cst_5 = arith.constant 0.000000e+00 : f32
    %6 = vector.broadcast %cst_5 : f32 to vector<64x128xf32>
    %7 = arith.maximumf %5, %6 : vector<64x128xf32>
    %c0_6 = arith.constant 0 : index
    %c0_7 = arith.constant 0 : index
    %8 = vector.load %arg4[%c0_6, %c0_7] : memref<64x128xf32, #tpu.memory_space<vmem>>, vector<64x128xf32>
    tpu.vector_store %arg4[%c0_6, %c0_7], %7 {strides = array<i32>} : memref<64x128xf32, #tpu.memory_space<vmem>>, vector<64x128xf32>,
    return
  }
  func.func @transform_0(%arg0: i32) -> (i32, i32) {
    %c0_i32 = arith.constant 0 : i32
    %c0_i32_0 = arith.constant 0 : i32
    %c0_i32_1 = arith.constant 0 : i32
    return %c0_i32, %c0_i32_0 : i32, i32
  }
  func.func @transform_1(%arg0: i32) -> (i32, i32) {
    %c0_i32 = arith.constant 0 : i32
    %c0_i32_0 = arith.constant 0 : i32
    return %c0_i32, %arg0 : i32, i32
  }
  func.func @transform_2(%arg0: i32) -> (i32, i32) {
    %c0_i32 = arith.constant 0 : i32
    %c0_i32_0 = arith.constant 0 : i32
    %c0_i32_1 = arith.constant 0 : i32
    return %c0_i32, %c0_i32_0 : i32, i32
  }
  func.func @transform_3(%arg0: i32) -> (i32, i32) {
    %c0_i32 = arith.constant 0 : i32
    %c0_i32_0 = arith.constant 0 : i32
    return %c0_i32, %arg0 : i32, i32
  }
}

module attributes {stable_mosaic.version = 11 : i64} {
  func.func @_conv_gemm_kernel(%arg0: i32, %arg1: memref<64x576xf32, #tpu.memory_space<vmem>>, %arg2: memref<576x128xf32, #tpu.memory_space<vmem>>, %arg3: memref<64x1xf32, #tpu.memory_space<vmem>>, %arg4: memref<64x128xf32, #tpu.memory_space<vmem>>) attributes {dimension_semantics = [#tpu.dimension_semantics<parallel>], iteration_bounds = array<i64: 1>, scalar_prefetch = 0 : i64, scratch_operands = 0 : i64, tpu.core_type = #tpu.core_type<tc>, window_params = [{pipeline_mode = #tpu.pipeline_mode<synchronous>, transform_indices = @transform_0, window_bounds = array<i64: 64, 576>}, {transform_indices = @transform_1, window_bounds = array<i64: 576, 128>}, {pipeline_mode = #tpu.pipeline_mode<synchronous>, transform_indices = @transform_2, window_bounds = array<i64: 64, 1>}, {transform_indices = @transform_3, window_bounds = array<i64: 64, 128>}]} {
    %c0 = arith.constant 0 : index
    %c0_0 = arith.constant 0 : index
    %0 = vector.load %arg1[%c0, %c0_0] : memref<64x576xf32, #tpu.memory_space<vmem>>, vector<64x576xf32>
    %c0_1 = arith.constant 0 : index
    %c0_2 = arith.constant 0 : index
    %1 = vector.load %arg2[%c0_1, %c0_2] : memref<576x128xf32, #tpu.memory_space<vmem>>, vector<576x128xf32>
    %cst = arith.constant dense<0.000000e+00> : vector<64x128xf32>
    %2 = tpu.matmul %0, %1, %cst {dimension_numbers = #tpu.dot_dimension_numbers<[1], [0], [0], [1], [0, 0, 1, 1], [], []>} : vector<64x576xf32>, vector<576x128xf32>, vector<64x128xf32> -> vector<64x128xf32>
    %c0_3 = arith.constant 0 : index
    %c0_4 = arith.constant 0 : index
    %3 = vector.load %arg3[%c0_3, %c0_4] : memref<64x1xf32, #tpu.memory_space<vmem>>, vector<64x1xf32>
    %4 = vector.broadcast %3 : vector<64x1xf32> to vector<64x128xf32>
    %5 = arith.addf %2, %4 : vector<64x128xf32>
    %cst_5 = arith.constant 0.000000e+00 : f32
    %6 = vector.broadcast %cst_5 : f32 to vector<64x128xf32>
    %7 = arith.maximumf %5, %6 : vector<64x128xf32>
    %c0_6 = arith.constant 0 : index
    %c0_7 = arith.constant 0 : index
    %8 = vector.load %arg4[%c0_6, %c0_7] : memref<64x128xf32, #tpu.memory_space<vmem>>, vector<64x128xf32>
    tpu.vector_store %arg4[%c0_6, %c0_7], %7 {strides = array<i32>} : memref<64x128xf32, #tpu.memory_space<vmem>>, vector<64x128xf32>,
    return
  }
  func.func @transform_0(%arg0: i32) -> (i32, i32) {
    %c0_i32 = arith.constant 0 : i32
    %c0_i32_0 = arith.constant 0 : i32
    %c0_i32_1 = arith.constant 0 : i32
    return %c0_i32, %c0_i32_0 : i32, i32
  }
  func.func @transform_1(%arg0: i32) -> (i32, i32) {
    %c0_i32 = arith.constant 0 : i32
    %c0_i32_0 = arith.constant 0 : i32
    return %c0_i32, %arg0 : i32, i32
  }
  func.func @transform_2(%arg0: i32) -> (i32, i32) {
    %c0_i32 = arith.constant 0 : i32
    %c0_i32_0 = arith.constant 0 : i32
    %c0_i32_1 = arith.constant 0 : i32
    return %c0_i32, %c0_i32_0 : i32, i32
  }
  func.func @transform_3(%arg0: i32) -> (i32, i32) {
    %c0_i32 = arith.constant 0 : i32
    %c0_i32_0 = arith.constant 0 : i32
    return %c0_i32, %arg0 : i32, i32
  }
}

module attributes {stable_mosaic.version = 11 : i64} {
  func.func @_fc_fused_kernel(%arg0: i32, %arg1: memref<2x1024xf32, #tpu.memory_space<vmem>>, %arg2: memref<1024x512xf32, #tpu.memory_space<vmem>>, %arg3: memref<1x512xf32, #tpu.memory_space<vmem>>, %arg4: memref<512x5xf32, #tpu.memory_space<vmem>>, %arg5: memref<1x5xf32, #tpu.memory_space<vmem>>, %arg6: memref<2x5xf32, #tpu.memory_space<vmem>>, %arg7: memref<2x512xf32, #tpu.memory_space<vmem>>) attributes {dimension_semantics = [#tpu.dimension_semantics<arbitrary>], iteration_bounds = array<i64: 4>, scalar_prefetch = 0 : i64, scratch_operands = 1 : i64, tpu.core_type = #tpu.core_type<tc>, window_params = [{transform_indices = @transform_0, window_bounds = array<i64: 2, 1024>}, {transform_indices = @transform_1, window_bounds = array<i64: 1024, 512>}, {pipeline_mode = #tpu.pipeline_mode<synchronous>, transform_indices = @transform_2, window_bounds = array<i64: 1, 512>}, {pipeline_mode = #tpu.pipeline_mode<synchronous>, transform_indices = @transform_3, window_bounds = array<i64: 512, 5>}, {pipeline_mode = #tpu.pipeline_mode<synchronous>, transform_indices = @transform_4, window_bounds = array<i64: 1, 5>}, {pipeline_mode = #tpu.pipeline_mode<synchronous>, transform_indices = @transform_5, window_bounds = array<i64: 2, 5>}]} {
    %c0_i32 = arith.constant 0 : i32
    %0 = arith.cmpi eq, %arg0, %c0_i32 : i32
    %1 = arith.extui %0 : i1 to i32
    %c0_i32_0 = arith.constant 0 : i32
    %2 = arith.cmpi ne, %1, %c0_i32_0 : i32
    scf.if %2 {
      %cst_9 = arith.constant 0.000000e+00 : f32
      %12 = vector.broadcast %cst_9 : f32 to vector<2x512xf32>
      %c0_10 = arith.constant 0 : index
      %c0_11 = arith.constant 0 : index
      %13 = vector.load %arg7[%c0_10, %c0_11] : memref<2x512xf32, #tpu.memory_space<vmem>>, vector<2x512xf32>
      tpu.vector_store %arg7[%c0_10, %c0_11], %12 {strides = array<i32>} : memref<2x512xf32, #tpu.memory_space<vmem>>, vector<2x512xf32>,
    } else {
    }
    %c0 = arith.constant 0 : index
    %c0_1 = arith.constant 0 : index
    %3 = vector.load %arg7[%c0, %c0_1] : memref<2x512xf32, #tpu.memory_space<vmem>>, vector<2x512xf32>
    %c0_2 = arith.constant 0 : index
    %c0_3 = arith.constant 0 : index
    %4 = vector.load %arg1[%c0_2, %c0_3] : memref<2x1024xf32, #tpu.memory_space<vmem>>, vector<2x1024xf32>
    %c0_4 = arith.constant 0 : index
    %c0_5 = arith.constant 0 : index
    %5 = vector.load %arg2[%c0_4, %c0_5] : memref<1024x512xf32, #tpu.memory_space<vmem>>, vector<1024x512xf32>
    %cst = arith.constant dense<0.000000e+00> : vector<2x512xf32>
    %6 = tpu.matmul %4, %5, %cst {dimension_numbers = #tpu.dot_dimension_numbers<[1], [0], [0], [1], [0, 0, 1, 1], [], []>} : vector<2x1024xf32>, vector<1024x512xf32>, vector<2x512xf32> -> vector<2x512xf32>
    %7 = arith.addf %3, %6 : vector<2x512xf32>
    %c0_6 = arith.constant 0 : index
    %c0_7 = arith.constant 0 : index
    %8 = vector.load %arg7[%c0_6, %c0_7] : memref<2x512xf32, #tpu.memory_space<vmem>>, vector<2x512xf32>
    tpu.vector_store %arg7[%c0_6, %c0_7], %7 {strides = array<i32>} : memref<2x512xf32, #tpu.memory_space<vmem>>, vector<2x512xf32>,
    %c3_i32 = arith.constant 3 : i32
    %9 = arith.cmpi eq, %arg0, %c3_i32 : i32
    %10 = arith.extui %9 : i1 to i32
    %c0_i32_8 = arith.constant 0 : i32
    %11 = arith.cmpi ne, %10, %c0_i32_8 : i32
    scf.if %11 {
      %c0_9 = arith.constant 0 : index
      %c0_10 = arith.constant 0 : index
      %12 = vector.load %arg7[%c0_9, %c0_10] : memref<2x512xf32, #tpu.memory_space<vmem>>, vector<2x512xf32>
      %c0_11 = arith.constant 0 : index
      %c0_12 = arith.constant 0 : index
      %13 = vector.load %arg3[%c0_11, %c0_12] : memref<1x512xf32, #tpu.memory_space<vmem>>, vector<1x512xf32>
      %14 = vector.broadcast %13 : vector<1x512xf32> to vector<2x512xf32>
      %15 = arith.addf %12, %14 : vector<2x512xf32>
      %cst_13 = arith.constant 0.000000e+00 : f32
      %16 = vector.broadcast %cst_13 : f32 to vector<2x512xf32>
      %17 = arith.maximumf %15, %16 : vector<2x512xf32>
      %c0_14 = arith.constant 0 : index
      %c0_15 = arith.constant 0 : index
      %18 = vector.load %arg4[%c0_14, %c0_15] : memref<512x5xf32, #tpu.memory_space<vmem>>, vector<512x5xf32>
      %cst_16 = arith.constant dense<0.000000e+00> : vector<2x5xf32>
      %19 = tpu.matmul %17, %18, %cst_16 {dimension_numbers = #tpu.dot_dimension_numbers<[1], [0], [0], [1], [0, 0, 1, 1], [], []>} : vector<2x512xf32>, vector<512x5xf32>, vector<2x5xf32> -> vector<2x5xf32>
      %c0_17 = arith.constant 0 : index
      %c0_18 = arith.constant 0 : index
      %20 = vector.load %arg5[%c0_17, %c0_18] : memref<1x5xf32, #tpu.memory_space<vmem>>, vector<1x5xf32>
      %21 = vector.broadcast %20 : vector<1x5xf32> to vector<2x5xf32>
      %22 = arith.addf %19, %21 : vector<2x5xf32>
      %c0_19 = arith.constant 0 : index
      %c0_20 = arith.constant 0 : index
      %23 = vector.load %arg6[%c0_19, %c0_20] : memref<2x5xf32, #tpu.memory_space<vmem>>, vector<2x5xf32>
      tpu.vector_store %arg6[%c0_19, %c0_20], %22 {strides = array<i32>} : memref<2x5xf32, #tpu.memory_space<vmem>>, vector<2x5xf32>,
    } else {
    }
    return
  }
  func.func @transform_0(%arg0: i32) -> (i32, i32) {
    %c0_i32 = arith.constant 0 : i32
    %c0_i32_0 = arith.constant 0 : i32
    return %c0_i32, %arg0 : i32, i32
  }
  func.func @transform_1(%arg0: i32) -> (i32, i32) {
    %c0_i32 = arith.constant 0 : i32
    %c0_i32_0 = arith.constant 0 : i32
    return %arg0, %c0_i32 : i32, i32
  }
  func.func @transform_2(%arg0: i32) -> (i32, i32) {
    %c0_i32 = arith.constant 0 : i32
    %c0_i32_0 = arith.constant 0 : i32
    %c0_i32_1 = arith.constant 0 : i32
    return %c0_i32, %c0_i32_0 : i32, i32
  }
  func.func @transform_3(%arg0: i32) -> (i32, i32) {
    %c0_i32 = arith.constant 0 : i32
    %c0_i32_0 = arith.constant 0 : i32
    %c0_i32_1 = arith.constant 0 : i32
    return %c0_i32, %c0_i32_0 : i32, i32
  }
  func.func @transform_4(%arg0: i32) -> (i32, i32) {
    %c0_i32 = arith.constant 0 : i32
    %c0_i32_0 = arith.constant 0 : i32
    %c0_i32_1 = arith.constant 0 : i32
    return %c0_i32, %c0_i32_0 : i32, i32
  }
  func.func @transform_5(%arg0: i32) -> (i32, i32) {
    %c0_i32 = arith.constant 0 : i32
    %c0_i32_0 = arith.constant 0 : i32
    %c0_i32_1 = arith.constant 0 : i32
    return %c0_i32, %c0_i32_0 : i32, i32
  }
}

</mosaic_0001>

<bundles_post_ra>
// kernel: cnn_forward.4
= control target key start
LH: loop header
LB: loop body
LE: loop exit
PB: predicated region body
PF: predicated region fallthrough
CT: control target
= control target key end

     0   :  { %s1266_s12 = smov 0   ;;  %s1268_s13 = smov 0   ;;  %s2002_s0 = inlined_call_operand.vmem [shape: f32[32,256], index: 0, kind: input, shape index: {}]   ;;  %s2003_s1 = inlined_call_operand.vmem [shape: f32[256,1280], index: 1, kind: input, shape index: {}]   ;;  %s2004_s2 = inlined_call_operand.vmem [shape: f32[32,1], index: 2, kind: input, shape index: {}]   ;;  %s2005_s3 = inlined_call_operand.vmem [shape: f32[32,1280], index: 3, kind: output, shape index: {}]  }
   0x1   :  { %s1270_s14 = smov 0  }
   0x2 LB: > { %s1148_s15 = sadd.s32 4294967295, %s1243_s14   ;;  %s1283_s16 = sadd.s32 1, %s1243_s14   ;;  %s1243_s14 = sphi %s1270_s14, %s2009_s14   ;;  %s1239_s13 = sphi %s1268_s13, %s2008_s13   ;;  %s1235_s12 = sphi %s1266_s12, %s2007_s12  }
   0x3   : > { %s38_s17 = ssub.s32 %s1243_s14, %s1283_s16  ;;  %s41_s18 = sadd.s32 1, %s1239_s13 }
   0x4   : > { %p39_p0 = scmp.eq.s32.totalorder %s38_s17, 0  ;;  %p48_p1 = scmp.ne.s32.totalorder %s1239_s13, %s1235_s12 }
   0x5   : > { %p49_p2 = scmp.eq.s32.totalorder %s1243_s14, 0  ;;  %p99_p3 = scmp.eq.s32.totalorder %s1148_s15, 1 }
   0x6   : > { %s1294_s19 = scalar_select %p39_p0, %s1239_s13, %s41_s18  }
   0x7   : > { %p50_p4 = por %p49_p2, %p48_p1  ;;  %p1296_p5 = por %p99_p3, %p48_p1 }
   0x8   : > { %p1151_p6 = scmp.ge.s32.totalorder %s1243_s14, 2 }
   0xa   : > { %127 = sbr.rel (%p1151_p6) target bundleno = 180 (0xb4), region = 24 }
   0xf   : > { %130 = sbr.rel (!%p50_p4) target bundleno = 180 (0xb4), region = 28  ;;  %s132_s21 = sand.u32 (%p50_p4), 1, %s1239_s13  }
  0x10   : > { %s1157_s22 = smul.u32 (%p50_p4), 40, %s1243_s14 }
  0x11   : > { %s1191_s23 = smul.u32 (%p50_p4), 1280, %s132_s21 }
  0x12   : > { %s1306_s26 = scalar_lea.vmem (%p50_p4), %s2003_s1, %s1157_s22 }
  0x13   : > { %v150_v0 = vld [vmem:[%s1306_s26] sm:$0xff] (%p50_p4)  ;;  %v152_v1 = vld [vmem:[%s1306_s26 + $0x8] sm:$0xff] (%p50_p4)  ;;  %v154_v2 = vld [vmem:[%s1306_s26 + $0x10] sm:$0xff] (%p50_p4)  ;;  %s1311_s27 = scalar_lea.vmem (%p50_p4), [#allocation2], %s1191_s23 }
  0x14   : > { %151 = vst [vmem:[%s1311_s27] sm:$0xff] %v150_v0  ;;  %v156_v3 = vld [vmem:[%s1306_s26 + $0x18] sm:$0xff]  ;;  %v158_v4 = vld [vmem:[%s1306_s26 + $0x20] sm:$0xff]  ;;  %v160_v5 = vld [vmem:[%s1306_s26 + $0x50] sm:$0xff] }
  0x15   : > { %153 = vst [vmem:[%s1311_s27 + $0x8] sm:$0xff] %v152_v1  ;;  %v162_v6 = vld [vmem:[%s1306_s26 + $0x58] sm:$0xff]  ;;  %v164_v7 = vld [vmem:[%s1306_s26 + $0x60] sm:$0xff]  ;;  %v166_v8 = vld [vmem:[%s1306_s26 + $0x68] sm:$0xff] }
  0x16   : > { %155 = vst [vmem:[%s1311_s27 + $0x10] sm:$0xff] %v154_v2  ;;  %v168_v9 = vld [vmem:[%s1306_s26 + $0x70] sm:$0xff]  ;;  %v170_v10 = vld [vmem:[%s1306_s26 + $0xa0] sm:$0xff]  ;;  %v172_v11 = vld [vmem:[%s1306_s26 + $0xa8] sm:$0xff] }
  0x17   : > { %157 = vst [vmem:[%s1311_s27 + $0x18] sm:$0xff] %v156_v3  ;;  %v174_v12 = vld [vmem:[%s1306_s26 + $0xb0] sm:$0xff]  ;;  %v176_v13 = vld [vmem:[%s1306_s26 + $0xb8] sm:$0xff]  ;;  %v178_v14 = vld [vmem:[%s1306_s26 + $0xc0] sm:$0xff] }
  0x18   : > { %159 = vst [vmem:[%s1311_s27 + $0x20] sm:$0xff] %v158_v4  ;;  %v180_v15 = vld [vmem:[%s1306_s26 + $0xf0] sm:$0xff]  ;;  %v182_v16 = vld [vmem:[%s1306_s26 + $0xf8] sm:$0xff]  ;;  %v184_v17 = vld [vmem:[%s1306_s26 + $0x100] sm:$0xff] }
  0x19   : > { %161 = vst [vmem:[%s1311_s27 + $0x28] sm:$0xff] %v160_v5  ;;  %v186_v18 = vld [vmem:[%s1306_s26 + $0x108] sm:$0xff]  ;;  %v188_v19 = vld [vmem:[%s1306_s26 + $0x110] sm:$0xff]  ;;  %v190_v20 = vld [vmem:[%s1306_s26 + $0x140] sm:$0xff] }
  0x1a   : > { %163 = vst [vmem:[%s1311_s27 + $0x30] sm:$0xff] %v162_v6  ;;  %v192_v21 = vld [vmem:[%s1306_s26 + $0x148] sm:$0xff]  ;;  %v194_v22 = vld [vmem:[%s1306_s26 + $0x150] sm:$0xff]  ;;  %v196_v23 = vld [vmem:[%s1306_s26 + $0x158] sm:$0xff] }
  0x1b   : > { %165 = vst [vmem:[%s1311_s27 + $0x38] sm:$0xff] %v164_v7  ;;  %v198_v24 = vld [vmem:[%s1306_s26 + $0x160] sm:$0xff]  ;;  %v200_v25 = vld [vmem:[%s1306_s26 + $0x190] sm:$0xff]  ;;  %v202_v26 = vld [vmem:[%s1306_s26 + $0x198] sm:$0xff] }
  0x1c   : > { %167 = vst [vmem:[%s1311_s27 + $0x40] sm:$0xff] %v166_v8  ;;  %v204_v27 = vld [vmem:[%s1306_s26 + $0x1a0] sm:$0xff]  ;;  %v206_v28 = vld [vmem:[%s1306_s26 + $0x1a8] sm:$0xff]  ;;  %v208_v29 = vld [vmem:[%s1306_s26 + $0x1b0] sm:$0xff] }
  0x1d   : > { %169 = vst [vmem:[%s1311_s27 + $0x48] sm:$0xff] %v168_v9  ;;  %v210_v30 = vld [vmem:[%s1306_s26 + $0x1e0] sm:$0xff]  ;;  %v212_v31 = vld [vmem:[%s1306_s26 + $0x1e8] sm:$0xff]  ;;  %v214_v32 = vld [vmem:[%s1306_s26 + $0x1f0] sm:$0xff] }
  0x1e   : > { %171 = vst [vmem:[%s1311_s27 + $0x50] sm:$0xff] %v170_v10  ;;  %v216_v33 = vld [vmem:[%s1306_s26 + $0x1f8] sm:$0xff]  ;;  %v218_v34 = vld [vmem:[%s1306_s26 + $0x200] sm:$0xff]  ;;  %v220_v35 = vld [vmem:[%s1306_s26 + $0x230] sm:$0xff] }
  0x1f   : > { %173 = vst [vmem:[%s1311_s27 + $0x58] sm:$0xff] %v172_v11  ;;  %v222_v36 = vld [vmem:[%s1306_s26 + $0x238] sm:$0xff]  ;;  %v224_v37 = vld [vmem:[%s1306_s26 + $0x240] sm:$0xff]  ;;  %v226_v38 = vld [vmem:[%s1306_s26 + $0x248] sm:$0xff] }
  0x20   : > { %175 = vst [vmem:[%s1311_s27 + $0x60] sm:$0xff] %v174_v12  ;;  %v228_v39 = vld [vmem:[%s1306_s26 + $0x250] sm:$0xff]  ;;  %v230_v40 = vld [vmem:[%s1306_s26 + $0x280] sm:$0xff]  ;;  %v232_v41 = vld [vmem:[%s1306_s26 + $0x288] sm:$0xff] }
  0x21   : > { %177 = vst [vmem:[%s1311_s27 + $0x68] sm:$0xff] %v176_v13  ;;  %v234_v42 = vld [vmem:[%s1306_s26 + $0x290] sm:$0xff]  ;;  %v236_v43 = vld [vmem:[%s1306_s26 + $0x298] sm:$0xff]  ;;  %v238_v44 = vld [vmem:[%s1306_s26 + $0x2a0] sm:$0xff] }
  0x22   : > { %179 = vst [vmem:[%s1311_s27 + $0x70] sm:$0xff] %v178_v14  ;;  %v240_v45 = vld [vmem:[%s1306_s26 + $0x2d0] sm:$0xff]  ;;  %v242_v46 = vld [vmem:[%s1306_s26 + $0x2d8] sm:$0xff]  ;;  %v244_v47 = vld [vmem:[%s1306_s26 + $0x2e0] sm:$0xff] }
  0x23   : > { %181 = vst [vmem:[%s1311_s27 + $0x78] sm:$0xff] %v180_v15  ;;  %v246_v48 = vld [vmem:[%s1306_s26 + $0x2e8] sm:$0xff]  ;;  %v248_v49 = vld [vmem:[%s1306_s26 + $0x2f0] sm:$0xff]  ;;  %v250_v50 = vld [vmem:[%s1306_s26 + $0x320] sm:$0xff] }
  0x24   : > { %183 = vst [vmem:[%s1311_s27 + $0x80] sm:$0xff] %v182_v16  ;;  %v252_v51 = vld [vmem:[%s1306_s26 + $0x328] sm:$0xff]  ;;  %v254_v52 = vld [vmem:[%s1306_s26 + $0x330] sm:$0xff]  ;;  %v256_v53 = vld [vmem:[%s1306_s26 + $0x338] sm:$0xff] }
  0x25   : > { %185 = vst [vmem:[%s1311_s27 + $0x88] sm:$0xff] %v184_v17  ;;  %v258_v54 = vld [vmem:[%s1306_s26 + $0x340] sm:$0xff]  ;;  %v260_v55 = vld [vmem:[%s1306_s26 + $0x370] sm:$0xff]  ;;  %v262_v56 = vld [vmem:[%s1306_s26 + $0x378] sm:$0xff] }
  0x26   : > { %187 = vst [vmem:[%s1311_s27 + $0x90] sm:$0xff] %v186_v18  ;;  %v264_v57 = vld [vmem:[%s1306_s26 + $0x380] sm:$0xff]  ;;  %v266_v58 = vld [vmem:[%s1306_s26 + $0x388] sm:$0xff]  ;;  %v268_v59 = vld [vmem:[%s1306_s26 + $0x390] sm:$0xff] }
  0x27   : > { %189 = vst [vmem:[%s1311_s27 + $0x98] sm:$0xff] %v188_v19  ;;  %v270_v60 = vld [vmem:[%s1306_s26 + $0x3c0] sm:$0xff]  ;;  %v272_v61 = vld [vmem:[%s1306_s26 + $0x3c8] sm:$0xff]  ;;  %v274_v62 = vld [vmem:[%s1306_s26 + $0x3d0] sm:$0xff] }
  0x28   : > { %191 = vst [vmem:[%s1311_s27 + $0xa0] sm:$0xff] %v190_v20  ;;  %v276_v63 = vld [vmem:[%s1306_s26 + $0x3d8] sm:$0xff]  ;;  %v278_v0 = vld [vmem:[%s1306_s26 + $0x3e0] sm:$0xff]  ;;  %v280_v1 = vld [vmem:[%s1306_s26 + $0x410] sm:$0xff] }
  0x29   : > { %193 = vst [vmem:[%s1311_s27 + $0xa8] sm:$0xff] %v192_v21  ;;  %v282_v2 = vld [vmem:[%s1306_s26 + $0x418] sm:$0xff]  ;;  %v284_v3 = vld [vmem:[%s1306_s26 + $0x420] sm:$0xff]  ;;  %v286_v4 = vld [vmem:[%s1306_s26 + $0x428] sm:$0xff] }
  0x2a   : > { %195 = vst [vmem:[%s1311_s27 + $0xb0] sm:$0xff] %v194_v22  ;;  %v288_v5 = vld [vmem:[%s1306_s26 + $0x430] sm:$0xff]  ;;  %v290_v6 = vld [vmem:[%s1306_s26 + $0x460] sm:$0xff]  ;;  %v292_v7 = vld [vmem:[%s1306_s26 + $0x468] sm:$0xff] }
  0x2b   : > { %197 = vst [vmem:[%s1311_s27 + $0xb8] sm:$0xff] %v196_v23  ;;  %v294_v8 = vld [vmem:[%s1306_s26 + $0x470] sm:$0xff]  ;;  %v296_v9 = vld [vmem:[%s1306_s26 + $0x478] sm:$0xff]  ;;  %v298_v10 = vld [vmem:[%s1306_s26 + $0x480] sm:$0xff] }
  0x2c   : > { %199 = vst [vmem:[%s1311_s27 + $0xc0] sm:$0xff] %v198_v24  ;;  %v300_v11 = vld [vmem:[%s1306_s26 + $0x4b0] sm:$0xff]  ;;  %v302_v12 = vld [vmem:[%s1306_s26 + $0x4b8] sm:$0xff]  ;;  %v304_v13 = vld [vmem:[%s1306_s26 + $0x4c0] sm:$0xff] }
  0x2d   : > { %201 = vst [vmem:[%s1311_s27 + $0xc8] sm:$0xff] %v200_v25  ;;  %v306_v14 = vld [vmem:[%s1306_s26 + $0x4c8] sm:$0xff]  ;;  %v308_v15 = vld [vmem:[%s1306_s26 + $0x4d0] sm:$0xff]  ;;  %v310_v16 = vld [vmem:[%s1306_s26 + $0x500] sm:$0xff] }
  0x2e   : > { %203 = vst [vmem:[%s1311_s27 + $0xd0] sm:$0xff] %v202_v26  ;;  %v312_v17 = vld [vmem:[%s1306_s26 + $0x508] sm:$0xff]  ;;  %v314_v18 = vld [vmem:[%s1306_s26 + $0x510] sm:$0xff]  ;;  %v316_v19 = vld [vmem:[%s1306_s26 + $0x518] sm:$0xff] }
  0x2f   : > { %205 = vst [vmem:[%s1311_s27 + $0xd8] sm:$0xff] %v204_v27  ;;  %v318_v20 = vld [vmem:[%s1306_s26 + $0x520] sm:$0xff]  ;;  %v320_v21 = vld [vmem:[%s1306_s26 + $0x550] sm:$0xff]  ;;  %v322_v22 = vld [vmem:[%s1306_s26 + $0x558] sm:$0xff] }
  0x30   : > { %207 = vst [vmem:[%s1311_s27 + $0xe0] sm:$0xff] %v206_v28  ;;  %v324_v23 = vld [vmem:[%s1306_s26 + $0x560] sm:$0xff]  ;;  %v326_v24 = vld [vmem:[%s1306_s26 + $0x568] sm:$0xff]  ;;  %v328_v25 = vld [vmem:[%s1306_s26 + $0x570] sm:$0xff] }
  0x31   : > { %209 = vst [vmem:[%s1311_s27 + $0xe8] sm:$0xff] %v208_v29  ;;  %v330_v26 = vld [vmem:[%s1306_s26 + $0x5a0] sm:$0xff]  ;;  %v332_v27 = vld [vmem:[%s1306_s26 + $0x5a8] sm:$0xff]  ;;  %v334_v28 = vld [vmem:[%s1306_s26 + $0x5b0] sm:$0xff] }
  0x32   : > { %211 = vst [vmem:[%s1311_s27 + $0xf0] sm:$0xff] %v210_v30  ;;  %v336_v29 = vld [vmem:[%s1306_s26 + $0x5b8] sm:$0xff]  ;;  %v338_v30 = vld [vmem:[%s1306_s26 + $0x5c0] sm:$0xff] }
  0x33   : > { %213 = vst [vmem:[%s1311_s27 + $0xf8] sm:$0xff] %v212_v31  ;;  %v340_v31 = vld [vmem:[%s1306_s26 + $0x5f0] sm:$0xff] }
  0x34   : > { %215 = vst [vmem:[%s1311_s27 + $0x100] sm:$0xff] %v214_v32  ;;  %v342_v32 = vld [vmem:[%s1306_s26 + $0x5f8] sm:$0xff] }
  0x35   : > { %217 = vst [vmem:[%s1311_s27 + $0x108] sm:$0xff] %v216_v33  ;;  %v344_v33 = vld [vmem:[%s1306_s26 + $0x600] sm:$0xff] }
  0x36   : > { %219 = vst [vmem:[%s1311_s27 + $0x110] sm:$0xff] %v218_v34  ;;  %v346_v34 = vld [vmem:[%s1306_s26 + $0x608] sm:$0xff] }
  0x37   : > { %221 = vst [vmem:[%s1311_s27 + $0x118] sm:$0xff] %v220_v35  ;;  %v348_v35 = vld [vmem:[%s1306_s26 + $0x610] sm:$0xff] }
  0x38   : > { %223 = vst [vmem:[%s1311_s27 + $0x120] sm:$0xff] %v222_v36  ;;  %v350_v36 = vld [vmem:[%s1306_s26 + $0x640] sm:$0xff] }
  0x39   : > { %225 = vst [vmem:[%s1311_s27 + $0x128] sm:$0xff] %v224_v37  ;;  %v352_v37 = vld [vmem:[%s1306_s26 + $0x648] sm:$0xff] }
  0x3a   : > { %227 = vst [vmem:[%s1311_s27 + $0x130] sm:$0xff] %v226_v38  ;;  %v354_v38 = vld [vmem:[%s1306_s26 + $0x650] sm:$0xff] }
  0x3b   : > { %229 = vst [vmem:[%s1311_s27 + $0x138] sm:$0xff] %v228_v39  ;;  %v356_v39 = vld [vmem:[%s1306_s26 + $0x658] sm:$0xff] }
  0x3c   : > { %231 = vst [vmem:[%s1311_s27 + $0x140] sm:$0xff] %v230_v40  ;;  %v358_v40 = vld [vmem:[%s1306_s26 + $0x660] sm:$0xff] }
  0x3d   : > { %233 = vst [vmem:[%s1311_s27 + $0x148] sm:$0xff] %v232_v41  ;;  %v360_v41 = vld [vmem:[%s1306_s26 + $0x690] sm:$0xff] }
  0x3e   : > { %235 = vst [vmem:[%s1311_s27 + $0x150] sm:$0xff] %v234_v42  ;;  %v362_v42 = vld [vmem:[%s1306_s26 + $0x698] sm:$0xff] }
  0x3f   : > { %237 = vst [vmem:[%s1311_s27 + $0x158] sm:$0xff] %v236_v43  ;;  %v364_v43 = vld [vmem:[%s1306_s26 + $0x6a0] sm:$0xff] }
  0x40   : > { %239 = vst [vmem:[%s1311_s27 + $0x160] sm:$0xff] %v238_v44  ;;  %v366_v44 = vld [vmem:[%s1306_s26 + $0x6a8] sm:$0xff] }
  0x41   : > { %241 = vst [vmem:[%s1311_s27 + $0x168] sm:$0xff] %v240_v45  ;;  %v368_v45 = vld [vmem:[%s1306_s26 + $0x6b0] sm:$0xff] }
  0x42   : > { %243 = vst [vmem:[%s1311_s27 + $0x170] sm:$0xff] %v242_v46  ;;  %v370_v46 = vld [vmem:[%s1306_s26 + $0x6e0] sm:$0xff] }
  0x43   : > { %245 = vst [vmem:[%s1311_s27 + $0x178] sm:$0xff] %v244_v47  ;;  %v372_v47 = vld [vmem:[%s1306_s26 + $0x6e8] sm:$0xff] }
  0x44   : > { %247 = vst [vmem:[%s1311_s27 + $0x180] sm:$0xff] %v246_v48  ;;  %v374_v48 = vld [vmem:[%s1306_s26 + $0x6f0] sm:$0xff] }
  0x45   : > { %249 = vst [vmem:[%s1311_s27 + $0x188] sm:$0xff] %v248_v49  ;;  %v376_v49 = vld [vmem:[%s1306_s26 + $0x6f8] sm:$0xff] }
  0x46   : > { %251 = vst [vmem:[%s1311_s27 + $0x190] sm:$0xff] %v250_v50  ;;  %v378_v50 = vld [vmem:[%s1306_s26 + $0x700] sm:$0xff] }
  0x47   : > { %253 = vst [vmem:[%s1311_s27 + $0x198] sm:$0xff] %v252_v51  ;;  %v380_v51 = vld [vmem:[%s1306_s26 + $0x730] sm:$0xff] }
  0x48   : > { %255 = vst [vmem:[%s1311_s27 + $0x1a0] sm:$0xff] %v254_v52  ;;  %v382_v52 = vld [vmem:[%s1306_s26 + $0x738] sm:$0xff] }
  0x49   : > { %257 = vst [vmem:[%s1311_s27 + $0x1a8] sm:$0xff] %v256_v53  ;;  %v384_v53 = vld [vmem:[%s1306_s26 + $0x740] sm:$0xff] }
  0x4a   : > { %259 = vst [vmem:[%s1311_s27 + $0x1b0] sm:$0xff] %v258_v54  ;;  %v386_v54 = vld [vmem:[%s1306_s26 + $0x748] sm:$0xff] }
  0x4b   : > { %261 = vst [vmem:[%s1311_s27 + $0x1b8] sm:$0xff] %v260_v55  ;;  %v388_v55 = vld [vmem:[%s1306_s26 + $0x750] sm:$0xff] }
  0x4c   : > { %263 = vst [vmem:[%s1311_s27 + $0x1c0] sm:$0xff] %v262_v56  ;;  %v390_v56 = vld [vmem:[%s1306_s26 + $0x780] sm:$0xff] }
  0x4d   : > { %265 = vst [vmem:[%s1311_s27 + $0x1c8] sm:$0xff] %v264_v57  ;;  %v392_v57 = vld [vmem:[%s1306_s26 + $0x788] sm:$0xff] }
  0x4e   : > { %267 = vst [vmem:[%s1311_s27 + $0x1d0] sm:$0xff] %v266_v58  ;;  %v394_v58 = vld [vmem:[%s1306_s26 + $0x790] sm:$0xff] }
  0x4f   : > { %269 = vst [vmem:[%s1311_s27 + $0x1d8] sm:$0xff] %v268_v59  ;;  %v396_v59 = vld [vmem:[%s1306_s26 + $0x798] sm:$0xff] }
  0x50   : > { %271 = vst [vmem:[%s1311_s27 + $0x1e0] sm:$0xff] %v270_v60  ;;  %v398_v60 = vld [vmem:[%s1306_s26 + $0x7a0] sm:$0xff] }
  0x51   : > { %273 = vst [vmem:[%s1311_s27 + $0x1e8] sm:$0xff] %v272_v61  ;;  %v400_v61 = vld [vmem:[%s1306_s26 + $0x7d0] sm:$0xff] }
  0x52   : > { %275 = vst [vmem:[%s1311_s27 + $0x1f0] sm:$0xff] %v274_v62  ;;  %v402_v62 = vld [vmem:[%s1306_s26 + $0x7d8] sm:$0xff] }
  0x53   : > { %277 = vst [vmem:[%s1311_s27 + $0x1f8] sm:$0xff] %v276_v63  ;;  %v404_v63 = vld [vmem:[%s1306_s26 + $0x7e0] sm:$0xff] }
  0x54   : > { %279 = vst [vmem:[%s1311_s27 + $0x200] sm:$0xff] %v278_v0  ;;  %v406_v0 = vld [vmem:[%s1306_s26 + $0x7e8] sm:$0xff] }
  0x55   : > { %281 = vst [vmem:[%s1311_s27 + $0x208] sm:$0xff] %v280_v1  ;;  %v408_v1 = vld [vmem:[%s1306_s26 + $0x7f0] sm:$0xff] }
  0x56   : > { %283 = vst [vmem:[%s1311_s27 + $0x210] sm:$0xff] %v282_v2  ;;  %v410_v2 = vld [vmem:[%s1306_s26 + $0x820] sm:$0xff] }
  0x57   : > { %285 = vst [vmem:[%s1311_s27 + $0x218] sm:$0xff] %v284_v3  ;;  %v412_v3 = vld [vmem:[%s1306_s26 + $0x828] sm:$0xff] }
  0x58   : > { %287 = vst [vmem:[%s1311_s27 + $0x220] sm:$0xff] %v286_v4  ;;  %v414_v4 = vld [vmem:[%s1306_s26 + $0x830] sm:$0xff] }
  0x59   : > { %289 = vst [vmem:[%s1311_s27 + $0x228] sm:$0xff] %v288_v5  ;;  %v416_v5 = vld [vmem:[%s1306_s26 + $0x838] sm:$0xff] }
  0x5a   : > { %291 = vst [vmem:[%s1311_s27 + $0x230] sm:$0xff] %v290_v6  ;;  %v418_v6 = vld [vmem:[%s1306_s26 + $0x840] sm:$0xff] }
  0x5b   : > { %293 = vst [vmem:[%s1311_s27 + $0x238] sm:$0xff] %v292_v7  ;;  %v420_v7 = vld [vmem:[%s1306_s26 + $0x870] sm:$0xff] }
  0x5c   : > { %295 = vst [vmem:[%s1311_s27 + $0x240] sm:$0xff] %v294_v8  ;;  %v422_v8 = vld [vmem:[%s1306_s26 + $0x878] sm:$0xff] }
  0x5d   : > { %297 = vst [vmem:[%s1311_s27 + $0x248] sm:$0xff] %v296_v9  ;;  %v424_v9 = vld [vmem:[%s1306_s26 + $0x880] sm:$0xff] }
  0x5e   : > { %299 = vst [vmem:[%s1311_s27 + $0x250] sm:$0xff] %v298_v10  ;;  %v426_v10 = vld [vmem:[%s1306_s26 + $0x888] sm:$0xff] }
  0x5f   : > { %301 = vst [vmem:[%s1311_s27 + $0x258] sm:$0xff] %v300_v11  ;;  %v428_v11 = vld [vmem:[%s1306_s26 + $0x890] sm:$0xff] }
  0x60   : > { %303 = vst [vmem:[%s1311_s27 + $0x260] sm:$0xff] %v302_v12  ;;  %v430_v12 = vld [vmem:[%s1306_s26 + $0x8c0] sm:$0xff] }
  0x61   : > { %305 = vst [vmem:[%s1311_s27 + $0x268] sm:$0xff] %v304_v13  ;;  %v432_v13 = vld [vmem:[%s1306_s26 + $0x8c8] sm:$0xff] }
  0x62   : > { %307 = vst [vmem:[%s1311_s27 + $0x270] sm:$0xff] %v306_v14  ;;  %v434_v14 = vld [vmem:[%s1306_s26 + $0x8d0] sm:$0xff] }
  0x63   : > { %309 = vst [vmem:[%s1311_s27 + $0x278] sm:$0xff] %v308_v15  ;;  %v436_v15 = vld [vmem:[%s1306_s26 + $0x8d8] sm:$0xff] }
  0x64   : > { %311 = vst [vmem:[%s1311_s27 + $0x280] sm:$0xff] %v310_v16  ;;  %v438_v16 = vld [vmem:[%s1306_s26 + $0x8e0] sm:$0xff] }
  0x65   : > { %313 = vst [vmem:[%s1311_s27 + $0x288] sm:$0xff] %v312_v17  ;;  %v440_v17 = vld [vmem:[%s1306_s26 + $0x910] sm:$0xff] }
  0x66   : > { %315 = vst [vmem:[%s1311_s27 + $0x290] sm:$0xff] %v314_v18  ;;  %v442_v18 = vld [vmem:[%s1306_s26 + $0x918] sm:$0xff] }
  0x67   : > { %317 = vst [vmem:[%s1311_s27 + $0x298] sm:$0xff] %v316_v19  ;;  %v444_v19 = vld [vmem:[%s1306_s26 + $0x920] sm:$0xff] }
  0x68   : > { %319 = vst [vmem:[%s1311_s27 + $0x2a0] sm:$0xff] %v318_v20  ;;  %v446_v20 = vld [vmem:[%s1306_s26 + $0x928] sm:$0xff] }
  0x69   : > { %321 = vst [vmem:[%s1311_s27 + $0x2a8] sm:$0xff] %v320_v21  ;;  %v448_v21 = vld [vmem:[%s1306_s26 + $0x930] sm:$0xff] }
  0x6a   : > { %323 = vst [vmem:[%s1311_s27 + $0x2b0] sm:$0xff] %v322_v22  ;;  %v450_v22 = vld [vmem:[%s1306_s26 + $0x960] sm:$0xff] }
  0x6b   : > { %325 = vst [vmem:[%s1311_s27 + $0x2b8] sm:$0xff] %v324_v23  ;;  %v452_v23 = vld [vmem:[%s1306_s26 + $0x968] sm:$0xff] }
  0x6c   : > { %327 = vst [vmem:[%s1311_s27 + $0x2c0] sm:$0xff] %v326_v24  ;;  %v454_v24 = vld [vmem:[%s1306_s26 + $0x970] sm:$0xff] }
  0x6d   : > { %329 = vst [vmem:[%s1311_s27 + $0x2c8] sm:$0xff] %v328_v25  ;;  %v456_v25 = vld [vmem:[%s1306_s26 + $0x978] sm:$0xff] }
  0x6e   : > { %331 = vst [vmem:[%s1311_s27 + $0x2d0] sm:$0xff] %v330_v26  ;;  %v458_v26 = vld [vmem:[%s1306_s26 + $0x980] sm:$0xff] }
  0x6f   : > { %333 = vst [vmem:[%s1311_s27 + $0x2d8] sm:$0xff] %v332_v27  ;;  %v460_v27 = vld [vmem:[%s1306_s26 + $0x9b0] sm:$0xff] }
  0x70   : > { %335 = vst [vmem:[%s1311_s27 + $0x2e0] sm:$0xff] %v334_v28  ;;  %v462_v28 = vld [vmem:[%s1306_s26 + $0x9b8] sm:$0xff] }
  0x71   : > { %337 = vst [vmem:[%s1311_s27 + $0x2e8] sm:$0xff] %v336_v29  ;;  %v464_v29 = vld [vmem:[%s1306_s26 + $0x9c0] sm:$0xff] }
  0x72   : > { %339 = vst [vmem:[%s1311_s27 + $0x2f0] sm:$0xff] %v338_v30  ;;  %v466_v30 = vld [vmem:[%s1306_s26 + $0x9c8] sm:$0xff] }
  0x73   : > { %341 = vst [vmem:[%s1311_s27 + $0x2f8] sm:$0xff] %v340_v31  ;;  %v468_v31 = vld [vmem:[%s1306_s26 + $0x9d0] sm:$0xff] }
  0x74   : > { %343 = vst [vmem:[%s1311_s27 + $0x300] sm:$0xff] %v342_v32 }
  0x75   : > { %345 = vst [vmem:[%s1311_s27 + $0x308] sm:$0xff] %v344_v33 }
  0x76   : > { %347 = vst [vmem:[%s1311_s27 + $0x310] sm:$0xff] %v346_v34 }
  0x77   : > { %349 = vst [vmem:[%s1311_s27 + $0x318] sm:$0xff] %v348_v35 }
  0x78   : > { %351 = vst [vmem:[%s1311_s27 + $0x320] sm:$0xff] %v350_v36 }
  0x79   : > { %353 = vst [vmem:[%s1311_s27 + $0x328] sm:$0xff] %v352_v37 }
  0x7a   : > { %355 = vst [vmem:[%s1311_s27 + $0x330] sm:$0xff] %v354_v38 }
  0x7b   : > { %357 = vst [vmem:[%s1311_s27 + $0x338] sm:$0xff] %v356_v39 }
  0x7c   : > { %359 = vst [vmem:[%s1311_s27 + $0x340] sm:$0xff] %v358_v40 }
  0x7d   : > { %361 = vst [vmem:[%s1311_s27 + $0x348] sm:$0xff] %v360_v41 }
  0x7e   : > { %363 = vst [vmem:[%s1311_s27 + $0x350] sm:$0xff] %v362_v42 }
  0x7f   : > { %365 = vst [vmem:[%s1311_s27 + $0x358] sm:$0xff] %v364_v43 }
  0x80   : > { %367 = vst [vmem:[%s1311_s27 + $0x360] sm:$0xff] %v366_v44 }
  0x81   : > { %369 = vst [vmem:[%s1311_s27 + $0x368] sm:$0xff] %v368_v45 }
  0x82   : > { %371 = vst [vmem:[%s1311_s27 + $0x370] sm:$0xff] %v370_v46 }
  0x83   : > { %373 = vst [vmem:[%s1311_s27 + $0x378] sm:$0xff] %v372_v47 }
  0x84   : > { %375 = vst [vmem:[%s1311_s27 + $0x380] sm:$0xff] %v374_v48 }
  0x85   : > { %377 = vst [vmem:[%s1311_s27 + $0x388] sm:$0xff] %v376_v49 }
  0x86   : > { %379 = vst [vmem:[%s1311_s27 + $0x390] sm:$0xff] %v378_v50 }
  0x87   : > { %381 = vst [vmem:[%s1311_s27 + $0x398] sm:$0xff] %v380_v51 }
  0x88   : > { %383 = vst [vmem:[%s1311_s27 + $0x3a0] sm:$0xff] %v382_v52 }
  0x89   : > { %385 = vst [vmem:[%s1311_s27 + $0x3a8] sm:$0xff] %v384_v53 }
  0x8a   : > { %387 = vst [vmem:[%s1311_s27 + $0x3b0] sm:$0xff] %v386_v54 }
  0x8b   : > { %389 = vst [vmem:[%s1311_s27 + $0x3b8] sm:$0xff] %v388_v55 }
  0x8c   : > { %391 = vst [vmem:[%s1311_s27 + $0x3c0] sm:$0xff] %v390_v56 }
  0x8d   : > { %393 = vst [vmem:[%s1311_s27 + $0x3c8] sm:$0xff] %v392_v57 }
  0x8e   : > { %395 = vst [vmem:[%s1311_s27 + $0x3d0] sm:$0xff] %v394_v58 }
  0x8f   : > { %397 = vst [vmem:[%s1311_s27 + $0x3d8] sm:$0xff] %v396_v59 }
  0x90   : > { %399 = vst [vmem:[%s1311_s27 + $0x3e0] sm:$0xff] %v398_v60 }
  0x91   : > { %401 = vst [vmem:[%s1311_s27 + $0x3e8] sm:$0xff] %v400_v61 }
  0x92   : > { %403 = vst [vmem:[%s1311_s27 + $0x3f0] sm:$0xff] %v402_v62 }
  0x93   : > { %405 = vst [vmem:[%s1311_s27 + $0x3f8] sm:$0xff] %v404_v63 }
  0x94   : > { %407 = vst [vmem:[%s1311_s27 + $0x400] sm:$0xff] %v406_v0 }
  0x95   : > { %409 = vst [vmem:[%s1311_s27 + $0x408] sm:$0xff] %v408_v1 }
  0x96   : > { %411 = vst [vmem:[%s1311_s27 + $0x410] sm:$0xff] %v410_v2 }
  0x97   : > { %413 = vst [vmem:[%s1311_s27 + $0x418] sm:$0xff] %v412_v3 }
  0x98   : > { %415 = vst [vmem:[%s1311_s27 + $0x420] sm:$0xff] %v414_v4 }
  0x99   : > { %417 = vst [vmem:[%s1311_s27 + $0x428] sm:$0xff] %v416_v5 }
  0x9a   : > { %419 = vst [vmem:[%s1311_s27 + $0x430] sm:$0xff] %v418_v6 }
  0x9b   : > { %421 = vst [vmem:[%s1311_s27 + $0x438] sm:$0xff] %v420_v7 }
  0x9c   : > { %423 = vst [vmem:[%s1311_s27 + $0x440] sm:$0xff] %v422_v8 }
  0x9d   : > { %425 = vst [vmem:[%s1311_s27 + $0x448] sm:$0xff] %v424_v9 }
  0x9e   : > { %427 = vst [vmem:[%s1311_s27 + $0x450] sm:$0xff] %v426_v10 }
  0x9f   : > { %429 = vst [vmem:[%s1311_s27 + $0x458] sm:$0xff] %v428_v11 }
  0xa0   : > { %431 = vst [vmem:[%s1311_s27 + $0x460] sm:$0xff] %v430_v12 }
  0xa1   : > { %433 = vst [vmem:[%s1311_s27 + $0x468] sm:$0xff] %v432_v13 }
  0xa2   : > { %435 = vst [vmem:[%s1311_s27 + $0x470] sm:$0xff] %v434_v14 }
  0xa3   : > { %437 = vst [vmem:[%s1311_s27 + $0x478] sm:$0xff] %v436_v15 }
  0xa4   : > { %439 = vst [vmem:[%s1311_s27 + $0x480] sm:$0xff] %v438_v16 }
  0xa5   : > { %441 = vst [vmem:[%s1311_s27 + $0x488] sm:$0xff] %v440_v17 }
  0xa6   : > { %443 = vst [vmem:[%s1311_s27 + $0x490] sm:$0xff] %v442_v18 }
  0xa7   : > { %445 = vst [vmem:[%s1311_s27 + $0x498] sm:$0xff] %v444_v19 }
  0xa8   : > { %447 = vst [vmem:[%s1311_s27 + $0x4a0] sm:$0xff] %v446_v20 }
  0xa9   : > { %449 = vst [vmem:[%s1311_s27 + $0x4a8] sm:$0xff] %v448_v21 }
  0xaa   : > { %451 = vst [vmem:[%s1311_s27 + $0x4b0] sm:$0xff] %v450_v22 }
  0xab   : > { %453 = vst [vmem:[%s1311_s27 + $0x4b8] sm:$0xff] %v452_v23 }
  0xac   : > { %455 = vst [vmem:[%s1311_s27 + $0x4c0] sm:$0xff] %v454_v24 }
  0xad   : > { %457 = vst [vmem:[%s1311_s27 + $0x4c8] sm:$0xff] %v456_v25 }
  0xae   : > { %459 = vst [vmem:[%s1311_s27 + $0x4d0] sm:$0xff] %v458_v26 }
  0xaf   : > { %461 = vst [vmem:[%s1311_s27 + $0x4d8] sm:$0xff] %v460_v27 }
  0xb0   : > { %463 = vst [vmem:[%s1311_s27 + $0x4e0] sm:$0xff] %v462_v28 }
  0xb1   : > { %465 = vst [vmem:[%s1311_s27 + $0x4e8] sm:$0xff] %v464_v29 }
  0xb2   : > { %467 = vst [vmem:[%s1311_s27 + $0x4f0] sm:$0xff] %v466_v30 }
  0xb3   : > { %469 = vst [vmem:[%s1311_s27 + $0x4f8] sm:$0xff] %v468_v31 }
  0xb4 PF: > { %p1153_p7 = scmp.ge.s32.totalorder %s1243_s14, 1  ;;  %p474_p8 = scmp.lt.s32.totalorder %s1243_s14, 3 }
  0xb6   : > { %p475_p9 = pnand %p1153_p7, %p474_p8 }
  0xb7   : > { %s481_s28 = sand.u32 (!%p475_p9), 1, %s1235_s12  }
  0xb8   : > { %478 = sbr.rel (%p475_p9) target bundleno = 459 (0x1cb), region = 51 }
  0xb9   : > { %s1192_s29 = smul.u32 (!%p475_p9), 1280, %s481_s28 }
  0xbb   : > { %s1635_s30 = scalar_lea.vmem (!%p475_p9), [#allocation2], %s1192_s29 }
  0xbd   : > { %v588_v32 = vld [vmem:[%s1635_s30 + $0x258] sm:$0xff]  ;;  %v589_v33 = vld [vmem:[%s1635_s30 + $0x260] sm:$0xff]  ;;  %v583_v34 = vld [vmem:[%s1635_s30 + $0x230] sm:$0xff]  ;;  %s1158_s12 = smul.u32 (%p1296_p5), 40, %s1148_s15 }
  0xbe   : > { %697 = vmatpush.msra.mxu0 %v588_v32  ;;  %755 = vmatpush.msra.mxu2 %v589_v33  ;;  %v668_v35 = vld [vmem:[%s1635_s30 + $0x4d8] sm:$0xff]  ;;  %v669_v37 = vld [vmem:[%s1635_s30 + $0x4e0] sm:$0xff]  ;;  %v578_v38 = vld [vmem:[%s1635_s30 + $0x208] sm:$0xff] }
  0xbf   : > { %v584_v36 = vld [vmem:[%s1635_s30 + $0x238] sm:$0xff]  ;;  %726 = vmatpush.msra.mxu1 %v668_v35  ;;  %784 = vmatpush.msra.mxu3 %v669_v37  ;;  %v663_v39 = vld [vmem:[%s1635_s30 + $0x4b0] sm:$0xff]  ;;  %v658_v42 = vld [vmem:[%s1635_s30 + $0x488] sm:$0xff]  ;;  %s1952_s20 = scalar_lea.vmem (%p1296_p5), %s2005_s3, %s1158_s12 }
  0xc0   : > { %v579_v40 = vld [vmem:[%s1635_s30 + $0x210] sm:$0xff]  ;;  %698 = vmatpush.msra.mxu0 %v583_v34  ;;  %756 = vmatpush.msra.mxu2 %v584_v36  ;;  %v664_v41 = vld [vmem:[%s1635_s30 + $0x4b8] sm:$0xff]  ;;  %v573_v43 = vld [vmem:[%s1635_s30 + $0x1e0] sm:$0xff] }
  0xc1   : > { %727 = vmatpush.msra.mxu1 %v663_v39  ;;  %785 = vmatpush.msra.mxu3 %v664_v41  ;;  %v574_v44 = vld [vmem:[%s1635_s30 + $0x1e8] sm:$0xff]  ;;  %v659_v45 = vld [vmem:[%s1635_s30 + $0x490] sm:$0xff]  ;;  %v653_v46 = vld [vmem:[%s1635_s30 + $0x460] sm:$0xff] }
  0xc2   : > { %699 = vmatpush.msra.mxu0 %v578_v38  ;;  %757 = vmatpush.msra.mxu2 %v579_v40  ;;  %v654_v47 = vld [vmem:[%s1635_s30 + $0x468] sm:$0xff]  ;;  %v568_v48 = vld [vmem:[%s1635_s30 + $0x1b8] sm:$0xff]  ;;  %v569_v49 = vld [vmem:[%s1635_s30 + $0x1c0] sm:$0xff] }
  0xc3   : > { %728 = vmatpush.msra.mxu1 %v658_v42  ;;  %786 = vmatpush.msra.mxu3 %v659_v45  ;;  %v648_v50 = vld [vmem:[%s1635_s30 + $0x438] sm:$0xff]  ;;  %v649_v51 = vld [vmem:[%s1635_s30 + $0x440] sm:$0xff]  ;;  %v563_v52 = vld [vmem:[%s1635_s30 + $0x190] sm:$0xff] }
  0xc4   : > { %700 = vmatpush.msra.mxu0 %v573_v43  ;;  %758 = vmatpush.msra.mxu2 %v574_v44  ;;  %v564_v53 = vld [vmem:[%s1635_s30 + $0x198] sm:$0xff]  ;;  %v643_v54 = vld [vmem:[%s1635_s30 + $0x410] sm:$0xff]  ;;  %v558_v56 = vld [vmem:[%s1635_s30 + $0x168] sm:$0xff] }
  0xc5   : > { %729 = vmatpush.msra.mxu1 %v653_v46  ;;  %787 = vmatpush.msra.mxu3 %v654_v47  ;;  %v644_v55 = vld [vmem:[%s1635_s30 + $0x418] sm:$0xff]  ;;  %v559_v57 = vld [vmem:[%s1635_s30 + $0x170] sm:$0xff]  ;;  %v638_v58 = vld [vmem:[%s1635_s30 + $0x3e8] sm:$0xff] }
  0xc6   : > { %701 = vmatpush.msra.mxu0 %v568_v48  ;;  %759 = vmatpush.msra.mxu2 %v569_v49  ;;  %v639_v59 = vld [vmem:[%s1635_s30 + $0x3f0] sm:$0xff]  ;;  %v553_v60 = vld [vmem:[%s1635_s30 + $0x140] sm:$0xff]  ;;  %v554_v61 = vld [vmem:[%s1635_s30 + $0x148] sm:$0xff] }
  0xc7   : > { %730 = vmatpush.msra.mxu1 %v648_v50  ;;  %788 = vmatpush.msra.mxu3 %v649_v51  ;;  %v633_v62 = vld [vmem:[%s1635_s30 + $0x3c0] sm:$0xff]  ;;  %v634_v63 = vld [vmem:[%s1635_s30 + $0x3c8] sm:$0xff]  ;;  %v548_v0 = vld [vmem:[%s1635_s30 + $0x118] sm:$0xff] }
  0xc8   : > { %702 = vmatpush.msra.mxu0 %v563_v52  ;;  %760 = vmatpush.msra.mxu2 %v564_v53  ;;  %v549_v1 = vld [vmem:[%s1635_s30 + $0x120] sm:$0xff]  ;;  %v628_v2 = vld [vmem:[%s1635_s30 + $0x398] sm:$0xff]  ;;  %v543_v4 = vld [vmem:[%s1635_s30 + $0xf0] sm:$0xff] }
  0xc9   : > { %731 = vmatpush.msra.mxu1 %v643_v54  ;;  %789 = vmatpush.msra.mxu3 %v644_v55  ;;  %v629_v3 = vld [vmem:[%s1635_s30 + $0x3a0] sm:$0xff]  ;;  %v544_v5 = vld [vmem:[%s1635_s30 + $0xf8] sm:$0xff]  ;;  %v623_v6 = vld [vmem:[%s1635_s30 + $0x370] sm:$0xff] }
  0xca   : > { %703 = vmatpush.msra.mxu0 %v558_v56  ;;  %761 = vmatpush.msra.mxu2 %v559_v57  ;;  %v624_v7 = vld [vmem:[%s1635_s30 + $0x378] sm:$0xff]  ;;  %v538_v8 = vld [vmem:[%s1635_s30 + $0xc8] sm:$0xff]  ;;  %v539_v9 = vld [vmem:[%s1635_s30 + $0xd0] sm:$0xff] }
  0xcb   : > { %732 = vmatpush.msra.mxu1 %v638_v58  ;;  %790 = vmatpush.msra.mxu3 %v639_v59  ;;  %v618_v10 = vld [vmem:[%s1635_s30 + $0x348] sm:$0xff]  ;;  %v619_v11 = vld [vmem:[%s1635_s30 + $0x350] sm:$0xff]  ;;  %v533_v12 = vld [vmem:[%s1635_s30 + $0xa0] sm:$0xff] }
  0xcc   : > { %704 = vmatpush.msra.mxu0 %v553_v60  ;;  %762 = vmatpush.msra.mxu2 %v554_v61  ;;  %v534_v13 = vld [vmem:[%s1635_s30 + $0xa8] sm:$0xff]  ;;  %v613_v14 = vld [vmem:[%s1635_s30 + $0x320] sm:$0xff]  ;;  %v528_v16 = vld [vmem:[%s1635_s30 + $0x78] sm:$0xff] }
  0xcd   : > { %733 = vmatpush.msra.mxu1 %v633_v62  ;;  %791 = vmatpush.msra.mxu3 %v634_v63  ;;  %v614_v15 = vld [vmem:[%s1635_s30 + $0x328] sm:$0xff]  ;;  %v529_v17 = vld [vmem:[%s1635_s30 + $0x80] sm:$0xff]  ;;  %v608_v18 = vld [vmem:[%s1635_s30 + $0x2f8] sm:$0xff] }
  0xce   : > { %705 = vmatpush.msra.mxu0 %v548_v0  ;;  %763 = vmatpush.msra.mxu2 %v549_v1  ;;  %v609_v19 = vld [vmem:[%s1635_s30 + $0x300] sm:$0xff]  ;;  %v523_v20 = vld [vmem:[%s1635_s30 + $0x50] sm:$0xff]  ;;  %v524_v21 = vld [vmem:[%s1635_s30 + $0x58] sm:$0xff] }
  0xcf   : > { %734 = vmatpush.msra.mxu1 %v628_v2  ;;  %792 = vmatpush.msra.mxu3 %v629_v3  ;;  %v603_v22 = vld [vmem:[%s1635_s30 + $0x2d0] sm:$0xff]  ;;  %v604_v23 = vld [vmem:[%s1635_s30 + $0x2d8] sm:$0xff]  ;;  %v518_v24 = vld [vmem:[%s1635_s30 + $0x28] sm:$0xff] }
  0xd0   : > { %706 = vmatpush.msra.mxu0 %v543_v4  ;;  %764 = vmatpush.msra.mxu2 %v544_v5  ;;  %v519_v25 = vld [vmem:[%s1635_s30 + $0x30] sm:$0xff]  ;;  %v598_v26 = vld [vmem:[%s1635_s30 + $0x2a8] sm:$0xff]  ;;  %v513_v28 = vld [vmem:[%s1635_s30] sm:$0xff] }
  0xd1   : > { %735 = vmatpush.msra.mxu1 %v623_v6  ;;  %793 = vmatpush.msra.mxu3 %v624_v7  ;;  %v599_v27 = vld [vmem:[%s1635_s30 + $0x2b0] sm:$0xff]  ;;  %v514_v29 = vld [vmem:[%s1635_s30 + $0x8] sm:$0xff]  ;;  %v1702_v30 = vld [vmem:[%s2002_s0] sm:$0xff]  ;;  %v1245_v6 = vmov 0  }
  0xd2   : > { %707 = vmatpush.msra.mxu0 %v538_v8  ;;  %765 = vmatpush.msra.mxu2 %v539_v9  ;;  %v591_v31 = vld [vmem:[%s1635_s30 + $0x270] sm:$0xff]  ;;  %v593_v32 = vld [vmem:[%s1635_s30 + $0x280] sm:$0xff]  ;;  %v594_v33 = vld [vmem:[%s1635_s30 + $0x288] sm:$0xff] }
  0xd3   : > { %736 = vmatpush.msra.mxu1 %v618_v10  ;;  %794 = vmatpush.msra.mxu3 %v619_v11  ;;  %v590_v34 = vld [vmem:[%s1635_s30 + $0x268] sm:$0xff]  ;;  %v671_v37 = vld [vmem:[%s1635_s30 + $0x4f0] sm:$0xff]  ;;  %v585_v38 = vld [vmem:[%s1635_s30 + $0x240] sm:$0xff] }
  0xd4   : > { %708 = vmatpush.msra.mxu0 %v533_v12  ;;  %766 = vmatpush.msra.mxu2 %v534_v13  ;;  %v1713_v35 = vld [vmem:[%s2002_s0 + $0x8] sm:$0xff]  ;;  %v581_v40 = vld [vmem:[%s1635_s30 + $0x220] sm:$0xff]  ;;  %v580_v42 = vld [vmem:[%s1635_s30 + $0x218] sm:$0xff] }
  0xd5   : > { %737 = vmatpush.msra.mxu1 %v613_v14  ;;  %795 = vmatpush.msra.mxu3 %v614_v15  ;;  %v586_v36 = vld [vmem:[%s1635_s30 + $0x248] sm:$0xff]  ;;  %v665_v43 = vld [vmem:[%s1635_s30 + $0x4c0] sm:$0xff]  ;;  %v576_v44 = vld [vmem:[%s1635_s30 + $0x1f8] sm:$0xff] }
  0xd6   : > { %709 = vmatpush.msra.mxu0 %v528_v16  ;;  %767 = vmatpush.msra.mxu2 %v529_v17  ;;  %v670_v39 = vld [vmem:[%s1635_s30 + $0x4e8] sm:$0xff]  ;;  %v661_v45 = vld [vmem:[%s1635_s30 + $0x4a0] sm:$0xff]  ;;  %v575_v46 = vld [vmem:[%s1635_s30 + $0x1f0] sm:$0xff] }
  0xd7   : > { %738 = vmatpush.msra.mxu1 %v608_v18  ;;  %796 = vmatpush.msra.mxu3 %v609_v19  ;;  %v666_v41 = vld [vmem:[%s1635_s30 + $0x4c8] sm:$0xff]  ;;  %v660_v47 = vld [vmem:[%s1635_s30 + $0x498] sm:$0xff]  ;;  %v1732_v48 = vld [vmem:[%s2002_s0 + $0x10] sm:$0xff] }
  0xd8   : > { %710 = vmatpush.msra.mxu0 %v523_v20  ;;  %768 = vmatpush.msra.mxu2 %v524_v21  ;;  %v571_v49 = vld [vmem:[%s1635_s30 + $0x1d0] sm:$0xff]  ;;  %v656_v50 = vld [vmem:[%s1635_s30 + $0x478] sm:$0xff]  ;;  %v570_v51 = vld [vmem:[%s1635_s30 + $0x1c8] sm:$0xff] }
  0xd9   : > { %739 = vmatpush.msra.mxu1 %v603_v22  ;;  %797 = vmatpush.msra.mxu3 %v604_v23  ;;  %v655_v52 = vld [vmem:[%s1635_s30 + $0x470] sm:$0xff]  ;;  %v1743_v53 = vld [vmem:[%s2002_s0 + $0x18] sm:$0xff]  ;;  %v566_v54 = vld [vmem:[%s1635_s30 + $0x1a8] sm:$0xff] }
  0xda   : > { %711 = vmatpush.msra.mxu0 %v518_v24  ;;  %769 = vmatpush.msra.mxu2 %v519_v25  ;;  %v651_v55 = vld [vmem:[%s1635_s30 + $0x450] sm:$0xff]  ;;  %v565_v56 = vld [vmem:[%s1635_s30 + $0x1a0] sm:$0xff]  ;;  %v650_v57 = vld [vmem:[%s1635_s30 + $0x448] sm:$0xff] }
  0xdb   : > { %740 = vmatpush.msra.mxu1 %v598_v26  ;;  %798 = vmatpush.msra.mxu3 %v599_v27  ;;  %v561_v58 = vld [vmem:[%s1635_s30 + $0x180] sm:$0xff]  ;;  %v646_v59 = vld [vmem:[%s1635_s30 + $0x428] sm:$0xff]  ;;  %v560_v60 = vld [vmem:[%s1635_s30 + $0x178] sm:$0xff] }
  0xdc   : > { %712 = vmatpush.msra.mxu0 %v513_v28  ;;  %770 = vmatpush.msra.mxu2 %v514_v29  ;;  %v645_v61 = vld [vmem:[%s1635_s30 + $0x420] sm:$0xff]  ;;  %v556_v62 = vld [vmem:[%s1635_s30 + $0x158] sm:$0xff]  ;;  %v555_v0 = vld [vmem:[%s1635_s30 + $0x150] sm:$0xff] }
  0xdd   : > { %713 = vmatmul.f32.vlgmr.msra.gmra.mxu0 %v1702_v30  ;;  %771 = vmatmul.f32.vlgmr.msra.gmra.mxu2 %v1702_v30  ;;  %v641_v63 = vld [vmem:[%s1635_s30 + $0x400] sm:$0xff]  ;;  %v640_v1 = vld [vmem:[%s1635_s30 + $0x3f8] sm:$0xff]  ;;  %v551_v4 = vld [vmem:[%s1635_s30 + $0x130] sm:$0xff] }
  0xde   : > { %871 = vmatpush.msrb.mxu2 %v591_v31  ;;  %741 = vmatpush.msra.mxu1 %v593_v32  ;;  %v1762_v2 = vld [vmem:[%s2002_s0 + $0x20] sm:$0xff]  ;;  %v636_v3 = vld [vmem:[%s1635_s30 + $0x3d8] sm:$0xff]  ;;  %v550_v7 = vld [vmem:[%s1635_s30 + $0x128] sm:$0xff] }
  0xdf   : > { %799 = vmatpush.msra.mxu3 %v594_v33  ;;  %813 = vmatpush.msrb.mxu0 %v590_v34  ;;  %v673_v5 = vld [vmem:[%s2004_s2] sm:$0xff]  ;;  %v635_v8 = vld [vmem:[%s1635_s30 + $0x3d0] sm:$0xff]  ;;  %v1777_v9 = vld [vmem:[%s2002_s0 + $0x28] sm:$0xff] }
  0xe0   : > { %742 = vmatmul.f32.vlgmr.msra.gmra.mxu1 %v1713_v35  ;;  %800 = vmatmul.f32.vlgmr.msra.gmra.mxu3 %v1713_v35  ;;  %v546_v10 = vld [vmem:[%s1635_s30 + $0x108] sm:$0xff]  ;;  %v631_v11 = vld [vmem:[%s1635_s30 + $0x3b0] sm:$0xff]  ;;  %v545_v12 = vld [vmem:[%s1635_s30 + $0x100] sm:$0xff] }
  0xe1   : > { %872 = vmatpush.msrb.mxu2 %v586_v36  ;;  %900 = vmatpush.msrb.mxu3 %v671_v37  ;;  %v630_v13 = vld [vmem:[%s1635_s30 + $0x3a8] sm:$0xff]  ;;  %v541_v14 = vld [vmem:[%s1635_s30 + $0xe0] sm:$0xff]  ;;  %v540_v16 = vld [vmem:[%s1635_s30 + $0xd8] sm:$0xff] }
  0xe2   : > { %814 = vmatpush.msrb.mxu0 %v585_v38  ;;  %842 = vmatpush.msrb.mxu1 %v670_v39  ;;  %v626_v15 = vld [vmem:[%s1635_s30 + $0x388] sm:$0xff]  ;;  %v625_v17 = vld [vmem:[%s1635_s30 + $0x380] sm:$0xff]  ;;  %v536_v18 = vld [vmem:[%s1635_s30 + $0xb8] sm:$0xff] }
  0xe3   : > { %873 = vmatpush.msrb.mxu2 %v581_v40  ;;  %901 = vmatpush.msrb.mxu3 %v666_v41  ;;  %v621_v19 = vld [vmem:[%s1635_s30 + $0x360] sm:$0xff]  ;;  %v535_v20 = vld [vmem:[%s1635_s30 + $0xb0] sm:$0xff]  ;;  %v620_v21 = vld [vmem:[%s1635_s30 + $0x358] sm:$0xff] }
  0xe4   : > { %815 = vmatpush.msrb.mxu0 %v580_v42  ;;  %843 = vmatpush.msrb.mxu1 %v665_v43  ;;  %v1796_v22 = vld [vmem:[%s2002_s0 + $0x30] sm:$0xff]  ;;  %v616_v24 = vld [vmem:[%s1635_s30 + $0x338] sm:$0xff]  ;;  %v674_v25 = vld [vmem:[%s2004_s2 + $0x8] sm:$0xff] }
  0xe5   : > { %874 = vmatpush.msrb.mxu2 %v576_v44  ;;  %902 = vmatpush.msrb.mxu3 %v661_v45  ;;  %v531_v23 = vld [vmem:[%s1635_s30 + $0x90] sm:$0xff]  ;;  %v530_v26 = vld [vmem:[%s1635_s30 + $0x88] sm:$0xff]  ;;  %v1810_v28 = vld [vmem:[%s2002_s0 + $0x38] sm:$0xff] }
  0xe6   : > { %816 = vmatpush.msrb.mxu0 %v575_v46  ;;  %844 = vmatpush.msrb.mxu1 %v660_v47  ;;  %v615_v27 = vld [vmem:[%s1635_s30 + $0x330] sm:$0xff]  ;;  %v526_v29 = vld [vmem:[%s1635_s30 + $0x68] sm:$0xff]  ;;  %v525_v32 = vld [vmem:[%s1635_s30 + $0x60] sm:$0xff] }
  0xe7   : > { %716 = vmatmul.f32.gmra.mxu0 %v1732_v48  ;;  %774 = vmatmul.f32.gmra.mxu2 %v1732_v48  ;;  %v611_v31 = vld [vmem:[%s1635_s30 + $0x310] sm:$0xff]  ;;  %v610_v33 = vld [vmem:[%s1635_s30 + $0x308] sm:$0xff]  ;;  %v521_v34 = vld [vmem:[%s1635_s30 + $0x40] sm:$0xff] }
  0xe8   : > { %875 = vmatpush.msrb.mxu2 %v571_v49  ;;  %903 = vmatpush.msrb.mxu3 %v656_v50  ;;  %v606_v36 = vld [vmem:[%s1635_s30 + $0x2e8] sm:$0xff]  ;;  %v520_v37 = vld [vmem:[%s1635_s30 + $0x38] sm:$0xff]  ;;  %v605_v38 = vld [vmem:[%s1635_s30 + $0x2e0] sm:$0xff] }
  0xe9   : > { %817 = vmatpush.msrb.mxu0 %v570_v51  ;;  %845 = vmatpush.msrb.mxu1 %v655_v52  ;;  %v516_v39 = vld [vmem:[%s1635_s30 + $0x18] sm:$0xff]  ;;  %v601_v40 = vld [vmem:[%s1635_s30 + $0x2c0] sm:$0xff]  ;;  %v515_v41 = vld [vmem:[%s1635_s30 + $0x10] sm:$0xff] }
  0xea   : > { %745 = vmatmul.f32.gmra.mxu1 %v1743_v53  ;;  %803 = vmatmul.f32.gmra.mxu3 %v1743_v53  ;;  %v600_v42 = vld [vmem:[%s1635_s30 + $0x2b8] sm:$0xff]  ;;  %v675_v45 = vld [vmem:[%s2004_s2 + $0x10] sm:$0xff]  ;;  %v582_v50 = vld [vmem:[%s1635_s30 + $0x228] sm:$0xff] }
  0xeb   : > { %876 = vmatpush.msrb.mxu2 %v566_v54  ;;  %904 = vmatpush.msrb.mxu3 %v651_v55  ;;  %v596_v43 = vld [vmem:[%s1635_s30 + $0x298] sm:$0xff]  ;;  %v595_v46 = vld [vmem:[%s1635_s30 + $0x290] sm:$0xff]  ;;  %v577_v52 = vld [vmem:[%s1635_s30 + $0x200] sm:$0xff] }
  0xec   : > { %818 = vmatpush.msrb.mxu0 %v565_v56  ;;  %846 = vmatpush.msrb.mxu1 %v650_v57  ;;  %v592_v44 = vld [vmem:[%s1635_s30 + $0x278] sm:$0xff]  ;;  %v587_v47 = vld [vmem:[%s1635_s30 + $0x250] sm:$0xff]  ;;  %v662_v54 = vld [vmem:[%s1635_s30 + $0x4a8] sm:$0xff] }
  0xed   : > { %877 = vmatpush.msrb.mxu2 %v561_v58  ;;  %905 = vmatpush.msrb.mxu3 %v646_v59  ;;  %v672_v49 = vld [vmem:[%s1635_s30 + $0x4f8] sm:$0xff]  ;;  %v667_v51 = vld [vmem:[%s1635_s30 + $0x4d0] sm:$0xff]  ;;  %v657_v55 = vld [vmem:[%s1635_s30 + $0x480] sm:$0xff] }
  0xee   : > { %819 = vmatpush.msrb.mxu0 %v560_v60  ;;  %847 = vmatpush.msrb.mxu1 %v645_v61  ;;  %v572_v56 = vld [vmem:[%s1635_s30 + $0x1d8] sm:$0xff]  ;;  %v567_v58 = vld [vmem:[%s1635_s30 + $0x1b0] sm:$0xff]  ;;  %v562_v60 = vld [vmem:[%s1635_s30 + $0x188] sm:$0xff] }
  0xef   : > { %878 = vmatpush.msrb.mxu2 %v556_v62  ;;  %906 = vmatpush.msrb.mxu3 %v641_v63  ;;  %v676_v57 = vld [vmem:[%s2004_s2 + $0x18] sm:$0xff]  ;;  %v647_v61 = vld [vmem:[%s1635_s30 + $0x430] sm:$0xff]  ;;  %v557_v62 = vld [vmem:[%s1635_s30 + $0x160] sm:$0xff] }
  0xf0   : > { %820 = vmatpush.msrb.mxu0 %v555_v0  ;;  %848 = vmatpush.msrb.mxu1 %v640_v1  ;;  %v652_v59 = vld [vmem:[%s1635_s30 + $0x458] sm:$0xff]  ;;  %v642_v63 = vld [vmem:[%s1635_s30 + $0x408] sm:$0xff]  ;;  %v637_v1 = vld [vmem:[%s1635_s30 + $0x3e0] sm:$0xff] }
  0xf1   : > { %1219 = vset.pattern.permute.xlu0 %v1245_v6  ;;  %719 = vmatmul.f32.gmra.mxu0 %v1762_v2  ;;  %v552_v0 = vld [vmem:[%s1635_s30 + $0x138] sm:$0xff] }
  0xf2   : > { %777 = vmatmul.f32.gmra.mxu2 %v1762_v2  ;;  %907 = vmatpush.msrb.mxu3 %v636_v3  ;;  %v547_v3 = vld [vmem:[%s1635_s30 + $0x110] sm:$0xff] }
  0xf3   : > { %879 = vmatpush.msrb.mxu2 %v551_v4  ;;  %679 = vperm.xlu0 %1219, %v673_v5   ;;  %v632_v4 = vld [vmem:[%s1635_s30 + $0x3b8] sm:$0xff]  ;;  %v542_v5 = vld [vmem:[%s1635_s30 + $0xe8] sm:$0xff] }
  0xf4   : > { %821 = vmatpush.msrb.mxu0 %v550_v7  ;;  %849 = vmatpush.msrb.mxu1 %v635_v8  ;;  %v537_v7 = vld [vmem:[%s1635_s30 + $0xc0] sm:$0xff]  ;;  %v622_v8 = vld [vmem:[%s1635_s30 + $0x368] sm:$0xff] }
  0xf5   : > { %748 = vmatmul.f32.gmra.mxu1 %v1777_v9  ;;  %806 = vmatmul.f32.gmra.mxu3 %v1777_v9 }
  0xf6   : > { %880 = vmatpush.msrb.mxu2 %v546_v10  ;;  %908 = vmatpush.msrb.mxu3 %v631_v11  ;;  %v532_v10 = vld [vmem:[%s1635_s30 + $0x98] sm:$0xff]  ;;  %v617_v11 = vld [vmem:[%s1635_s30 + $0x340] sm:$0xff] }
  0xf7   : > { %822 = vmatpush.msrb.mxu0 %v545_v12  ;;  %850 = vmatpush.msrb.mxu1 %v630_v13  ;;  %v527_v12 = vld [vmem:[%s1635_s30 + $0x70] sm:$0xff]  ;;  %v612_v13 = vld [vmem:[%s1635_s30 + $0x318] sm:$0xff] }
  0xf8   : > { %881 = vmatpush.msrb.mxu2 %v541_v14  ;;  %909 = vmatpush.msrb.mxu3 %v626_v15  ;;  %v522_v14 = vld [vmem:[%s1635_s30 + $0x48] sm:$0xff]  ;;  %v607_v15 = vld [vmem:[%s1635_s30 + $0x2f0] sm:$0xff] }
  0xf9   : > { %823 = vmatpush.msrb.mxu0 %v540_v16  ;;  %851 = vmatpush.msrb.mxu1 %v625_v17  ;;  %v517_v16 = vld [vmem:[%s1635_s30 + $0x20] sm:$0xff]  ;;  %v602_v17 = vld [vmem:[%s1635_s30 + $0x2c8] sm:$0xff] }
  0xfa   : > { %882 = vmatpush.msrb.mxu2 %v536_v18  ;;  %910 = vmatpush.msrb.mxu3 %v621_v19  ;;  %v597_v18 = vld [vmem:[%s1635_s30 + $0x2a0] sm:$0xff] }
  0xfb   : > { %824 = vmatpush.msrb.mxu0 %v535_v20  ;;  %852 = vmatpush.msrb.mxu1 %v620_v21 }
  0xfc   : > { %722 = vmatmul.f32.gmra.mxu0 %v1796_v22  ;;  %780 = vmatmul.f32.gmra.mxu2 %v1796_v22 }
  0xfd   : > { %883 = vmatpush.msrb.mxu2 %v531_v23  ;;  %911 = vmatpush.msrb.mxu3 %v616_v24 }
  0xfe   : > { %684 = vperm.xlu0 %1219, %v674_v25   ;;  %825 = vmatpush.msrb.mxu0 %v530_v26 }
  0xff   : > { %853 = vmatpush.msrb.mxu1 %v615_v27  ;;  %809 = vmatmul.f32.gmra.mxu3 %v1810_v28 }
 0x100   : > { %751 = vmatmul.f32.gmra.mxu1 %v1810_v28  ;;  %884 = vmatpush.msrb.mxu2 %v526_v29 }
 0x101   : > { %912 = vmatpush.msrb.mxu3 %v611_v31  ;;  %826 = vmatpush.msrb.mxu0 %v525_v32 }
 0x102   : > { %854 = vmatpush.msrb.mxu1 %v610_v33  ;;  %885 = vmatpush.msrb.mxu2 %v521_v34 }
 0x103   : > { %913 = vmatpush.msrb.mxu3 %v606_v36  ;;  %827 = vmatpush.msrb.mxu0 %v520_v37 }
 0x104   : > { %855 = vmatpush.msrb.mxu1 %v605_v38  ;;  %886 = vmatpush.msrb.mxu2 %v516_v39 }
 0x105   : > { %914 = vmatpush.msrb.mxu3 %v601_v40  ;;  %828 = vmatpush.msrb.mxu0 %v515_v41 }
 0x106   : > { %856 = vmatpush.msrb.mxu1 %v600_v42  ;;  %1220 = vset.pattern.permute.xlu1 %v1245_v6  ;;  %v627_v6 = vld [vmem:[%s1635_s30 + $0x390] sm:$0xff]  ;;  %s1193_s30 = smul.u32 160, %s481_s28 }
 0x107   : > { %829 = vmatmul.f32.vlgmr.msrb.gmra.mxu0 %v1702_v30  ;;  %887 = vmatmul.f32.vlgmr.msrb.gmra.mxu2 %v1702_v30 }
 0x108   : > { %915 = vmatpush.msrb.mxu3 %v596_v43  ;;  %1159 = vmatpush.msra.mxu2 %v592_v44  ;;  %s1897_s10 = scalar_lea.vmem [#allocation3], %s1193_s30 }
 0x109   : > { %689 = vperm.xlu1 %1220, %v675_v45   ;;  %857 = vmatpush.msrb.mxu1 %v595_v46 }
 0x10a   : > { %929 = vmatpush.msra.mxu0 %v592_v44  ;;  %858 = vmatmul.f32.vlgmr.msrb.gmra.mxu1 %v1713_v35 }
 0x10b   : > { %916 = vmatmul.f32.vlgmr.msrb.gmra.mxu3 %v1713_v35  ;;  %1160 = vmatpush.msra.mxu2 %v587_v47 }
 0x10c   : > { %1175 = vmatpush.msra.mxu3 %v672_v49  ;;  %930 = vmatpush.msra.mxu0 %v587_v47 }
 0x10d   : > { %958 = vmatpush.msra.mxu1 %v672_v49  ;;  %1161 = vmatpush.msra.mxu2 %v582_v50 }
 0x10e   : > { %1176 = vmatpush.msra.mxu3 %v667_v51  ;;  %931 = vmatpush.msra.mxu0 %v582_v50 }
 0x10f   : > { %959 = vmatpush.msra.mxu1 %v667_v51  ;;  %1162 = vmatpush.msra.mxu2 %v577_v52 }
 0x110   : > { %1177 = vmatpush.msra.mxu3 %v662_v54  ;;  %932 = vmatpush.msra.mxu0 %v577_v52 }
 0x111   : > { %960 = vmatpush.msra.mxu1 %v662_v54  ;;  %832 = vmatmul.f32.gmra.mxu0 %v1732_v48 }
 0x112   : > { %890 = vmatmul.f32.gmra.mxu2 %v1732_v48  ;;  %1178 = vmatpush.msra.mxu3 %v657_v55 }
 0x113   : > { %1163 = vmatpush.msra.mxu2 %v572_v56  ;;  %694 = vperm.xlu1 %1220, %v676_v57  }
 0x114   : > { %933 = vmatpush.msra.mxu0 %v572_v56  ;;  %961 = vmatpush.msra.mxu1 %v657_v55 }
 0x115   : > { %861 = vmatmul.f32.gmra.mxu1 %v1743_v53  ;;  %919 = vmatmul.f32.gmra.mxu3 %v1743_v53 }
 0x116   : > { %1164 = vmatpush.msra.mxu2 %v567_v58  ;;  %1179 = vmatpush.msra.mxu3 %v652_v59 }
 0x117   : > { %934 = vmatpush.msra.mxu0 %v567_v58  ;;  %962 = vmatpush.msra.mxu1 %v652_v59 }
 0x118   : > { %1165 = vmatpush.msra.mxu2 %v562_v60  ;;  %1180 = vmatpush.msra.mxu3 %v647_v61 }
 0x119   : > { %935 = vmatpush.msra.mxu0 %v562_v60  ;;  %963 = vmatpush.msra.mxu1 %v647_v61 }
 0x11a   : > { %1166 = vmatpush.msra.mxu2 %v557_v62  ;;  %1181 = vmatpush.msra.mxu3 %v642_v63 }
 0x11b   : > { %936 = vmatpush.msra.mxu0 %v557_v62  ;;  %964 = vmatpush.msra.mxu1 %v642_v63 }
 0x11c   : > { %835 = vmatmul.f32.gmra.mxu0 %v1762_v2  ;;  %893 = vmatmul.f32.gmra.mxu2 %v1762_v2 }
 0x11d   : > { %1167 = vmatpush.msra.mxu2 %v552_v0  ;;  %1182 = vmatpush.msra.mxu3 %v637_v1 }
 0x11e   : > { %937 = vmatpush.msra.mxu0 %v552_v0  ;;  %965 = vmatpush.msra.mxu1 %v637_v1 }
 0x11f   : > { %864 = vmatmul.f32.gmra.mxu1 %v1777_v9  ;;  %922 = vmatmul.f32.gmra.mxu3 %v1777_v9 }
 0x120   : > { %1168 = vmatpush.msra.mxu2 %v547_v3  ;;  %1183 = vmatpush.msra.mxu3 %v632_v4 }
 0x121   : > { %938 = vmatpush.msra.mxu0 %v547_v3  ;;  %966 = vmatpush.msra.mxu1 %v632_v4 }
 0x122   : > { %1169 = vmatpush.msra.mxu2 %v542_v5  ;;  %1184 = vmatpush.msra.mxu3 %v627_v6 }
 0x123   : > { %939 = vmatpush.msra.mxu0 %v542_v5  ;;  %967 = vmatpush.msra.mxu1 %v627_v6 }
 0x124   : > { %1170 = vmatpush.msra.mxu2 %v537_v7  ;;  %1185 = vmatpush.msra.mxu3 %v622_v8 }
 0x125   : > { %940 = vmatpush.msra.mxu0 %v537_v7  ;;  %968 = vmatpush.msra.mxu1 %v622_v8 }
 0x126   : > { %838 = vmatmul.f32.gmra.mxu0 %v1796_v22  ;;  %896 = vmatmul.f32.gmra.mxu2 %v1796_v22 }
 0x127   : > { %1171 = vmatpush.msra.mxu2 %v532_v10  ;;  %1186 = vmatpush.msra.mxu3 %v617_v11 }
 0x128   : > { %941 = vmatpush.msra.mxu0 %v532_v10  ;;  %969 = vmatpush.msra.mxu1 %v617_v11 }
 0x129   : > { %867 = vmatmul.f32.gmra.mxu1 %v1810_v28  ;;  %925 = vmatmul.f32.gmra.mxu3 %v1810_v28 }
 0x12a   : > { %1172 = vmatpush.msra.mxu2 %v527_v12  ;;  %1187 = vmatpush.msra.mxu3 %v612_v13 }
 0x12b   : > { %942 = vmatpush.msra.mxu0 %v527_v12  ;;  %970 = vmatpush.msra.mxu1 %v612_v13 }
 0x12c   : > { %1173 = vmatpush.msra.mxu2 %v522_v14  ;;  %1188 = vmatpush.msra.mxu3 %v607_v15 }
 0x12d   : > { %943 = vmatpush.msra.mxu0 %v522_v14  ;;  %971 = vmatpush.msra.mxu1 %v607_v15 }
 0x12e   : > { %1174 = vmatpush.msra.mxu2 %v517_v16  ;;  %1189 = vmatpush.msra.mxu3 %v602_v17 }
 0x12f   : > { %944 = vmatpush.msra.mxu0 %v517_v16  ;;  %972 = vmatpush.msra.mxu1 %v602_v17 }
 0x130   : > { %945 = vmatmul.f32.vlgmr.msra.gmra.mxu0 %v1702_v30  ;;  %951 = vmatmul.f32.vlgmr.msra.gmra.mxu2 %v1762_v2 }
 0x131   : > { %1190 = vmatpush.msra.mxu3 %v597_v18  ;;  %973 = vmatpush.msra.mxu1 %v597_v18 }
 0x132   : > { %974 = vmatmul.f32.vlgmr.msra.gmra.mxu1 %v1713_v35  ;;  %980 = vmatmul.f32.vlgmr.msra.gmra.mxu3 %v1777_v9 }
 0x138   : > { %948 = vmatmul.f32.gmra.mxu0 %v1732_v48  ;;  %954 = vmatmul.f32.gmra.mxu2 %v1796_v22 }
 0x13a   : > { %977 = vmatmul.f32.gmra.mxu1 %v1743_v53  ;;  %983 = vmatmul.f32.gmra.mxu3 %v1810_v28 }
 0x15a   : > { %v714_v19 = vpop.f32.mrf.mxu0 }
 0x15d   : > { %v743_v20 = vpop.f32.mrf.mxu1 }
 0x160   : > { %v772_v21 = vpop.f32.mrf.mxu2 }
 0x163   : > { %v801_v2 = vpop.f32.mrf.mxu3 }
 0x164   : > { %v717_v23 = vpop.f32.mrf.mxu0 }
 0x165   : > { %v1891_v30 = vpop.permute.xlu0 %679 }
 0x166   : > { %v715_v35 = vadd.f32 %v714_v19, %v1891_v30  ;;  %v773_v9 = vadd.f32 %v772_v21, %v1891_v30 }
 0x167   : > { %v746_v22 = vpop.f32.mrf.mxu1 }
 0x168   : > { %v744_v48 = vadd.f32 %v743_v20, %v715_v35  ;;  %v802_v24 = vadd.f32 %v801_v2, %v773_v9 }
 0x16a   : > { %v987_v25 = vmax.f32 %v744_v48, 0.0  ;;  %v988_v53 = vmax.f32 %v802_v24, 0.0  ;;  %v775_v26 = vpop.f32.mrf.mxu2 }
 0x16c   : > { %1007 = vst [vmem:[%s1897_s10] sm:$0xff] %v987_v25 }
 0x16d   : > { %1008 = vst [vmem:[%s1897_s10 + $0x8] sm:$0xff] %v988_v53  ;;  %v804_v27 = vpop.f32.mrf.mxu3 }
 0x16e   : > { %v720_v29 = vpop.f32.mrf.mxu0 }
 0x170   : > { %v1901_v28 = vpop.permute.xlu0 %684 }
 0x171   : > { %v718_v31 = vadd.f32 %v717_v23, %v1901_v28  ;;  %v776_v32 = vadd.f32 %v775_v26, %v1901_v28 }
 0x172   : > { %v749_v36 = vpop.f32.mrf.mxu1 }
 0x173   : > { %v747_v33 = vadd.f32 %v746_v22, %v718_v31  ;;  %v805_v34 = vadd.f32 %v804_v27, %v776_v32 }
 0x175   : > { %v992_v37 = vmax.f32 %v747_v33, 0.0  ;;  %v993_v38 = vmax.f32 %v805_v34, 0.0  ;;  %v778_v39 = vpop.f32.mrf.mxu2 }
 0x177   : > { %1012 = vst [vmem:[%s1897_s10 + $0x28] sm:$0xff] %v992_v37 }
 0x178   : > { %1013 = vst [vmem:[%s1897_s10 + $0x30] sm:$0xff] %v993_v38  ;;  %v807_v41 = vpop.f32.mrf.mxu3 }
 0x179   : > { %v723_v40 = vpop.f32.mrf.mxu0 }
 0x17b   : > { %v1907_v42 = vpop.permute.xlu1 %689 }
 0x17c   : > { %v721_v43 = vadd.f32 %v720_v29, %v1907_v42  ;;  %v779_v44 = vadd.f32 %v778_v39, %v1907_v42 }
 0x17d   : > { %v752_v45 = vpop.f32.mrf.mxu1 }
 0x17e   : > { %v750_v46 = vadd.f32 %v749_v36, %v721_v43  ;;  %v808_v47 = vadd.f32 %v807_v41, %v779_v44 }
 0x17f   : > { %v781_v51 = vpop.f32.mrf.mxu2 }
 0x180   : > { %v997_v49 = vmax.f32 %v750_v46, 0.0  ;;  %v998_v50 = vmax.f32 %v808_v47, 0.0 }
 0x182   : > { %1017 = vst [vmem:[%s1897_s10 + $0x50] sm:$0xff] %v997_v49  ;;  %v810_v52 = vpop.f32.mrf.mxu3 }
 0x183   : > { %1018 = vst [vmem:[%s1897_s10 + $0x58] sm:$0xff] %v998_v50 }
 0x184   : > { %v830_v54 = vpop.f32.mrf.mxu0 }
 0x185   : > { %v1913_v55 = vpop.permute.xlu1 %694  ;;  %v831_v56 = vadd.f32 %v830_v54, %v1891_v30 }
 0x186   : > { %v724_v57 = vadd.f32 %v723_v40, %v1913_v55  ;;  %v782_v58 = vadd.f32 %v781_v51, %v1913_v55 }
 0x187   : > { %v859_v59 = vpop.f32.mrf.mxu1 }
 0x188   : > { %v753_v60 = vadd.f32 %v752_v45, %v724_v57  ;;  %v811_v61 = vadd.f32 %v810_v52, %v782_v58  ;;  %v860_v62 = vadd.f32 %v859_v59, %v831_v56 }
 0x18a   : > { %v1002_v63 = vmax.f32 %v753_v60, 0.0  ;;  %v1003_v0 = vmax.f32 %v811_v61, 0.0  ;;  %v989_v1 = vmax.f32 %v860_v62, 0.0  ;;  %v888_v3 = vpop.f32.mrf.mxu2  ;;  %v1059_v62 = vld [vmem:[%s1897_s10 + $0x28] sm:$0xff] (%p1296_p5) }
 0x18b   : > { %v889_v4 = vadd.f32 %v888_v3, %v1891_v30  ;;  %1060 = vst [vmem:[%s1952_s20 + $0x50] sm:$0xff] (%p1296_p5), %v1059_v62 }
 0x18c   : > { %1022 = vst [vmem:[%s1897_s10 + $0x78] sm:$0xff] %v1002_v63  ;;  %v1061_v63 = vld [vmem:[%s1897_s10 + $0x30] sm:$0xff] (%p1296_p5) }
 0x18d   : > { %1023 = vst [vmem:[%s1897_s10 + $0x80] sm:$0xff] %v1003_v0 }
 0x18e   : > { %1009 = vst [vmem:[%s1897_s10 + $0x10] sm:$0xff] %v989_v1  ;;  %v833_v5 = vpop.f32.mrf.mxu0  ;;  %v917_v6 = vpop.f32.mrf.mxu3 }
 0x18f   : > { %v834_v7 = vadd.f32 %v833_v5, %v1901_v28  ;;  %v918_v8 = vadd.f32 %v917_v6, %v889_v4  ;;  %1062 = vst [vmem:[%s1952_s20 + $0x58] sm:$0xff] (%p1296_p5), %v1061_v63  ;;  %v1069_v4 = vld [vmem:[%s1897_s10 + $0x50] sm:$0xff] (%p1296_p5)  ;;  %v1071_v5 = vld [vmem:[%s1897_s10 + $0x58] sm:$0xff] (%p1296_p5) }
 0x190   : > { %1070 = vst [vmem:[%s1952_s20 + $0xa0] sm:$0xff] (%p1296_p5), %v1069_v4 }
 0x191   : > { %v990_v10 = vmax.f32 %v918_v8, 0.0  ;;  %1072 = vst [vmem:[%s1952_s20 + $0xa8] sm:$0xff] (%p1296_p5), %v1071_v5 }
 0x192   : > { %v862_v11 = vpop.f32.mrf.mxu1 }
 0x193   : > { %1010 = vst [vmem:[%s1897_s10 + $0x18] sm:$0xff] %v990_v10  ;;  %v863_v12 = vadd.f32 %v862_v11, %v834_v7  ;;  %v1079_v10 = vld [vmem:[%s1897_s10 + $0x78] sm:$0xff] (%p1296_p5) }
 0x194   : > { %v1081_v11 = vld [vmem:[%s1897_s10 + $0x80] sm:$0xff] (%p1296_p5)  ;;  %1080 = vst [vmem:[%s1952_s20 + $0xf0] sm:$0xff] (%p1296_p5), %v1079_v10 }
 0x195   : > { %v994_v13 = vmax.f32 %v863_v12, 0.0  ;;  %v891_v14 = vpop.f32.mrf.mxu2  ;;  %1082 = vst [vmem:[%s1952_s20 + $0xf8] sm:$0xff] (%p1296_p5), %v1081_v11 }
 0x196   : > { %v892_v15 = vadd.f32 %v891_v14, %v1901_v28 }
 0x197   : > { %1014 = vst [vmem:[%s1897_s10 + $0x38] sm:$0xff] %v994_v13 }
 0x198   : > { %v920_v16 = vpop.f32.mrf.mxu3 }
 0x199   : > { %v836_v17 = vpop.f32.mrf.mxu0  ;;  %v921_v18 = vadd.f32 %v920_v16, %v892_v15 }
 0x19a   : > { %v837_v19 = vadd.f32 %v836_v17, %v1907_v42  ;;  %v1055_v60 = vld [vmem:[%s1897_s10 + $0x18] sm:$0xff] (%p1296_p5) }
 0x19b   : > { %v995_v20 = vmax.f32 %v921_v18, 0.0  ;;  %1056 = vst [vmem:[%s1952_s20 + $0x18] sm:$0xff] (%p1296_p5), %v1055_v60 }
 0x19c   : > { %v865_v21 = vpop.f32.mrf.mxu1 }
 0x19d   : > { %1015 = vst [vmem:[%s1897_s10 + $0x40] sm:$0xff] %v995_v20  ;;  %v866_v2 = vadd.f32 %v865_v21, %v837_v19 }
 0x19e   : > { %v1063_v0 = vld [vmem:[%s1897_s10 + $0x38] sm:$0xff] (%p1296_p5) }
 0x19f   : > { %v999_v35 = vmax.f32 %v866_v2, 0.0  ;;  %v894_v9 = vpop.f32.mrf.mxu2  ;;  %1064 = vst [vmem:[%s1952_s20 + $0x60] sm:$0xff] (%p1296_p5), %v1063_v0 }
 0x1a0   : > { %v895_v23 = vadd.f32 %v894_v9, %v1907_v42 }
 0x1a1   : > { %1019 = vst [vmem:[%s1897_s10 + $0x60] sm:$0xff] %v999_v35 }
 0x1a2   : > { %v923_v48 = vpop.f32.mrf.mxu3 }
 0x1a3   : > { %v839_v24 = vpop.f32.mrf.mxu0  ;;  %v924_v22 = vadd.f32 %v923_v48, %v895_v23 }
 0x1a4   : > { %v840_v25 = vadd.f32 %v839_v24, %v1913_v55  ;;  %v1065_v1 = vld [vmem:[%s1897_s10 + $0x40] sm:$0xff] (%p1296_p5) }
 0x1a5   : > { %v1000_v53 = vmax.f32 %v924_v22, 0.0  ;;  %1066 = vst [vmem:[%s1952_s20 + $0x68] sm:$0xff] (%p1296_p5), %v1065_v1 }
 0x1a6   : > { %v868_v26 = vpop.f32.mrf.mxu1 }
 0x1a7   : > { %1020 = vst [vmem:[%s1897_s10 + $0x68] sm:$0xff] %v1000_v53  ;;  %v869_v27 = vadd.f32 %v868_v26, %v840_v25 }
 0x1a8   : > { %v1073_v6 = vld [vmem:[%s1897_s10 + $0x60] sm:$0xff] (%p1296_p5) }
 0x1a9   : > { %v1004_v29 = vmax.f32 %v869_v27, 0.0  ;;  %v897_v31 = vpop.f32.mrf.mxu2  ;;  %1074 = vst [vmem:[%s1952_s20 + $0xb0] sm:$0xff] (%p1296_p5), %v1073_v6 }
 0x1aa   : > { %v898_v32 = vadd.f32 %v897_v31, %v1913_v55 }
 0x1ab   : > { %1024 = vst [vmem:[%s1897_s10 + $0x88] sm:$0xff] %v1004_v29 }
 0x1ac   : > { %v926_v33 = vpop.f32.mrf.mxu3 }
 0x1ad   : > { %v927_v34 = vadd.f32 %v926_v33, %v898_v32  ;;  %v946_v36 = vpop.f32.mrf.mxu0 }
 0x1ae   : > { %v947_v37 = vadd.f32 %v946_v36, %v1891_v30  ;;  %v1075_v7 = vld [vmem:[%s1897_s10 + $0x68] sm:$0xff] (%p1296_p5) }
 0x1af   : > { %v1005_v38 = vmax.f32 %v927_v34, 0.0  ;;  %v975_v39 = vpop.f32.mrf.mxu1  ;;  %1076 = vst [vmem:[%s1952_s20 + $0xb8] sm:$0xff] (%p1296_p5), %v1075_v7 }
 0x1b0   : > { %v976_v40 = vadd.f32 %v975_v39, %v947_v37 }
 0x1b1   : > { %1025 = vst [vmem:[%s1897_s10 + $0x90] sm:$0xff] %v1005_v38 }
 0x1b2   : > { %v991_v41 = vmax.f32 %v976_v40, 0.0  ;;  %v1083_v12 = vld [vmem:[%s1897_s10 + $0x88] sm:$0xff] (%p1296_p5) }
 0x1b3   : > { %v952_v43 = vpop.f32.mrf.mxu2  ;;  %1084 = vst [vmem:[%s1952_s20 + $0x100] sm:$0xff] (%p1296_p5), %v1083_v12 }
 0x1b4   : > { %1011 = vst [vmem:[%s1897_s10 + $0x20] sm:$0xff] %v991_v41  ;;  %v953_v44 = vadd.f32 %v952_v43, %v1907_v42  ;;  %v1051_v42 = vld [vmem:[%s1897_s10 + $0x8] sm:$0xff] (%p1296_p5) }
 0x1b5   : > { %v949_v45 = vpop.f32.mrf.mxu0  ;;  %v981_v46 = vpop.f32.mrf.mxu3  ;;  %1052 = vst [vmem:[%s1952_s20 + $0x8] sm:$0xff] (%p1296_p5), %v1051_v42 }
 0x1b6   : > { %v950_v47 = vadd.f32 %v949_v45, %v1901_v28  ;;  %v982_v49 = vadd.f32 %v981_v46, %v953_v44  ;;  %v1049_v28 = vld [vmem:[%s1897_s10] sm:$0xff] (%p1296_p5) }
 0x1b7   : > { %v978_v50 = vpop.f32.mrf.mxu1  ;;  %1050 = vst [vmem:[%s1952_s20] sm:$0xff] (%p1296_p5), %v1049_v28 }
 0x1b8   : > { %v1001_v51 = vmax.f32 %v982_v49, 0.0  ;;  %v979_v30 = vadd.f32 %v978_v50, %v950_v47  ;;  %v1085_v13 = vld [vmem:[%s1897_s10 + $0x90] sm:$0xff] (%p1296_p5) }
 0x1b9   : > { %1086 = vst [vmem:[%s1952_s20 + $0x108] sm:$0xff] (%p1296_p5), %v1085_v13 }
 0x1ba   : > { %1021 = vst [vmem:[%s1897_s10 + $0x70] sm:$0xff] %v1001_v51  ;;  %v996_v52 = vmax.f32 %v979_v30, 0.0 }
 0x1bb   : > { %v955_v54 = vpop.f32.mrf.mxu2  ;;  %v1057_v61 = vld [vmem:[%s1897_s10 + $0x20] sm:$0xff] (%p1296_p5) }
 0x1bc   : > { %1016 = vst [vmem:[%s1897_s10 + $0x48] sm:$0xff] %v996_v52  ;;  %v956_v56 = vadd.f32 %v955_v54, %v1913_v55  ;;  %v1053_v55 = vld [vmem:[%s1897_s10 + $0x10] sm:$0xff] (%p1296_p5) }
 0x1bd   : > { %v984_v57 = vpop.f32.mrf.mxu3  ;;  %1054 = vst [vmem:[%s1952_s20 + $0x10] sm:$0xff] (%p1296_p5), %v1053_v55 }
 0x1be   : > { %v985_v58 = vadd.f32 %v984_v57, %v956_v56  ;;  %1033 = sbr.rel (!%p1296_p5) target bundleno = 459 (0x1cb), region = 59  ;;  %1058 = vst [vmem:[%s1952_s20 + $0x20] sm:$0xff] (%p1296_p5), %v1057_v61 }
 0x1c0   : > { %v1006_v59 = vmax.f32 %v985_v58, 0.0 }
 0x1c1   : > { %v1077_v8 = vld [vmem:[%s1897_s10 + $0x70] sm:$0xff] (%p1296_p5) }
 0x1c2   : > { %1026 = vst [vmem:[%s1897_s10 + $0x98] sm:$0xff] %v1006_v59 }
 0x1c3   : > { %v1067_v3 = vld [vmem:[%s1897_s10 + $0x48] sm:$0xff]  ;;  %1078 = vst [vmem:[%s1952_s20 + $0xc0] sm:$0xff] %v1077_v8 }
 0x1c4   : > { %1068 = vst [vmem:[%s1952_s20 + $0x70] sm:$0xff] %v1067_v3 }
 0x1c9   : > { %v1087_v14 = vld [vmem:[%s1897_s10 + $0x98] sm:$0xff] }
 0x1ca   : > { %1088 = vst [vmem:[%s1952_s20 + $0x110] sm:$0xff] %v1087_v14 }
 0x1cb PF: > { %p10_p10 = scmp.ge.s32.totalorder %s1283_s16, 4   ;;  %s2007_s12 = smov %s1239_s13 }
 0x1cc   : > { %s2008_s13 = smov %s1294_s19  ;;  %s2009_s14 = smov %s1283_s16 }
 0x1cd   :  { %12 = sbr.rel (!%p10_p10) target bundleno = 2 (0x2), region = 113 }

// kernel: cnn_forward.5
= control target key start
LH: loop header
LB: loop body
LE: loop exit
PB: predicated region body
PF: predicated region fallthrough
CT: control target
= control target key end

     0   :  { %s988_s12 = smov 0   ;;  %s990_s13 = smov 0   ;;  %s1388_s0 = inlined_call_operand.vmem [shape: f32[64,512], index: 0, kind: input, shape index: {}]   ;;  %s1389_s1 = inlined_call_operand.vmem [shape: f32[512,256], index: 1, kind: input, shape index: {}]   ;;  %s1390_s2 = inlined_call_operand.vmem [shape: f32[64,1], index: 2, kind: input, shape index: {}]   ;;  %s1391_s3 = inlined_call_operand.vmem [shape: f32[64,256], index: 3, kind: output, shape index: {}]  }
   0x1   :  { %s992_s14 = smov 0  }
   0x2 LB: > { %s902_s15 = sadd.s32 4294967295, %s965_s14   ;;  %s1005_s16 = sadd.s32 1, %s965_s14   ;;  %s965_s14 = sphi %s992_s14, %s1395_s14   ;;  %s961_s13 = sphi %s990_s13, %s1394_s13   ;;  %s957_s12 = sphi %s988_s12, %s1393_s12  }
   0x3   : > { %s38_s17 = ssub.s32 %s965_s14, %s1005_s16  ;;  %s41_s18 = sadd.s32 1, %s961_s13 }
   0x4   : > { %p39_p0 = scmp.eq.s32.totalorder %s38_s17, 0  ;;  %p48_p1 = scmp.ne.s32.totalorder %s961_s13, %s957_s12 }
   0x5   : > { %p49_p2 = scmp.eq.s32.totalorder %s965_s14, 0  ;;  %p99_p3 = scmp.eq.s32.totalorder %s902_s15, 1 }
   0x6   : > { %s1016_s19 = scalar_select %p39_p0, %s961_s13, %s41_s18  }
   0x7   : > { %p50_p4 = por %p49_p2, %p48_p1  ;;  %p1018_p5 = por %p99_p3, %p48_p1 }
   0x8   : > { %p905_p6 = scmp.ge.s32.totalorder %s965_s14, 2 }
   0xa   : > { %127 = sbr.rel (%p905_p6) target bundleno = 83 (0x53), region = 24 }
   0xf   : > { %130 = sbr.rel (!%p50_p4) target bundleno = 83 (0x53), region = 28  ;;  %s132_s21 = sand.u32 (%p50_p4), 1, %s961_s13  }
  0x10   : > { %s907_s22 = sshll.u32 (%p50_p4), %s965_s14, 3  ;;  %s906_s23 = sshll.u32 (%p50_p4), %s132_s21, 9 }
  0x11   : > { %s1028_s26 = scalar_lea.vmem (%p50_p4), %s1389_s1, %s907_s22  ;;  %s1033_s27 = scalar_lea.vmem (%p50_p4), [#allocation2], %s906_s23 }
  0x12   : > { %v291_v0 = vld [vmem:[%s1028_s26] sm:$0xff] (%p50_p4)  ;;  %v293_v1 = vld [vmem:[%s1028_s26 + $0x10] sm:$0xff] (%p50_p4) }
  0x13   : > { %v295_v2 = vld [vmem:[%s1028_s26 + $0x20] sm:$0xff] (%p50_p4)  ;;  %292 = vst [vmem:[%s1033_s27] sm:$0xff] (%p50_p4), %v291_v0  ;;  %v297_v3 = vld [vmem:[%s1028_s26 + $0x30] sm:$0xff] (%p50_p4) }
  0x14   : > { %294 = vst [vmem:[%s1033_s27 + $0x8] sm:$0xff] %v293_v1  ;;  %v299_v4 = vld [vmem:[%s1028_s26 + $0x40] sm:$0xff]  ;;  %v301_v5 = vld [vmem:[%s1028_s26 + $0x50] sm:$0xff] }
  0x15   : > { %296 = vst [vmem:[%s1033_s27 + $0x10] sm:$0xff] %v295_v2  ;;  %v303_v6 = vld [vmem:[%s1028_s26 + $0x60] sm:$0xff]  ;;  %v305_v7 = vld [vmem:[%s1028_s26 + $0x70] sm:$0xff] }
  0x16   : > { %298 = vst [vmem:[%s1033_s27 + $0x18] sm:$0xff] %v297_v3  ;;  %v307_v8 = vld [vmem:[%s1028_s26 + $0x80] sm:$0xff]  ;;  %v309_v9 = vld [vmem:[%s1028_s26 + $0x90] sm:$0xff] }
  0x17   : > { %300 = vst [vmem:[%s1033_s27 + $0x20] sm:$0xff] %v299_v4  ;;  %v311_v10 = vld [vmem:[%s1028_s26 + $0xa0] sm:$0xff]  ;;  %v313_v11 = vld [vmem:[%s1028_s26 + $0xb0] sm:$0xff] }
  0x18   : > { %302 = vst [vmem:[%s1033_s27 + $0x28] sm:$0xff] %v301_v5  ;;  %v315_v12 = vld [vmem:[%s1028_s26 + $0xc0] sm:$0xff]  ;;  %v317_v13 = vld [vmem:[%s1028_s26 + $0xd0] sm:$0xff] }
  0x19   : > { %304 = vst [vmem:[%s1033_s27 + $0x30] sm:$0xff] %v303_v6  ;;  %v319_v14 = vld [vmem:[%s1028_s26 + $0xe0] sm:$0xff]  ;;  %v321_v15 = vld [vmem:[%s1028_s26 + $0xf0] sm:$0xff] }
  0x1a   : > { %306 = vst [vmem:[%s1033_s27 + $0x38] sm:$0xff] %v305_v7  ;;  %v323_v16 = vld [vmem:[%s1028_s26 + $0x100] sm:$0xff]  ;;  %v325_v17 = vld [vmem:[%s1028_s26 + $0x110] sm:$0xff] }
  0x1b   : > { %308 = vst [vmem:[%s1033_s27 + $0x40] sm:$0xff] %v307_v8  ;;  %v327_v18 = vld [vmem:[%s1028_s26 + $0x120] sm:$0xff]  ;;  %v329_v19 = vld [vmem:[%s1028_s26 + $0x130] sm:$0xff] }
  0x1c   : > { %310 = vst [vmem:[%s1033_s27 + $0x48] sm:$0xff] %v309_v9  ;;  %v331_v20 = vld [vmem:[%s1028_s26 + $0x140] sm:$0xff]  ;;  %v333_v21 = vld [vmem:[%s1028_s26 + $0x150] sm:$0xff] }
  0x1d   : > { %312 = vst [vmem:[%s1033_s27 + $0x50] sm:$0xff] %v311_v10  ;;  %v335_v22 = vld [vmem:[%s1028_s26 + $0x160] sm:$0xff]  ;;  %v337_v23 = vld [vmem:[%s1028_s26 + $0x170] sm:$0xff] }
  0x1e   : > { %314 = vst [vmem:[%s1033_s27 + $0x58] sm:$0xff] %v313_v11  ;;  %v339_v24 = vld [vmem:[%s1028_s26 + $0x180] sm:$0xff]  ;;  %v341_v25 = vld [vmem:[%s1028_s26 + $0x190] sm:$0xff] }
  0x1f   : > { %316 = vst [vmem:[%s1033_s27 + $0x60] sm:$0xff] %v315_v12  ;;  %v343_v26 = vld [vmem:[%s1028_s26 + $0x1a0] sm:$0xff]  ;;  %v345_v27 = vld [vmem:[%s1028_s26 + $0x1b0] sm:$0xff] }
  0x20   : > { %318 = vst [vmem:[%s1033_s27 + $0x68] sm:$0xff] %v317_v13  ;;  %v347_v28 = vld [vmem:[%s1028_s26 + $0x1c0] sm:$0xff]  ;;  %v349_v29 = vld [vmem:[%s1028_s26 + $0x1d0] sm:$0xff] }
  0x21   : > { %320 = vst [vmem:[%s1033_s27 + $0x70] sm:$0xff] %v319_v14  ;;  %v351_v30 = vld [vmem:[%s1028_s26 + $0x1e0] sm:$0xff]  ;;  %v353_v31 = vld [vmem:[%s1028_s26 + $0x1f0] sm:$0xff] }
  0x22   : > { %322 = vst [vmem:[%s1033_s27 + $0x78] sm:$0xff] %v321_v15  ;;  %v355_v32 = vld [vmem:[%s1028_s26 + $0x200] sm:$0xff]  ;;  %v357_v33 = vld [vmem:[%s1028_s26 + $0x210] sm:$0xff] }
  0x23   : > { %324 = vst [vmem:[%s1033_s27 + $0x80] sm:$0xff] %v323_v16  ;;  %v359_v34 = vld [vmem:[%s1028_s26 + $0x220] sm:$0xff]  ;;  %v361_v35 = vld [vmem:[%s1028_s26 + $0x230] sm:$0xff] }
  0x24   : > { %326 = vst [vmem:[%s1033_s27 + $0x88] sm:$0xff] %v325_v17  ;;  %v363_v36 = vld [vmem:[%s1028_s26 + $0x240] sm:$0xff]  ;;  %v365_v37 = vld [vmem:[%s1028_s26 + $0x250] sm:$0xff] }
  0x25   : > { %328 = vst [vmem:[%s1033_s27 + $0x90] sm:$0xff] %v327_v18  ;;  %v367_v38 = vld [vmem:[%s1028_s26 + $0x260] sm:$0xff]  ;;  %v369_v39 = vld [vmem:[%s1028_s26 + $0x270] sm:$0xff] }
  0x26   : > { %330 = vst [vmem:[%s1033_s27 + $0x98] sm:$0xff] %v329_v19  ;;  %v371_v40 = vld [vmem:[%s1028_s26 + $0x280] sm:$0xff]  ;;  %v373_v41 = vld [vmem:[%s1028_s26 + $0x290] sm:$0xff] }
  0x27   : > { %332 = vst [vmem:[%s1033_s27 + $0xa0] sm:$0xff] %v331_v20  ;;  %v375_v42 = vld [vmem:[%s1028_s26 + $0x2a0] sm:$0xff]  ;;  %v377_v43 = vld [vmem:[%s1028_s26 + $0x2b0] sm:$0xff] }
  0x28   : > { %334 = vst [vmem:[%s1033_s27 + $0xa8] sm:$0xff] %v333_v21  ;;  %v379_v44 = vld [vmem:[%s1028_s26 + $0x2c0] sm:$0xff]  ;;  %v381_v45 = vld [vmem:[%s1028_s26 + $0x2d0] sm:$0xff] }
  0x29   : > { %336 = vst [vmem:[%s1033_s27 + $0xb0] sm:$0xff] %v335_v22  ;;  %v383_v46 = vld [vmem:[%s1028_s26 + $0x2e0] sm:$0xff]  ;;  %v385_v47 = vld [vmem:[%s1028_s26 + $0x2f0] sm:$0xff] }
  0x2a   : > { %338 = vst [vmem:[%s1033_s27 + $0xb8] sm:$0xff] %v337_v23  ;;  %v387_v48 = vld [vmem:[%s1028_s26 + $0x300] sm:$0xff]  ;;  %v389_v49 = vld [vmem:[%s1028_s26 + $0x310] sm:$0xff] }
  0x2b   : > { %340 = vst [vmem:[%s1033_s27 + $0xc0] sm:$0xff] %v339_v24  ;;  %v391_v50 = vld [vmem:[%s1028_s26 + $0x320] sm:$0xff]  ;;  %v393_v51 = vld [vmem:[%s1028_s26 + $0x330] sm:$0xff] }
  0x2c   : > { %342 = vst [vmem:[%s1033_s27 + $0xc8] sm:$0xff] %v341_v25  ;;  %v395_v52 = vld [vmem:[%s1028_s26 + $0x340] sm:$0xff]  ;;  %v397_v53 = vld [vmem:[%s1028_s26 + $0x350] sm:$0xff] }
  0x2d   : > { %344 = vst [vmem:[%s1033_s27 + $0xd0] sm:$0xff] %v343_v26  ;;  %v399_v54 = vld [vmem:[%s1028_s26 + $0x360] sm:$0xff]  ;;  %v401_v55 = vld [vmem:[%s1028_s26 + $0x370] sm:$0xff] }
  0x2e   : > { %346 = vst [vmem:[%s1033_s27 + $0xd8] sm:$0xff] %v345_v27  ;;  %v403_v56 = vld [vmem:[%s1028_s26 + $0x380] sm:$0xff]  ;;  %v405_v57 = vld [vmem:[%s1028_s26 + $0x390] sm:$0xff] }
  0x2f   : > { %348 = vst [vmem:[%s1033_s27 + $0xe0] sm:$0xff] %v347_v28  ;;  %v407_v58 = vld [vmem:[%s1028_s26 + $0x3a0] sm:$0xff]  ;;  %v409_v59 = vld [vmem:[%s1028_s26 + $0x3b0] sm:$0xff] }
  0x30   : > { %350 = vst [vmem:[%s1033_s27 + $0xe8] sm:$0xff] %v349_v29  ;;  %v411_v60 = vld [vmem:[%s1028_s26 + $0x3c0] sm:$0xff]  ;;  %v413_v61 = vld [vmem:[%s1028_s26 + $0x3d0] sm:$0xff] }
  0x31   : > { %352 = vst [vmem:[%s1033_s27 + $0xf0] sm:$0xff] %v351_v30  ;;  %v415_v62 = vld [vmem:[%s1028_s26 + $0x3e0] sm:$0xff]  ;;  %v417_v63 = vld [vmem:[%s1028_s26 + $0x3f0] sm:$0xff] }
  0x32   : > { %354 = vst [vmem:[%s1033_s27 + $0xf8] sm:$0xff] %v353_v31 }
  0x33   : > { %356 = vst [vmem:[%s1033_s27 + $0x100] sm:$0xff] %v355_v32 }
  0x34   : > { %358 = vst [vmem:[%s1033_s27 + $0x108] sm:$0xff] %v357_v33 }
  0x35   : > { %360 = vst [vmem:[%s1033_s27 + $0x110] sm:$0xff] %v359_v34 }
  0x36   : > { %362 = vst [vmem:[%s1033_s27 + $0x118] sm:$0xff] %v361_v35 }
  0x37   : > { %364 = vst [vmem:[%s1033_s27 + $0x120] sm:$0xff] %v363_v36 }
  0x38   : > { %366 = vst [vmem:[%s1033_s27 + $0x128] sm:$0xff] %v365_v37 }
  0x39   : > { %368 = vst [vmem:[%s1033_s27 + $0x130] sm:$0xff] %v367_v38 }
  0x3a   : > { %370 = vst [vmem:[%s1033_s27 + $0x138] sm:$0xff] %v369_v39 }
  0x3b   : > { %372 = vst [vmem:[%s1033_s27 + $0x140] sm:$0xff] %v371_v40 }
  0x3c   : > { %374 = vst [vmem:[%s1033_s27 + $0x148] sm:$0xff] %v373_v41 }
  0x3d   : > { %376 = vst [vmem:[%s1033_s27 + $0x150] sm:$0xff] %v375_v42 }
  0x3e   : > { %378 = vst [vmem:[%s1033_s27 + $0x158] sm:$0xff] %v377_v43 }
  0x3f   : > { %380 = vst [vmem:[%s1033_s27 + $0x160] sm:$0xff] %v379_v44 }
  0x40   : > { %382 = vst [vmem:[%s1033_s27 + $0x168] sm:$0xff] %v381_v45 }
  0x41   : > { %384 = vst [vmem:[%s1033_s27 + $0x170] sm:$0xff] %v383_v46 }
  0x42   : > { %386 = vst [vmem:[%s1033_s27 + $0x178] sm:$0xff] %v385_v47 }
  0x43   : > { %388 = vst [vmem:[%s1033_s27 + $0x180] sm:$0xff] %v387_v48 }
  0x44   : > { %390 = vst [vmem:[%s1033_s27 + $0x188] sm:$0xff] %v389_v49 }
  0x45   : > { %392 = vst [vmem:[%s1033_s27 + $0x190] sm:$0xff] %v391_v50 }
  0x46   : > { %394 = vst [vmem:[%s1033_s27 + $0x198] sm:$0xff] %v393_v51 }
  0x47   : > { %396 = vst [vmem:[%s1033_s27 + $0x1a0] sm:$0xff] %v395_v52 }
  0x48   : > { %398 = vst [vmem:[%s1033_s27 + $0x1a8] sm:$0xff] %v397_v53 }
  0x49   : > { %400 = vst [vmem:[%s1033_s27 + $0x1b0] sm:$0xff] %v399_v54 }
  0x4a   : > { %402 = vst [vmem:[%s1033_s27 + $0x1b8] sm:$0xff] %v401_v55 }
  0x4b   : > { %404 = vst [vmem:[%s1033_s27 + $0x1c0] sm:$0xff] %v403_v56 }
  0x4c   : > { %406 = vst [vmem:[%s1033_s27 + $0x1c8] sm:$0xff] %v405_v57 }
  0x4d   : > { %408 = vst [vmem:[%s1033_s27 + $0x1d0] sm:$0xff] %v407_v58 }
  0x4e   : > { %410 = vst [vmem:[%s1033_s27 + $0x1d8] sm:$0xff] %v409_v59 }
  0x4f   : > { %412 = vst [vmem:[%s1033_s27 + $0x1e0] sm:$0xff] %v411_v60 }
  0x50   : > { %414 = vst [vmem:[%s1033_s27 + $0x1e8] sm:$0xff] %v413_v61 }
  0x51   : > { %416 = vst [vmem:[%s1033_s27 + $0x1f0] sm:$0xff] %v415_v62 }
  0x52   : > { %418 = vst [vmem:[%s1033_s27 + $0x1f8] sm:$0xff] %v417_v63 }
  0x53 PF: > { %p908_p7 = scmp.ge.s32.totalorder %s965_s14, 1  ;;  %p423_p8 = scmp.lt.s32.totalorder %s965_s14, 3 }
  0x55   : > { %p424_p9 = pnand %p908_p7, %p423_p8 }
  0x56   : > { %s430_s28 = sand.u32 (!%p424_p9), 1, %s957_s12  }
  0x57   : > { %427 = sbr.rel (%p424_p9) target bundleno = 328 (0x148), region = 66  ;;  %s909_s29 = sshll.u32 (!%p424_p9), %s430_s28, 9 }
  0x58   : > { %s1165_s30 = scalar_lea.vmem (!%p424_p9), [#allocation2], %s909_s29  ;;  %s910_s8 = sshll.u32 (!%p424_p9), %s430_s28, 6 }
  0x59   : > { %s1353_s9 = scalar_lea.vmem (!%p424_p9), [#allocation3], %s910_s8 }
  0x5c   : > { %v499_v0 = vld [vmem:[%s1165_s30 + $0x78] sm:$0xff]  ;;  %v498_v2 = vld [vmem:[%s1165_s30 + $0x70] sm:$0xff]  ;;  %v497_v6 = vld [vmem:[%s1165_s30 + $0x68] sm:$0xff]  ;;  %s912_s12 = sshll.u32 (%p1018_p5), %s902_s15, 3 }
  0x5d   : > { %v531_v1 = vld [vmem:[%s1165_s30 + $0x178] sm:$0xff]  ;;  %596 = vmatpush.msra.mxu0 %v499_v0  ;;  %v530_v4 = vld [vmem:[%s1165_s30 + $0x170] sm:$0xff]  ;;  %v529_v8 = vld [vmem:[%s1165_s30 + $0x168] sm:$0xff]  ;;  %s784_s11 = scalar_lea.vmem (%p1018_p5), %s1391_s3, %s912_s12 }
  0x5e   : > { %678 = vmatpush.msra.mxu2 %v531_v1  ;;  %v515_v3 = vld [vmem:[%s1165_s30 + $0xf8] sm:$0xff]  ;;  %v514_v7 = vld [vmem:[%s1165_s30 + $0xf0] sm:$0xff]  ;;  %v513_v10 = vld [vmem:[%s1165_s30 + $0xe8] sm:$0xff] }
  0x5f   : > { %v547_v5 = vld [vmem:[%s1165_s30 + $0x1f8] sm:$0xff]  ;;  %637 = vmatpush.msra.mxu1 %v515_v3  ;;  %597 = vmatpush.msra.mxu0 %v498_v2  ;;  %v546_v9 = vld [vmem:[%s1165_s30 + $0x1f0] sm:$0xff]  ;;  %v496_v11 = vld [vmem:[%s1165_s30 + $0x60] sm:$0xff] }
  0x60   : > { %719 = vmatpush.msra.mxu3 %v547_v5  ;;  %679 = vmatpush.msra.mxu2 %v530_v4  ;;  %v528_v12 = vld [vmem:[%s1165_s30 + $0x160] sm:$0xff]  ;;  %v545_v13 = vld [vmem:[%s1165_s30 + $0x1e8] sm:$0xff]  ;;  %v495_v16 = vld [vmem:[%s1165_s30 + $0x58] sm:$0xff] }
  0x61   : > { %638 = vmatpush.msra.mxu1 %v514_v7  ;;  %598 = vmatpush.msra.mxu0 %v497_v6  ;;  %v512_v14 = vld [vmem:[%s1165_s30 + $0xe0] sm:$0xff]  ;;  %v527_v17 = vld [vmem:[%s1165_s30 + $0x158] sm:$0xff]  ;;  %v494_v20 = vld [vmem:[%s1165_s30 + $0x50] sm:$0xff]  ;;  %v967_v6 = vmov 0  }
  0x62   : > { %720 = vmatpush.msra.mxu3 %v546_v9  ;;  %680 = vmatpush.msra.mxu2 %v529_v8  ;;  %v544_v15 = vld [vmem:[%s1165_s30 + $0x1e0] sm:$0xff]  ;;  %v511_v18 = vld [vmem:[%s1165_s30 + $0xd8] sm:$0xff]  ;;  %v526_v21 = vld [vmem:[%s1165_s30 + $0x150] sm:$0xff] }
  0x63   : > { %639 = vmatpush.msra.mxu1 %v513_v10  ;;  %599 = vmatpush.msra.mxu0 %v496_v11  ;;  %v543_v19 = vld [vmem:[%s1165_s30 + $0x1d8] sm:$0xff]  ;;  %v510_v22 = vld [vmem:[%s1165_s30 + $0xd0] sm:$0xff]  ;;  %v493_v24 = vld [vmem:[%s1165_s30 + $0x48] sm:$0xff] }
  0x64   : > { %721 = vmatpush.msra.mxu3 %v545_v13  ;;  %681 = vmatpush.msra.mxu2 %v528_v12  ;;  %v542_v23 = vld [vmem:[%s1165_s30 + $0x1d0] sm:$0xff]  ;;  %v525_v25 = vld [vmem:[%s1165_s30 + $0x148] sm:$0xff]  ;;  %v492_v28 = vld [vmem:[%s1165_s30 + $0x40] sm:$0xff] }
  0x65   : > { %640 = vmatpush.msra.mxu1 %v512_v14  ;;  %600 = vmatpush.msra.mxu0 %v495_v16  ;;  %v509_v26 = vld [vmem:[%s1165_s30 + $0xc8] sm:$0xff]  ;;  %v524_v29 = vld [vmem:[%s1165_s30 + $0x140] sm:$0xff]  ;;  %v491_v32 = vld [vmem:[%s1165_s30 + $0x38] sm:$0xff] }
  0x66   : > { %722 = vmatpush.msra.mxu3 %v544_v15  ;;  %682 = vmatpush.msra.mxu2 %v527_v17  ;;  %v541_v27 = vld [vmem:[%s1165_s30 + $0x1c8] sm:$0xff]  ;;  %v508_v30 = vld [vmem:[%s1165_s30 + $0xc0] sm:$0xff]  ;;  %v523_v33 = vld [vmem:[%s1165_s30 + $0x138] sm:$0xff] }
  0x67   : > { %641 = vmatpush.msra.mxu1 %v511_v18  ;;  %601 = vmatpush.msra.mxu0 %v494_v20  ;;  %v540_v31 = vld [vmem:[%s1165_s30 + $0x1c0] sm:$0xff]  ;;  %v507_v34 = vld [vmem:[%s1165_s30 + $0xb8] sm:$0xff]  ;;  %v490_v36 = vld [vmem:[%s1165_s30 + $0x30] sm:$0xff] }
  0x68   : > { %723 = vmatpush.msra.mxu3 %v543_v19  ;;  %683 = vmatpush.msra.mxu2 %v526_v21  ;;  %v539_v35 = vld [vmem:[%s1165_s30 + $0x1b8] sm:$0xff]  ;;  %v522_v37 = vld [vmem:[%s1165_s30 + $0x130] sm:$0xff]  ;;  %v489_v40 = vld [vmem:[%s1165_s30 + $0x28] sm:$0xff] }
  0x69   : > { %642 = vmatpush.msra.mxu1 %v510_v22  ;;  %602 = vmatpush.msra.mxu0 %v493_v24  ;;  %v506_v38 = vld [vmem:[%s1165_s30 + $0xb0] sm:$0xff]  ;;  %v521_v41 = vld [vmem:[%s1165_s30 + $0x128] sm:$0xff]  ;;  %v488_v44 = vld [vmem:[%s1165_s30 + $0x20] sm:$0xff] }
  0x6a   : > { %724 = vmatpush.msra.mxu3 %v542_v23  ;;  %684 = vmatpush.msra.mxu2 %v525_v25  ;;  %v538_v39 = vld [vmem:[%s1165_s30 + $0x1b0] sm:$0xff]  ;;  %v505_v42 = vld [vmem:[%s1165_s30 + $0xa8] sm:$0xff]  ;;  %v520_v45 = vld [vmem:[%s1165_s30 + $0x120] sm:$0xff] }
  0x6b   : > { %643 = vmatpush.msra.mxu1 %v509_v26  ;;  %603 = vmatpush.msra.mxu0 %v492_v28  ;;  %v537_v43 = vld [vmem:[%s1165_s30 + $0x1a8] sm:$0xff]  ;;  %v504_v46 = vld [vmem:[%s1165_s30 + $0xa0] sm:$0xff]  ;;  %v487_v48 = vld [vmem:[%s1165_s30 + $0x18] sm:$0xff] }
  0x6c   : > { %725 = vmatpush.msra.mxu3 %v541_v27  ;;  %685 = vmatpush.msra.mxu2 %v524_v29  ;;  %v536_v47 = vld [vmem:[%s1165_s30 + $0x1a0] sm:$0xff]  ;;  %v519_v49 = vld [vmem:[%s1165_s30 + $0x118] sm:$0xff]  ;;  %v486_v52 = vld [vmem:[%s1165_s30 + $0x10] sm:$0xff] }
  0x6d   : > { %644 = vmatpush.msra.mxu1 %v508_v30  ;;  %604 = vmatpush.msra.mxu0 %v491_v32  ;;  %v503_v50 = vld [vmem:[%s1165_s30 + $0x98] sm:$0xff]  ;;  %v518_v53 = vld [vmem:[%s1165_s30 + $0x110] sm:$0xff]  ;;  %v485_v56 = vld [vmem:[%s1165_s30 + $0x8] sm:$0xff] }
  0x6e   : > { %726 = vmatpush.msra.mxu3 %v540_v31  ;;  %686 = vmatpush.msra.mxu2 %v523_v33  ;;  %v535_v51 = vld [vmem:[%s1165_s30 + $0x198] sm:$0xff]  ;;  %v502_v54 = vld [vmem:[%s1165_s30 + $0x90] sm:$0xff]  ;;  %v517_v57 = vld [vmem:[%s1165_s30 + $0x108] sm:$0xff] }
  0x6f   : > { %645 = vmatpush.msra.mxu1 %v507_v34  ;;  %605 = vmatpush.msra.mxu0 %v490_v36  ;;  %v534_v55 = vld [vmem:[%s1165_s30 + $0x190] sm:$0xff]  ;;  %v501_v58 = vld [vmem:[%s1165_s30 + $0x88] sm:$0xff]  ;;  %v484_v60 = vld [vmem:[%s1165_s30] sm:$0xff] }
  0x70   : > { %727 = vmatpush.msra.mxu3 %v539_v35  ;;  %687 = vmatpush.msra.mxu2 %v522_v37  ;;  %v533_v59 = vld [vmem:[%s1165_s30 + $0x188] sm:$0xff]  ;;  %v516_v61 = vld [vmem:[%s1165_s30 + $0x100] sm:$0xff]  ;;  %v454_v63 = vld [vmem:[%s1388_s0 + $0x10] sm:$0xff] }
  0x71   : > { %646 = vmatpush.msra.mxu1 %v506_v38  ;;  %606 = vmatpush.msra.mxu0 %v489_v40  ;;  %v452_v62 = vld [vmem:[%s1388_s0] sm:$0xff]  ;;  %v453_v2 = vld [vmem:[%s1388_s0 + $0x8] sm:$0xff]  ;;  %v455_v3 = vld [vmem:[%s1388_s0 + $0x18] sm:$0xff] }
  0x72   : > { %728 = vmatpush.msra.mxu3 %v538_v39  ;;  %688 = vmatpush.msra.mxu2 %v521_v41  ;;  %v500_v0 = vld [vmem:[%s1165_s30 + $0x80] sm:$0xff]  ;;  %v550_v5 = vld [vmem:[%s1390_s2 + $0x10] sm:$0xff]  ;;  %v457_v9 = vld [vmem:[%s1388_s0 + $0x28] sm:$0xff] }
  0x73   : > { %647 = vmatpush.msra.mxu1 %v505_v42  ;;  %607 = vmatpush.msra.mxu0 %v488_v44  ;;  %v532_v1 = vld [vmem:[%s1165_s30 + $0x180] sm:$0xff]  ;;  %v458_v8 = vld [vmem:[%s1388_s0 + $0x30] sm:$0xff]  ;;  %v459_v10 = vld [vmem:[%s1388_s0 + $0x38] sm:$0xff] }
  0x74   : > { %729 = vmatpush.msra.mxu3 %v537_v43  ;;  %689 = vmatpush.msra.mxu2 %v520_v45  ;;  %v548_v4 = vld [vmem:[%s1390_s2] sm:$0xff]  ;;  %v549_v11 = vld [vmem:[%s1390_s2 + $0x8] sm:$0xff]  ;;  %v551_v12 = vld [vmem:[%s1390_s2 + $0x18] sm:$0xff] }
  0x75   : > { %648 = vmatpush.msra.mxu1 %v504_v46  ;;  %608 = vmatpush.msra.mxu0 %v487_v48  ;;  %v456_v7 = vld [vmem:[%s1388_s0 + $0x20] sm:$0xff]  ;;  %v462_v14 = vld [vmem:[%s1388_s0 + $0x50] sm:$0xff]  ;;  %v461_v15 = vld [vmem:[%s1388_s0 + $0x48] sm:$0xff] }
  0x76   : > { %730 = vmatpush.msra.mxu3 %v536_v47  ;;  %690 = vmatpush.msra.mxu2 %v519_v49  ;;  %v460_v13 = vld [vmem:[%s1388_s0 + $0x40] sm:$0xff]  ;;  %v463_v16 = vld [vmem:[%s1388_s0 + $0x58] sm:$0xff]  ;;  %v554_v18 = vld [vmem:[%s1390_s2 + $0x30] sm:$0xff] }
  0x77   : > { %649 = vmatpush.msra.mxu1 %v503_v50  ;;  %609 = vmatpush.msra.mxu0 %v486_v52  ;;  %v555_v17 = vld [vmem:[%s1390_s2 + $0x38] sm:$0xff]  ;;  %v464_v19 = vld [vmem:[%s1388_s0 + $0x60] sm:$0xff]  ;;  %v466_v20 = vld [vmem:[%s1388_s0 + $0x70] sm:$0xff] }
  0x78   : > { %731 = vmatpush.msra.mxu3 %v535_v51  ;;  %691 = vmatpush.msra.mxu2 %v518_v53  ;;  %v465_v21 = vld [vmem:[%s1388_s0 + $0x68] sm:$0xff]  ;;  %v467_v22 = vld [vmem:[%s1388_s0 + $0x78] sm:$0xff]  ;;  %v552_v23 = vld [vmem:[%s1390_s2 + $0x20] sm:$0xff] }
  0x79   : > { %650 = vmatpush.msra.mxu1 %v502_v54  ;;  %610 = vmatpush.msra.mxu0 %v485_v56  ;;  %v468_v24 = vld [vmem:[%s1388_s0 + $0x80] sm:$0xff]  ;;  %v470_v25 = vld [vmem:[%s1388_s0 + $0x90] sm:$0xff]  ;;  %v469_v26 = vld [vmem:[%s1388_s0 + $0x88] sm:$0xff] }
  0x7a   : > { %732 = vmatpush.msra.mxu3 %v534_v55  ;;  %692 = vmatpush.msra.mxu2 %v517_v57  ;;  %v471_v27 = vld [vmem:[%s1388_s0 + $0x98] sm:$0xff]  ;;  %v553_v28 = vld [vmem:[%s1390_s2 + $0x28] sm:$0xff]  ;;  %v472_v29 = vld [vmem:[%s1388_s0 + $0xa0] sm:$0xff] }
  0x7b   : > { %651 = vmatpush.msra.mxu1 %v501_v58  ;;  %611 = vmatpush.msra.mxu0 %v484_v60  ;;  %v474_v30 = vld [vmem:[%s1388_s0 + $0xb0] sm:$0xff]  ;;  %v473_v31 = vld [vmem:[%s1388_s0 + $0xa8] sm:$0xff]  ;;  %v475_v32 = vld [vmem:[%s1388_s0 + $0xb8] sm:$0xff] }
  0x7c   : > { %733 = vmatpush.msra.mxu3 %v533_v59  ;;  %693 = vmatpush.msra.mxu2 %v516_v61  ;;  %v476_v33 = vld [vmem:[%s1388_s0 + $0xc0] sm:$0xff]  ;;  %v478_v34 = vld [vmem:[%s1388_s0 + $0xd0] sm:$0xff]  ;;  %v477_v35 = vld [vmem:[%s1388_s0 + $0xc8] sm:$0xff] }
  0x7d   : > { %612 = vmatmul.f32.vlgmr.msra.gmra.mxu0 %v452_v62  ;;  %694 = vmatmul.f32.vlgmr.msra.gmra.mxu2 %v454_v63  ;;  %v479_v36 = vld [vmem:[%s1388_s0 + $0xd8] sm:$0xff]  ;;  %v480_v37 = vld [vmem:[%s1388_s0 + $0xe0] sm:$0xff]  ;;  %v482_v38 = vld [vmem:[%s1388_s0 + $0xf0] sm:$0xff] }
  0x7e   : > { %652 = vmatpush.msra.mxu1 %v500_v0  ;;  %734 = vmatpush.msra.mxu3 %v532_v1  ;;  %v481_v39 = vld [vmem:[%s1388_s0 + $0xe8] sm:$0xff]  ;;  %v483_v40 = vld [vmem:[%s1388_s0 + $0xf8] sm:$0xff] }
  0x7f   : > { %653 = vmatmul.f32.vlgmr.msra.gmra.mxu1 %v453_v2  ;;  %735 = vmatmul.f32.vlgmr.msra.gmra.mxu3 %v455_v3 }
  0x80   : > { %940 = vset.pattern.permute.xlu0 %v967_v6  ;;  %941 = vset.pattern.permute.xlu1 %v967_v6 }
  0x81   : > { %558 = vperm.xlu0 %940, %v548_v4   ;;  %568 = vperm.xlu1 %941, %v550_v5  }
  0x82   : > { %942 = vset.pattern.permute.xlu2 %v967_v6 }
  0x83   : > { %578 = vperm.xlu2 %942, %v552_v23  }
  0x85   : > { %615 = vmatmul.f32.gmra.mxu0 %v456_v7  ;;  %697 = vmatmul.f32.gmra.mxu2 %v458_v8 }
  0x87   : > { %656 = vmatmul.f32.gmra.mxu1 %v457_v9  ;;  %738 = vmatmul.f32.gmra.mxu3 %v459_v10 }
  0x89   : > { %563 = vperm.xlu0 %940, %v549_v11   ;;  %573 = vperm.xlu1 %941, %v551_v12  }
  0x8b   : > { %583 = vperm.xlu2 %942, %v553_v28  }
  0x8d   : > { %618 = vmatmul.f32.gmra.mxu0 %v460_v13  ;;  %700 = vmatmul.f32.gmra.mxu2 %v462_v14 }
  0x8f   : > { %659 = vmatmul.f32.gmra.mxu1 %v461_v15  ;;  %741 = vmatmul.f32.gmra.mxu3 %v463_v16 }
  0x91   : > { %593 = vperm.xlu1 %941, %v555_v17   ;;  %588 = vperm.xlu0 %940, %v554_v18  }
  0x95   : > { %621 = vmatmul.f32.gmra.mxu0 %v464_v19  ;;  %703 = vmatmul.f32.gmra.mxu2 %v466_v20 }
  0x97   : > { %662 = vmatmul.f32.gmra.mxu1 %v465_v21  ;;  %744 = vmatmul.f32.gmra.mxu3 %v467_v22 }
  0x9d   : > { %624 = vmatmul.f32.gmra.mxu0 %v468_v24  ;;  %706 = vmatmul.f32.gmra.mxu2 %v470_v25 }
  0x9f   : > { %665 = vmatmul.f32.gmra.mxu1 %v469_v26  ;;  %747 = vmatmul.f32.gmra.mxu3 %v471_v27 }
  0xa5   : > { %627 = vmatmul.f32.gmra.mxu0 %v472_v29  ;;  %709 = vmatmul.f32.gmra.mxu2 %v474_v30 }
  0xa7   : > { %668 = vmatmul.f32.gmra.mxu1 %v473_v31  ;;  %750 = vmatmul.f32.gmra.mxu3 %v475_v32 }
  0xad   : > { %630 = vmatmul.f32.gmra.mxu0 %v476_v33  ;;  %712 = vmatmul.f32.gmra.mxu2 %v478_v34 }
  0xaf   : > { %671 = vmatmul.f32.gmra.mxu1 %v477_v35  ;;  %753 = vmatmul.f32.gmra.mxu3 %v479_v36 }
  0xb5   : > { %633 = vmatmul.f32.gmra.mxu0 %v480_v37  ;;  %715 = vmatmul.f32.gmra.mxu2 %v482_v38 }
  0xb7   : > { %674 = vmatmul.f32.gmra.mxu1 %v481_v39  ;;  %756 = vmatmul.f32.gmra.mxu3 %v483_v40 }
  0xdd   : > { %v579_v12 = vpop.permute.xlu2 %578 }
  0xe5   : > { %v584_v23 = vpop.permute.xlu2 %583 }
  0xf3   : > { %v559_v41 = vpop.permute.xlu0 %558  ;;  %v569_v56 = vpop.permute.xlu1 %568 }
  0xfa   : > { %v613_v42 = vpop.f32.mrf.mxu0 }
  0xfb   : > { %v614_v43 = vadd.f32 %v613_v42, %v559_v41  ;;  %v564_v47 = vpop.permute.xlu0 %563  ;;  %v574_v3 = vpop.permute.xlu1 %573 }
  0xfc   : > { %v654_v44 = vpop.f32.mrf.mxu1 }
  0xfd   : > { %v655_v45 = vadd.f32 %v654_v44, %v614_v43 }
 0x100   : > { %v695_v46 = vpop.f32.mrf.mxu2 }
 0x101   : > { %v696_v48 = vadd.f32 %v695_v46, %v655_v45 }
 0x102   : > { %v616_v49 = vpop.f32.mrf.mxu0  ;;  %v736_v50 = vpop.f32.mrf.mxu3 }
 0x103   : > { %v737_v51 = vadd.f32 %v736_v50, %v696_v48  ;;  %v617_v52 = vadd.f32 %v616_v49, %v564_v47  ;;  %v589_v33 = vpop.permute.xlu0 %588  ;;  %v594_v43 = vpop.permute.xlu1 %593 }
 0x104   : > { %v657_v53 = vpop.f32.mrf.mxu1 }
 0x105   : > { %v760_v54 = vmax.f32 %v737_v51, 0.0  ;;  %v658_v55 = vadd.f32 %v657_v53, %v617_v52 }
 0x107   : > { %768 = vst [vmem:[%s1353_s9] sm:$0xff] %v760_v54 }
 0x108   : > { %v698_v57 = vpop.f32.mrf.mxu2 }
 0x109   : > { %v699_v58 = vadd.f32 %v698_v57, %v658_v55 }
 0x10a   : > { %v619_v59 = vpop.f32.mrf.mxu0  ;;  %v739_v60 = vpop.f32.mrf.mxu3 }
 0x10b   : > { %v740_v61 = vadd.f32 %v739_v60, %v699_v58  ;;  %v620_v62 = vadd.f32 %v619_v59, %v569_v56 }
 0x10c   : > { %v660_v63 = vpop.f32.mrf.mxu1 }
 0x10d   : > { %v761_v0 = vmax.f32 %v740_v61, 0.0  ;;  %v661_v1 = vadd.f32 %v660_v63, %v620_v62 }
 0x10e   : > { %v827_v57 = vld [vmem:[%s1353_s9] sm:$0xff] (%p1018_p5) }
 0x10f   : > { %769 = vst [vmem:[%s1353_s9 + $0x8] sm:$0xff] %v761_v0 }
 0x110   : > { %v701_v2 = vpop.f32.mrf.mxu2  ;;  %828 = vst [vmem:[%s784_s11] sm:$0xff] (%p1018_p5), %v827_v57 }
 0x111   : > { %v702_v4 = vadd.f32 %v701_v2, %v661_v1 }
 0x112   : > { %v622_v5 = vpop.f32.mrf.mxu0  ;;  %v742_v6 = vpop.f32.mrf.mxu3 }
 0x113   : > { %v743_v7 = vadd.f32 %v742_v6, %v702_v4  ;;  %v623_v8 = vadd.f32 %v622_v5, %v574_v3 }
 0x114   : > { %v663_v9 = vpop.f32.mrf.mxu1 }
 0x115   : > { %v762_v10 = vmax.f32 %v743_v7, 0.0  ;;  %v664_v11 = vadd.f32 %v663_v9, %v623_v8 }
 0x116   : > { %v829_v58 = vld [vmem:[%s1353_s9 + $0x8] sm:$0xff] (%p1018_p5) }
 0x117   : > { %770 = vst [vmem:[%s1353_s9 + $0x10] sm:$0xff] %v762_v10 }
 0x118   : > { %v704_v13 = vpop.f32.mrf.mxu2  ;;  %830 = vst [vmem:[%s784_s11 + $0x10] sm:$0xff] (%p1018_p5), %v829_v58 }
 0x119   : > { %v705_v14 = vadd.f32 %v704_v13, %v664_v11 }
 0x11a   : > { %v625_v15 = vpop.f32.mrf.mxu0  ;;  %v745_v16 = vpop.f32.mrf.mxu3 }
 0x11b   : > { %v746_v17 = vadd.f32 %v745_v16, %v705_v14  ;;  %v626_v18 = vadd.f32 %v625_v15, %v579_v12 }
 0x11c   : > { %v666_v19 = vpop.f32.mrf.mxu1 }
 0x11d   : > { %v763_v20 = vmax.f32 %v746_v17, 0.0  ;;  %v667_v21 = vadd.f32 %v666_v19, %v626_v18 }
 0x11e   : > { %v831_v59 = vld [vmem:[%s1353_s9 + $0x10] sm:$0xff] (%p1018_p5) }
 0x11f   : > { %771 = vst [vmem:[%s1353_s9 + $0x18] sm:$0xff] %v763_v20 }
 0x120   : > { %v707_v22 = vpop.f32.mrf.mxu2  ;;  %832 = vst [vmem:[%s784_s11 + $0x20] sm:$0xff] (%p1018_p5), %v831_v59 }
 0x121   : > { %v708_v24 = vadd.f32 %v707_v22, %v667_v21 }
 0x122   : > { %v628_v25 = vpop.f32.mrf.mxu0  ;;  %v748_v26 = vpop.f32.mrf.mxu3 }
 0x123   : > { %v749_v27 = vadd.f32 %v748_v26, %v708_v24  ;;  %v629_v28 = vadd.f32 %v628_v25, %v584_v23 }
 0x124   : > { %v669_v29 = vpop.f32.mrf.mxu1 }
 0x125   : > { %v764_v30 = vmax.f32 %v749_v27, 0.0  ;;  %v670_v31 = vadd.f32 %v669_v29, %v629_v28 }
 0x126   : > { %v833_v60 = vld [vmem:[%s1353_s9 + $0x18] sm:$0xff] (%p1018_p5) }
 0x127   : > { %772 = vst [vmem:[%s1353_s9 + $0x20] sm:$0xff] %v764_v30 }
 0x128   : > { %v710_v32 = vpop.f32.mrf.mxu2  ;;  %834 = vst [vmem:[%s784_s11 + $0x30] sm:$0xff] (%p1018_p5), %v833_v60 }
 0x129   : > { %v711_v34 = vadd.f32 %v710_v32, %v670_v31 }
 0x12a   : > { %v631_v35 = vpop.f32.mrf.mxu0  ;;  %v751_v36 = vpop.f32.mrf.mxu3 }
 0x12b   : > { %v632_v37 = vadd.f32 %v631_v35, %v589_v33  ;;  %v752_v38 = vadd.f32 %v751_v36, %v711_v34 }
 0x12c   : > { %v672_v39 = vpop.f32.mrf.mxu1 }
 0x12d   : > { %v765_v40 = vmax.f32 %v752_v38, 0.0  ;;  %v673_v41 = vadd.f32 %v672_v39, %v632_v37 }
 0x12e   : > { %v835_v61 = vld [vmem:[%s1353_s9 + $0x20] sm:$0xff] (%p1018_p5) }
 0x12f   : > { %773 = vst [vmem:[%s1353_s9 + $0x28] sm:$0xff] %v765_v40 }
 0x130   : > { %v713_v42 = vpop.f32.mrf.mxu2  ;;  %836 = vst [vmem:[%s784_s11 + $0x40] sm:$0xff] (%p1018_p5), %v835_v61 }
 0x131   : > { %v714_v44 = vadd.f32 %v713_v42, %v673_v41 }
 0x132   : > { %v634_v45 = vpop.f32.mrf.mxu0  ;;  %v754_v46 = vpop.f32.mrf.mxu3 }
 0x133   : > { %v635_v47 = vadd.f32 %v634_v45, %v594_v43  ;;  %v755_v48 = vadd.f32 %v754_v46, %v714_v44 }
 0x134   : > { %v675_v49 = vpop.f32.mrf.mxu1 }
 0x135   : > { %v766_v50 = vmax.f32 %v755_v48, 0.0  ;;  %v676_v51 = vadd.f32 %v675_v49, %v635_v47 }
 0x136   : > { %v837_v62 = vld [vmem:[%s1353_s9 + $0x28] sm:$0xff] (%p1018_p5) }
 0x137   : > { %774 = vst [vmem:[%s1353_s9 + $0x30] sm:$0xff] %v766_v50 }
 0x138   : > { %v716_v52 = vpop.f32.mrf.mxu2  ;;  %838 = vst [vmem:[%s784_s11 + $0x50] sm:$0xff] (%p1018_p5), %v837_v62 }
 0x139   : > { %v717_v53 = vadd.f32 %v716_v52, %v676_v51 }
 0x13a   : > { %v757_v54 = vpop.f32.mrf.mxu3 }
 0x13b   : > { %v758_v55 = vadd.f32 %v757_v54, %v717_v53  ;;  %782 = sbr.rel (!%p1018_p5) target bundleno = 328 (0x148), region = 74 }
 0x13d   : > { %v767_v56 = vmax.f32 %v758_v55, 0.0 }
 0x13e   : > { %v839_v63 = vld [vmem:[%s1353_s9 + $0x30] sm:$0xff] (%p1018_p5) }
 0x13f   : > { %775 = vst [vmem:[%s1353_s9 + $0x38] sm:$0xff] %v767_v56 }
 0x140   : > { %840 = vst [vmem:[%s784_s11 + $0x60] sm:$0xff] %v839_v63 }
 0x146   : > { %v841_v0 = vld [vmem:[%s1353_s9 + $0x38] sm:$0xff] }
 0x147   : > { %842 = vst [vmem:[%s784_s11 + $0x70] sm:$0xff] %v841_v0 }
 0x148 PF: > { %p10_p10 = scmp.ge.s32.totalorder %s1005_s16, 4   ;;  %s1393_s12 = smov %s961_s13 }
 0x149   : > { %s1394_s13 = smov %s1016_s19  ;;  %s1395_s14 = smov %s1005_s16 }
 0x14a   :  { %12 = sbr.rel (!%p10_p10) target bundleno = 2 (0x2), region = 143 }

// kernel: cnn_forward.6
= control target key start
LH: loop header
LB: loop body
LE: loop exit
PB: predicated region body
PF: predicated region fallthrough
CT: control target
= control target key end

     0   :  { %v468_v19 = vmov 0   ;;  %vm174_vm0 = vcmask 523264   ;;  %s893_s1 = inlined_call_operand.vmem [shape: f32[576,128], index: 1, kind: input, shape index: {}]   ;;  %s894_s2 = inlined_call_operand.vmem [shape: f32[64,1], index: 2, kind: input, shape index: {}]   ;;  %s895_s0 = inlined_call_operand.vmem [shape: f32[64,576], index: 0, kind: input, shape index: {}]   ;;  %s896_s3 = inlined_call_operand.vmem [shape: f32[64,128], index: 3, kind: output, shape index: {}]  }
   0x1   :  { %v69_v0 = vld [vmem:[%s893_s1 + $0x78] sm:$0xff]  ;;  %v68_v1 = vld [vmem:[%s893_s1 + $0x70] sm:$0xff]  ;;  %v67_v2 = vld [vmem:[%s893_s1 + $0x68] sm:$0xff]  ;;  %466 = vset.pattern.permute.xlu1 %v468_v19  ;;  %465 = vset.pattern.permute.xlu0 %v468_v19 }
   0x2   :  { %432 = vmatpush.msra.mxu1 %v69_v0  ;;  %433 = vmatpush.msra.mxu2 %v69_v0  ;;  %v66_v3 = vld [vmem:[%s893_s1 + $0x60] sm:$0xff]  ;;  %v65_v4 = vld [vmem:[%s893_s1 + $0x58] sm:$0xff]  ;;  %v116_v6 = vld [vmem:[%s893_s1 + $0x1f0] sm:$0xff] }
   0x3   :  { %199 = vmatpush.msra.mxu0 %v69_v0  ;;  %v117_v5 = vld [vmem:[%s893_s1 + $0x1f8] sm:$0xff]  ;;  %v64_v7 = vld [vmem:[%s893_s1 + $0x50] sm:$0xff]  ;;  %v115_v8 = vld [vmem:[%s893_s1 + $0x1e8] sm:$0xff]  ;;  %467 = vset.pattern.permute.xlu2 %v468_v19 }
   0x4   :  { %434 = vmatpush.msra.mxu1 %v68_v1  ;;  %435 = vmatpush.msra.mxu2 %v68_v1  ;;  %v63_v9 = vld [vmem:[%s893_s1 + $0x48] sm:$0xff]  ;;  %v114_v10 = vld [vmem:[%s893_s1 + $0x1e0] sm:$0xff]  ;;  %v113_v12 = vld [vmem:[%s893_s1 + $0x1d8] sm:$0xff] }
   0x5   :  { %200 = vmatpush.msra.mxu0 %v68_v1  ;;  %322 = vmatpush.msra.mxu3 %v117_v5  ;;  %v62_v11 = vld [vmem:[%s893_s1 + $0x40] sm:$0xff]  ;;  %v61_v13 = vld [vmem:[%s893_s1 + $0x38] sm:$0xff]  ;;  %v112_v14 = vld [vmem:[%s893_s1 + $0x1d0] sm:$0xff] }
   0x6   :  { %436 = vmatpush.msra.mxu1 %v67_v2  ;;  %437 = vmatpush.msra.mxu2 %v67_v2  ;;  %v60_v15 = vld [vmem:[%s893_s1 + $0x30] sm:$0xff]  ;;  %v59_v16 = vld [vmem:[%s893_s1 + $0x28] sm:$0xff]  ;;  %v58_v18 = vld [vmem:[%s893_s1 + $0x20] sm:$0xff] }
   0x7   :  { %201 = vmatpush.msra.mxu0 %v67_v2  ;;  %323 = vmatpush.msra.mxu3 %v116_v6  ;;  %v128_v17 = vld [vmem:[%s894_s2 + $0x10] sm:$0xff]  ;;  %v111_v20 = vld [vmem:[%s893_s1 + $0x1c8] sm:$0xff]  ;;  %v57_v21 = vld [vmem:[%s893_s1 + $0x18] sm:$0xff] }
   0x8   :  { %438 = vmatpush.msra.mxu1 %v66_v3  ;;  %439 = vmatpush.msra.mxu2 %v66_v3  ;;  %v126_v22 = vld [vmem:[%s894_s2] sm:$0xff]  ;;  %v56_v23 = vld [vmem:[%s893_s1 + $0x10] sm:$0xff]  ;;  %v55_v25 = vld [vmem:[%s893_s1 + $0x8] sm:$0xff] }
   0x9   :  { %202 = vmatpush.msra.mxu0 %v66_v3  ;;  %324 = vmatpush.msra.mxu3 %v115_v8  ;;  %v110_v24 = vld [vmem:[%s893_s1 + $0x1c0] sm:$0xff]  ;;  %v109_v26 = vld [vmem:[%s893_s1 + $0x1b8] sm:$0xff]  ;;  %v24_v28 = vld [vmem:[%s895_s0 + $0x50] sm:$0xff] }
   0xa   :  { %440 = vmatpush.msra.mxu1 %v65_v4  ;;  %441 = vmatpush.msra.mxu2 %v65_v4  ;;  %v54_v27 = vld [vmem:[%s893_s1] sm:$0xff]  ;;  %v101_v29 = vld [vmem:[%s893_s1 + $0x178] sm:$0xff]  ;;  %v44_v31 = vld [vmem:[%s895_s0 + $0xf0] sm:$0xff] }
   0xb   :  { %203 = vmatpush.msra.mxu0 %v65_v4  ;;  %325 = vmatpush.msra.mxu3 %v114_v10  ;;  %v85_v30 = vld [vmem:[%s893_s1 + $0xf8] sm:$0xff]  ;;  %v100_v32 = vld [vmem:[%s893_s1 + $0x170] sm:$0xff]  ;;  %v99_v36 = vld [vmem:[%s893_s1 + $0x168] sm:$0xff] }
   0xc   :  { %442 = vmatpush.msra.mxu1 %v64_v7  ;;  %443 = vmatpush.msra.mxu2 %v64_v7  ;;  %v108_v33 = vld [vmem:[%s893_s1 + $0x1b0] sm:$0xff]  ;;  %v129_v35 = vld [vmem:[%s894_s2 + $0x18] sm:$0xff]  ;;  %v83_v37 = vld [vmem:[%s893_s1 + $0xe8] sm:$0xff] }
   0xd   :  { %204 = vmatpush.msra.mxu0 %v64_v7  ;;  %326 = vmatpush.msra.mxu3 %v113_v12  ;;  %v84_v34 = vld [vmem:[%s893_s1 + $0xf0] sm:$0xff]  ;;  %v107_v38 = vld [vmem:[%s893_s1 + $0x1a8] sm:$0xff]  ;;  %v98_v39 = vld [vmem:[%s893_s1 + $0x160] sm:$0xff] }
   0xe   :  { %444 = vmatpush.msra.mxu1 %v63_v9  ;;  %445 = vmatpush.msra.mxu2 %v63_v9  ;;  %v127_v40 = vld [vmem:[%s894_s2 + $0x8] sm:$0xff]  ;;  %v82_v41 = vld [vmem:[%s893_s1 + $0xe0] sm:$0xff]  ;;  %v29_v42 = vld [vmem:[%s895_s0 + $0x78] sm:$0xff] }
   0xf   :  { %205 = vmatpush.msra.mxu0 %v63_v9  ;;  %327 = vmatpush.msra.mxu3 %v112_v14  ;;  %v97_v43 = vld [vmem:[%s893_s1 + $0x158] sm:$0xff]  ;;  %v96_v46 = vld [vmem:[%s893_s1 + $0x150] sm:$0xff]  ;;  %v106_v47 = vld [vmem:[%s893_s1 + $0x1a0] sm:$0xff] }
  0x10   :  { %446 = vmatpush.msra.mxu1 %v62_v11  ;;  %447 = vmatpush.msra.mxu2 %v62_v11  ;;  %v81_v44 = vld [vmem:[%s893_s1 + $0xd8] sm:$0xff]  ;;  %v80_v48 = vld [vmem:[%s893_s1 + $0xd0] sm:$0xff]  ;;  %v14_v49 = vld [vmem:[%s895_s0] sm:$0xff] }
  0x11   :  { %206 = vmatpush.msra.mxu0 %v62_v11  ;;  %146 = vperm.xlu1 %466, %v128_v17   ;;  %v49_v45 = vld [vmem:[%s895_s0 + $0x118] sm:$0xff]  ;;  %v95_v50 = vld [vmem:[%s893_s1 + $0x148] sm:$0xff]  ;;  %v94_v54 = vld [vmem:[%s893_s1 + $0x140] sm:$0xff] }
  0x12   :  { %448 = vmatpush.msra.mxu1 %v61_v13  ;;  %449 = vmatpush.msra.mxu2 %v61_v13  ;;  %v125_v51 = vld [vmem:[%s893_s1 + $0x238] sm:$0xff]  ;;  %v79_v52 = vld [vmem:[%s893_s1 + $0xc8] sm:$0xff]  ;;  %v124_v55 = vld [vmem:[%s893_s1 + $0x230] sm:$0xff] }
  0x13   :  { %207 = vmatpush.msra.mxu0 %v61_v13  ;;  %328 = vmatpush.msra.mxu3 %v111_v20  ;;  %v105_v53 = vld [vmem:[%s893_s1 + $0x198] sm:$0xff]  ;;  %v78_v56 = vld [vmem:[%s893_s1 + $0xc0] sm:$0xff]  ;;  %v104_v57 = vld [vmem:[%s893_s1 + $0x190] sm:$0xff] }
  0x14   :  { %450 = vmatpush.msra.mxu1 %v60_v15  ;;  %451 = vmatpush.msra.mxu2 %v60_v15  ;;  %v34_v58 = vld [vmem:[%s895_s0 + $0xa0] sm:$0xff]  ;;  %v93_v59 = vld [vmem:[%s893_s1 + $0x138] sm:$0xff]  ;;  %v123_v61 = vld [vmem:[%s893_s1 + $0x228] sm:$0xff] }
  0x15   :  { %208 = vmatpush.msra.mxu0 %v60_v15  ;;  %136 = vperm.xlu0 %465, %v126_v22   ;;  %v77_v60 = vld [vmem:[%s893_s1 + $0xb8] sm:$0xff]  ;;  %v92_v62 = vld [vmem:[%s893_s1 + $0x130] sm:$0xff]  ;;  %v103_v63 = vld [vmem:[%s893_s1 + $0x188] sm:$0xff] }
  0x16   :  { %452 = vmatpush.msra.mxu1 %v59_v16  ;;  %453 = vmatpush.msra.mxu2 %v59_v16  ;;  %v76_v0 = vld [vmem:[%s893_s1 + $0xb0] sm:$0xff]  ;;  %v122_v1 = vld [vmem:[%s893_s1 + $0x220] sm:$0xff]  ;;  %v91_v2 = vld [vmem:[%s893_s1 + $0x128] sm:$0xff] }
  0x17   :  { %209 = vmatpush.msra.mxu0 %v59_v16  ;;  %329 = vmatpush.msra.mxu3 %v110_v24  ;;  %v132_v3 = vld [vmem:[%s894_s2 + $0x30] sm:$0xff]  ;;  %v75_v4 = vld [vmem:[%s893_s1 + $0xa8] sm:$0xff]  ;;  %v102_v5 = vld [vmem:[%s893_s1 + $0x180] sm:$0xff] }
  0x18   :  { %454 = vmatpush.msra.mxu1 %v58_v18  ;;  %455 = vmatpush.msra.mxu2 %v58_v18  ;;  %v90_v6 = vld [vmem:[%s893_s1 + $0x120] sm:$0xff]  ;;  %v19_v7 = vld [vmem:[%s895_s0 + $0x28] sm:$0xff]  ;;  %v17_v9 = vld [vmem:[%s895_s0 + $0x18] sm:$0xff] }
  0x19   :  { %210 = vmatpush.msra.mxu0 %v58_v18  ;;  %330 = vmatpush.msra.mxu3 %v109_v26  ;;  %v74_v8 = vld [vmem:[%s893_s1 + $0xa0] sm:$0xff]  ;;  %v39_v10 = vld [vmem:[%s895_s0 + $0xc8] sm:$0xff]  ;;  %v89_v11 = vld [vmem:[%s893_s1 + $0x118] sm:$0xff] }
  0x1a   :  { %456 = vmatpush.msra.mxu1 %v57_v21  ;;  %457 = vmatpush.msra.mxu2 %v57_v21  ;;  %v73_v12 = vld [vmem:[%s893_s1 + $0x98] sm:$0xff]  ;;  %v88_v14 = vld [vmem:[%s893_s1 + $0x110] sm:$0xff]  ;;  %v87_v18 = vld [vmem:[%s893_s1 + $0x108] sm:$0xff] }
  0x1b   :  { %211 = vmatpush.msra.mxu0 %v57_v21  ;;  %331 = vmatpush.msra.mxu3 %v108_v33  ;;  %v121_v13 = vld [vmem:[%s893_s1 + $0x218] sm:$0xff]  ;;  %v72_v16 = vld [vmem:[%s893_s1 + $0x90] sm:$0xff]  ;;  %v71_v20 = vld [vmem:[%s893_s1 + $0x88] sm:$0xff] }
  0x1c   :  { %458 = vmatpush.msra.mxu1 %v56_v23  ;;  %459 = vmatpush.msra.mxu2 %v56_v23  ;;  %v133_v15 = vld [vmem:[%s894_s2 + $0x38] sm:$0xff]  ;;  %v120_v17 = vld [vmem:[%s893_s1 + $0x210] sm:$0xff]  ;;  %v119_v21 = vld [vmem:[%s893_s1 + $0x208] sm:$0xff] }
  0x1d   :  { %212 = vmatpush.msra.mxu0 %v56_v23  ;;  %151 = vperm.xlu1 %466, %v129_v35   ;;  %v86_v22 = vld [vmem:[%s893_s1 + $0x100] sm:$0xff]  ;;  %v15_v26 = vld [vmem:[%s895_s0 + $0x8] sm:$0xff]  ;;  %v25_v35 = vld [vmem:[%s895_s0 + $0x58] sm:$0xff] }
  0x1e   :  { %460 = vmatpush.msra.mxu1 %v55_v25  ;;  %461 = vmatpush.msra.mxu2 %v55_v25  ;;  %v130_v23 = vld [vmem:[%s894_s2 + $0x20] sm:$0xff]  ;;  %v131_v19 = vld [vmem:[%s894_s2 + $0x28] sm:$0xff] }
  0x1f   :  { %213 = vmatpush.msra.mxu0 %v55_v25  ;;  %332 = vmatpush.msra.mxu3 %v107_v38  ;;  %v70_v24 = vld [vmem:[%s893_s1 + $0x80] sm:$0xff]  ;;  %v16_v25 = vld [vmem:[%s895_s0 + $0x10] sm:$0xff]  ;;  %v23_v33 = vld [vmem:[%s895_s0 + $0x48] sm:$0xff] }
  0x20   :  { %462 = vmatpush.msra.mxu1 %v54_v27  ;;  %463 = vmatpush.msra.mxu2 %v54_v27  ;;  %v31_v38 = vld [vmem:[%s895_s0 + $0x88] sm:$0xff] }
  0x21   :  { %221 = vmatmul.f32.vlgmr.msra.gmra.mxu1 %v24_v28  ;;  %233 = vmatmul.f32.vlgmr.msra.gmra.mxu2 %v44_v31  ;;  %v22_v28 = vld [vmem:[%s895_s0 + $0x40] sm:$0xff]  ;;  %v20_v31 = vld [vmem:[%s895_s0 + $0x30] sm:$0xff] }
  0x22   :  { %281 = vmatpush.msrb.mxu2 %v101_v29  ;;  %240 = vmatpush.msrb.mxu1 %v85_v30  ;;  %v18_v29 = vld [vmem:[%s895_s0 + $0x20] sm:$0xff]  ;;  %v21_v30 = vld [vmem:[%s895_s0 + $0x38] sm:$0xff] }
  0x23   :  { %141 = vperm.xlu0 %465, %v127_v40   ;;  %214 = vmatpush.msra.mxu0 %v54_v27  ;;  %v118_v27 = vld [vmem:[%s893_s1 + $0x200] sm:$0xff]  ;;  %v37_v40 = vld [vmem:[%s895_s0 + $0xb8] sm:$0xff] }
  0x24   :  { %282 = vmatpush.msrb.mxu2 %v100_v32  ;;  %241 = vmatpush.msrb.mxu1 %v84_v34  ;;  %v27_v32 = vld [vmem:[%s895_s0 + $0x68] sm:$0xff]  ;;  %v26_v34 = vld [vmem:[%s895_s0 + $0x60] sm:$0xff] }
  0x25   :  { %333 = vmatpush.msra.mxu3 %v106_v47  ;;  %215 = vmatmul.f32.vlgmr.msra.gmra.mxu0 %v14_v49  ;;  %v40_v47 = vld [vmem:[%s895_s0 + $0xd0] sm:$0xff]  ;;  %v43_v49 = vld [vmem:[%s895_s0 + $0xe8] sm:$0xff] }
  0x26   :  { %283 = vmatpush.msrb.mxu2 %v99_v36  ;;  %242 = vmatpush.msrb.mxu1 %v83_v37  ;;  %v32_v36 = vld [vmem:[%s895_s0 + $0x90] sm:$0xff] }
  0x27   :  { %371 = vmatpush.msrb.mxu0 %v125_v51  ;;  %334 = vmatpush.msra.mxu3 %v105_v53  ;;  %v28_v37 = vld [vmem:[%s895_s0 + $0x70] sm:$0xff]  ;;  %v45_v51 = vld [vmem:[%s895_s0 + $0xf8] sm:$0xff] }
  0x28   :  { %284 = vmatpush.msrb.mxu2 %v98_v39  ;;  %243 = vmatpush.msrb.mxu1 %v82_v41  ;;  %v30_v39 = vld [vmem:[%s895_s0 + $0x80] sm:$0xff]  ;;  %v33_v41 = vld [vmem:[%s895_s0 + $0x98] sm:$0xff]  ;;  %v48_v53 = vld [vmem:[%s895_s0 + $0x110] sm:$0xff] }
  0x29   :  { %224 = vmatmul.f32.gmra.mxu1 %v29_v42  ;;  %236 = vmatmul.f32.gmra.mxu2 %v49_v45  ;;  %v36_v42 = vld [vmem:[%s895_s0 + $0xb0] sm:$0xff]  ;;  %v38_v45 = vld [vmem:[%s895_s0 + $0xc0] sm:$0xff] }
  0x2a   :  { %285 = vmatpush.msrb.mxu2 %v97_v43  ;;  %244 = vmatpush.msrb.mxu1 %v81_v44  ;;  %v35_v43 = vld [vmem:[%s895_s0 + $0xa8] sm:$0xff]  ;;  %v42_v44 = vld [vmem:[%s895_s0 + $0xe0] sm:$0xff] }
  0x2b   :  { %372 = vmatpush.msrb.mxu0 %v124_v55  ;;  %335 = vmatpush.msra.mxu3 %v104_v57  ;;  %v50_v55 = vld [vmem:[%s895_s0 + $0x120] sm:$0xff] }
  0x2c   :  { %286 = vmatpush.msrb.mxu2 %v96_v46  ;;  %245 = vmatpush.msrb.mxu1 %v80_v48  ;;  %v41_v46 = vld [vmem:[%s895_s0 + $0xd8] sm:$0xff]  ;;  %v47_v48 = vld [vmem:[%s895_s0 + $0x108] sm:$0xff] }
  0x2d   :  { %373 = vmatpush.msrb.mxu0 %v123_v61  ;;  %336 = vmatpush.msra.mxu3 %v103_v63 }
  0x2e   :  { %287 = vmatpush.msrb.mxu2 %v95_v50  ;;  %246 = vmatpush.msrb.mxu1 %v79_v52  ;;  %v46_v50 = vld [vmem:[%s895_s0 + $0x100] sm:$0xff]  ;;  %v52_v52 = vld [vmem:[%s895_s0 + $0x130] sm:$0xff] }
  0x2f   :  { %374 = vmatpush.msrb.mxu0 %v122_v1  ;;  %166 = vperm.xlu0 %465, %v132_v3  }
  0x30   :  { %288 = vmatpush.msrb.mxu2 %v94_v54  ;;  %247 = vmatpush.msrb.mxu1 %v78_v56  ;;  %v51_v54 = vld [vmem:[%s895_s0 + $0x128] sm:$0xff]  ;;  %v53_v56 = vld [vmem:[%s895_s0 + $0x138] sm:$0xff] }
  0x31   :  { %227 = vmatmul.f32.gmra.mxu1 %v34_v58  ;;  %337 = vmatpush.msra.mxu3 %v102_v5 }
  0x32   :  { %289 = vmatpush.msrb.mxu2 %v93_v59  ;;  %248 = vmatpush.msrb.mxu1 %v77_v60 }
  0x33   :  { %218 = vmatmul.f32.gmra.mxu0 %v19_v7  ;;  %338 = vmatmul.f32.vlgmr.msra.gmra.mxu3 %v17_v9 }
  0x34   :  { %290 = vmatpush.msrb.mxu2 %v92_v62  ;;  %249 = vmatpush.msrb.mxu1 %v76_v0 }
  0x35   :  { %375 = vmatpush.msrb.mxu0 %v121_v13  ;;  %171 = vperm.xlu1 %466, %v133_v15  }
  0x36   :  { %291 = vmatpush.msrb.mxu2 %v91_v2  ;;  %250 = vmatpush.msrb.mxu1 %v75_v4 }
  0x37   :  { %376 = vmatpush.msrb.mxu0 %v120_v17  ;;  %156 = vperm.xlu2 %467, %v130_v23  }
  0x38   :  { %292 = vmatpush.msrb.mxu2 %v90_v6  ;;  %251 = vmatpush.msrb.mxu1 %v74_v8 }
  0x39   :  { %230 = vmatmul.f32.gmra.mxu1 %v39_v10  ;;  %377 = vmatpush.msrb.mxu0 %v119_v21 }
  0x3a   :  { %293 = vmatpush.msrb.mxu2 %v89_v11  ;;  %252 = vmatpush.msrb.mxu1 %v73_v12 }
  0x3b   :  { %378 = vmatpush.msrb.mxu0 %v118_v27  ;;  %341 = vmatmul.f32.gmra.mxu3 %v22_v28 }
  0x3c   :  { %294 = vmatpush.msrb.mxu2 %v88_v14  ;;  %253 = vmatpush.msrb.mxu1 %v72_v16 }
  0x3d   :  { %424 = vmatmul.msk.f32.vlgmr.msrb.gmra.mxu0 %vm174_vm0, %v18_v29 }
  0x3e   :  { %295 = vmatpush.msrb.mxu2 %v87_v18  ;;  %254 = vmatpush.msrb.mxu1 %v71_v20 }
  0x3f   :  { %161 = vperm.xlu2 %467, %v131_v19  }
  0x40   :  { %296 = vmatpush.msrb.mxu2 %v86_v22  ;;  %255 = vmatpush.msrb.mxu1 %v70_v24 }
  0x41   :  { %297 = vmatmul.f32.vlgmr.msrb.gmra.mxu2 %v16_v25  ;;  %256 = vmatmul.f32.vlgmr.msrb.gmra.mxu1 %v15_v26 }
  0x43   :  { %344 = vmatmul.f32.gmra.mxu3 %v27_v32 }
  0x45   :  { %425 = vmatmul.msk.f32.gmra.mxu0 %vm174_vm0, %v23_v33 }
  0x49   :  { %300 = vmatmul.f32.gmra.mxu2 %v21_v30  ;;  %259 = vmatmul.f32.gmra.mxu1 %v20_v31 }
  0x4b   :  { %347 = vmatmul.f32.gmra.mxu3 %v32_v36 }
  0x4d   :  { %426 = vmatmul.msk.f32.gmra.mxu0 %vm174_vm0, %v28_v37 }
  0x51   :  { %303 = vmatmul.f32.gmra.mxu2 %v26_v34  ;;  %262 = vmatmul.f32.gmra.mxu1 %v25_v35 }
  0x53   :  { %350 = vmatmul.f32.gmra.mxu3 %v37_v40 }
  0x55   :  { %427 = vmatmul.msk.f32.gmra.mxu0 %vm174_vm0, %v33_v41 }
  0x59   :  { %306 = vmatmul.f32.gmra.mxu2 %v31_v38  ;;  %265 = vmatmul.f32.gmra.mxu1 %v30_v39 }
  0x5b   :  { %353 = vmatmul.f32.gmra.mxu3 %v42_v44 }
  0x5d   :  { %428 = vmatmul.msk.f32.gmra.mxu0 %vm174_vm0, %v38_v45 }
  0x61   :  { %309 = vmatmul.f32.gmra.mxu2 %v36_v42  ;;  %268 = vmatmul.f32.gmra.mxu1 %v35_v43 }
  0x63   :  { %356 = vmatmul.f32.gmra.mxu3 %v47_v48 }
  0x65   :  { %429 = vmatmul.msk.f32.gmra.mxu0 %vm174_vm0, %v43_v49 }
  0x69   :  { %312 = vmatmul.f32.gmra.mxu2 %v41_v46  ;;  %271 = vmatmul.f32.gmra.mxu1 %v40_v47 }
  0x6b   :  { %359 = vmatmul.f32.gmra.mxu3 %v52_v52 }
  0x6d   :  { %430 = vmatmul.msk.f32.gmra.mxu0 %vm174_vm0, %v48_v53 }
  0x71   :  { %315 = vmatmul.f32.gmra.mxu2 %v46_v50  ;;  %274 = vmatmul.f32.gmra.mxu1 %v45_v51 }
  0x75   :  { %431 = vmatmul.msk.f32.gmra.mxu0 %vm174_vm0, %v53_v56 }
  0x79   :  { %318 = vmatmul.f32.gmra.mxu2 %v51_v54  ;;  %277 = vmatmul.f32.gmra.mxu1 %v50_v55 }
  0x83   :  { %v147_v18 = vpop.permute.xlu1 %146 }
  0x87   :  { %v137_v2 = vpop.permute.xlu0 %136 }
  0x8f   :  { %v152_v31 = vpop.permute.xlu1 %151 }
  0x91   :  { %v157_v40 = vpop.permute.xlu2 %156 }
  0x95   :  { %v142_v12 = vpop.permute.xlu0 %141 }
  0x99   :  { %v162_v53 = vpop.permute.xlu2 %161 }
  0x9e   :  { %v222_v57 = vpop.f32.mrf.mxu1 }
  0x9f   :  { %v223_v26 = vadd.f32 %v222_v57, %v147_v18 }
  0xa2   :  { %v216_v59 = vpop.f32.mrf.mxu0 }
  0xa3   :  { %v217_v5 = vadd.f32 %v216_v59, %v137_v2 }
  0xa4   :  { %v860_v61 = vpop.f32.mrf.mxu2 }
  0xa6   :  { %v225_v58 = vpop.f32.mrf.mxu1 }
  0xa7   :  { %v226_v36 = vadd.f32 %v225_v58, %v152_v31 }
  0xac   :  { %v864_v0 = vpop.f32.mrf.mxu2 }
  0xae   :  { %v228_v60 = vpop.f32.mrf.mxu1 }
  0xaf   :  { %v229_v47 = vadd.f32 %v228_v60, %v157_v40 }
  0xb0   :  { %v219_v62 = vpop.f32.mrf.mxu0 }
  0xb1   :  { %v220_v14 = vadd.f32 %v219_v62, %v142_v12 }
  0xb6   :  { %v862_v63 = vpop.f32.mrf.mxu1  ;;  %v339_v1 = vpop.f32.mrf.mxu3 }
  0xb7   :  { %v232_v57 = vadd.f32 %v862_v63, %v162_v53 }
  0xba   :  { %v380_v4 = vpop.f32.mrf.mxu0 }
  0xbe   :  { %v257_v3 = vpop.f32.mrf.mxu1  ;;  %v342_v9 = vpop.f32.mrf.mxu3 }
  0xbf   :  { %v258_v6 = vadd.f32 %v257_v3, %v217_v5  ;;  %v167_v3 = vpop.permute.xlu0 %166 }
  0xc2   :  { %v383_v13 = vpop.f32.mrf.mxu0 }
  0xc4   :  { %v298_v7 = vpop.f32.mrf.mxu2 }
  0xc5   :  { %v299_v8 = vadd.f32 %v298_v7, %v258_v6  ;;  %v235_v6 = vadd.f32 %v860_v61, %v167_v3 }
  0xc6   :  { %v260_v11 = vpop.f32.mrf.mxu1  ;;  %v345_v22 = vpop.f32.mrf.mxu3 }
  0xc7   :  { %v340_v10 = vadd.f32 %v339_v1, %v299_v8  ;;  %v261_v16 = vadd.f32 %v260_v11, %v220_v14 }
  0xc9   :  { %v381_v15 = vadd.f32 %v380_v4, %v340_v10 }
  0xca   :  { %v386_v25 = vpop.f32.mrf.mxu0 }
  0xcb   :  { %v404_v17 = vmax.f32 %v381_v15, 0.0 }
  0xcc   :  { %v301_v20 = vpop.f32.mrf.mxu2 }
  0xcd   :  { %412 = vst [vmem:[%s896_s3] sm:$0xff] %v404_v17  ;;  %v302_v21 = vadd.f32 %v301_v20, %v261_v16 }
  0xce   :  { %v263_v24 = vpop.f32.mrf.mxu1  ;;  %v348_v32 = vpop.f32.mrf.mxu3 }
  0xcf   :  { %v343_v23 = vadd.f32 %v342_v9, %v302_v21  ;;  %v264_v28 = vadd.f32 %v263_v24, %v223_v26 }
  0xd1   :  { %v384_v27 = vadd.f32 %v383_v13, %v343_v23  ;;  %v172_v13 = vpop.permute.xlu1 %171 }
  0xd2   :  { %v389_v35 = vpop.f32.mrf.mxu0  ;;  %v238_v16 = vadd.f32 %v864_v0, %v172_v13 }
  0xd3   :  { %v405_v29 = vmax.f32 %v384_v27, 0.0 }
  0xd4   :  { %v304_v19 = vpop.f32.mrf.mxu2 }
  0xd5   :  { %413 = vst [vmem:[%s896_s3 + $0x8] sm:$0xff] %v405_v29  ;;  %v305_v30 = vadd.f32 %v304_v19, %v264_v28 }
  0xd6   :  { %v266_v34 = vpop.f32.mrf.mxu1  ;;  %v351_v43 = vpop.f32.mrf.mxu3 }
  0xd7   :  { %v346_v33 = vadd.f32 %v345_v22, %v305_v30  ;;  %v267_v38 = vadd.f32 %v266_v34, %v226_v36 }
  0xd9   :  { %v387_v37 = vadd.f32 %v386_v25, %v346_v33 }
  0xda   :  { %v392_v46 = vpop.f32.mrf.mxu0 }
  0xdb   :  { %v406_v39 = vmax.f32 %v387_v37, 0.0 }
  0xdc   :  { %v307_v41 = vpop.f32.mrf.mxu2 }
  0xdd   :  { %414 = vst [vmem:[%s896_s3 + $0x10] sm:$0xff] %v406_v39  ;;  %v308_v42 = vadd.f32 %v307_v41, %v267_v38 }
  0xde   :  { %v269_v45 = vpop.f32.mrf.mxu1  ;;  %v354_v56 = vpop.f32.mrf.mxu3 }
  0xdf   :  { %v349_v44 = vadd.f32 %v348_v32, %v308_v42  ;;  %v270_v49 = vadd.f32 %v269_v45, %v229_v47 }
  0xe1   :  { %v390_v48 = vadd.f32 %v389_v35, %v349_v44 }
  0xe2   :  { %v395_v59 = vpop.f32.mrf.mxu0 }
  0xe3   :  { %v407_v50 = vmax.f32 %v390_v48, 0.0 }
  0xe4   :  { %v310_v51 = vpop.f32.mrf.mxu2 }
  0xe5   :  { %415 = vst [vmem:[%s896_s3 + $0x18] sm:$0xff] %v407_v50  ;;  %v311_v52 = vadd.f32 %v310_v51, %v270_v49 }
  0xe6   :  { %v272_v55 = vpop.f32.mrf.mxu1  ;;  %v357_v8 = vpop.f32.mrf.mxu3 }
  0xe7   :  { %v352_v54 = vadd.f32 %v351_v43, %v311_v52  ;;  %v273_v62 = vadd.f32 %v272_v55, %v232_v57 }
  0xe9   :  { %v393_v58 = vadd.f32 %v392_v46, %v352_v54 }
  0xea   :  { %v398_v11 = vpop.f32.mrf.mxu0 }
  0xeb   :  { %v408_v1 = vmax.f32 %v393_v58, 0.0 }
  0xec   :  { %v313_v60 = vpop.f32.mrf.mxu2 }
  0xed   :  { %416 = vst [vmem:[%s896_s3 + $0x20] sm:$0xff] %v408_v1  ;;  %v314_v2 = vadd.f32 %v313_v60, %v273_v62 }
  0xee   :  { %v275_v5 = vpop.f32.mrf.mxu1  ;;  %v360_v21 = vpop.f32.mrf.mxu3 }
  0xef   :  { %v355_v4 = vadd.f32 %v354_v56, %v314_v2  ;;  %v276_v9 = vadd.f32 %v275_v5, %v235_v6 }
  0xf1   :  { %v396_v7 = vadd.f32 %v395_v59, %v355_v4 }
  0xf2   :  { %v401_v23 = vpop.f32.mrf.mxu0 }
  0xf3   :  { %v409_v10 = vmax.f32 %v396_v7, 0.0 }
  0xf4   :  { %v316_v63 = vpop.f32.mrf.mxu2 }
  0xf5   :  { %417 = vst [vmem:[%s896_s3 + $0x28] sm:$0xff] %v409_v10  ;;  %v317_v12 = vadd.f32 %v316_v63, %v276_v9 }
  0xf6   :  { %v278_v15 = vpop.f32.mrf.mxu1 }
  0xf7   :  { %v358_v14 = vadd.f32 %v357_v8, %v317_v12  ;;  %v279_v18 = vadd.f32 %v278_v15, %v238_v16 }
  0xf9   :  { %v399_v17 = vadd.f32 %v398_v11, %v358_v14 }
  0xfb   :  { %v410_v20 = vmax.f32 %v399_v17, 0.0 }
  0xfc   :  { %v319_v61 = vpop.f32.mrf.mxu2 }
  0xfd   :  { %418 = vst [vmem:[%s896_s3 + $0x30] sm:$0xff] %v410_v20  ;;  %v320_v22 = vadd.f32 %v319_v61, %v279_v18 }
  0xff   :  { %v361_v24 = vadd.f32 %v360_v21, %v320_v22 }
 0x101   :  { %v402_v25 = vadd.f32 %v401_v23, %v361_v24 }
 0x103   :  { %v411_v26 = vmax.f32 %v402_v25, 0.0 }
 0x105   :  { %419 = vst [vmem:[%s896_s3 + $0x38] sm:$0xff] %v411_v26 }

// kernel: cnn_forward.7
= control target key start
LH: loop header
LB: loop body
LE: loop exit
PB: predicated region body
PF: predicated region fallthrough
CT: control target
= control target key end

     0   :  { %10 = vsyncpa [#allocation4], 0  ;;  %s1788_s18 = smov 0   ;;  %s2601_s0 = inlined_call_operand.vmem [shape: f32[2,4096], index: 0, kind: input, shape index: {}]   ;;  %s2602_s1 = inlined_call_operand.vmem [shape: f32[4096,512], index: 1, kind: input, shape index: {}]   ;;  %s2603_s2 = inlined_call_operand.vmem [shape: f32[1,512], index: 2, kind: input, shape index: {}]   ;;  %s2604_s3 = inlined_call_operand.vmem [shape: f32[512,5], index: 3, kind: input, shape index: {}]   ;;  %s2605_s4 = inlined_call_operand.vmem [shape: f32[1,5], index: 4, kind: input, shape index: {}]   ;;  %s2606_s5 = inlined_call_operand.hbm [shape: f32[2,5], index: 5, kind: output, shape index: {}]  }
   0x1 LB: > { %s1794_s19 = sadd.s32 4294967295, %s1754_s18   ;;  %p1678_p0 = scmp.ge.s32.totalorder %s1754_s18, 1  ;;  %s1754_s18 = sphi %s1788_s18, %s16_s18  }
   0x2   : > { %p196_p1 = scmp.lt.s32.totalorder %s1754_s18, 5 }
   0x4   : > { %p197_p2 = pnand %p1678_p0, %p196_p1 }
   0x5   : > { %s1679_s20 = sshll.u32 (!%p197_p2), %s1794_s19, 3  ;;  %s1681_s21 = sshll.u32 (!%p197_p2), %s1794_s19, 7 }
   0x6   : > { %200 = sbr.rel (%p197_p2) target bundleno = 704 (0x2c0), region = 40  ;;  %p226_p3 = scmp.lt.s32.totalorder (!%p197_p2), %s1679_s20, 31 }
   0x7   : > { %p232_p4 = scmp.lt.s32.totalorder (!%p197_p2), %s1681_s21, 511  ;;  %p1684_p5 = scmp.ne.s32.totalorder (!%p197_p2), %s1794_s19, 0 }
   0xb   : > { %s2608_s20 = smov (!%p226_p3, %s1679_s20), 31  ;;  %s2610_s21 = smov (!%p232_p4, %s1681_s21), 511 }
   0xc   : > { %s1680_s22 = sshll.u32 %s2608_s20, 1  ;;  %s1690_s26 = sshll.u32 %s2610_s21, 5 }
   0xd   : > { %s1803_s25 = scalar_lea.vmem %s2601_s0, %s1680_s22  ;;  %s1808_s29 = scalar_lea.vmem %s2602_s1, %s1690_s26 }
   0xe   : > { %241 = sbr.rel (%p1684_p5) target bundleno = 21 (0x15), region = 44 }
  0x13   : > { %v1756_v0 = vmov 0.0  }
  0x14   : > { %242 = vst [vmem:[#allocation2] sm:$0xff] %v1756_v0 }
  0x15 PF: > { %v306_v1 = vld [vmem:[%s1808_s29 + $0x1e0] sm:$0xff]  ;;  %vm1426_vm0 = vcmask 1041408   ;;  %vm1428_vm1 = vcmask 1045508   ;;  %vm1430_vm2 = vcmask 1043456   ;;  %p1685_p6 = scmp.ne.s32.totalorder %s1794_s19, 3 }
  0x16   : > { %v434_v2 = vld [vmem:[%s1808_s29 + $0x5e0] sm:$0xff]  ;;  %779 = vmatpush.msra.mxu0 %v306_v1 }
  0x17   : > { %v302_v3 = vld [vmem:[%s1808_s29 + $0x1c0] sm:$0xff]  ;;  %819 = vmatpush.msra.mxu2 %v434_v2 }
  0x18   : > { %v370_v4 = vld [vmem:[%s1808_s29 + $0x3e0] sm:$0xff]  ;;  %780 = vmatpush.msra.mxu0 %v302_v3 }
  0x19   : > { %v430_v5 = vld [vmem:[%s1808_s29 + $0x5c0] sm:$0xff]  ;;  %799 = vmatpush.msra.mxu1 %v370_v4 }
  0x1a   : > { %v498_v6 = vld [vmem:[%s1808_s29 + $0x7e0] sm:$0xff]  ;;  %820 = vmatpush.msra.mxu2 %v430_v5 }
  0x1b   : > { %839 = vmatpush.msra.mxu3 %v498_v6  ;;  %v298_v7 = vld [vmem:[%s1808_s29 + $0x1a0] sm:$0xff] }
  0x1c   : > { %v366_v8 = vld [vmem:[%s1808_s29 + $0x3c0] sm:$0xff]  ;;  %781 = vmatpush.msra.mxu0 %v298_v7 }
  0x1d   : > { %v426_v9 = vld [vmem:[%s1808_s29 + $0x5a0] sm:$0xff]  ;;  %800 = vmatpush.msra.mxu1 %v366_v8 }
  0x1e   : > { %v494_v10 = vld [vmem:[%s1808_s29 + $0x7c0] sm:$0xff]  ;;  %821 = vmatpush.msra.mxu2 %v426_v9 }
  0x1f   : > { %v362_v11 = vld [vmem:[%s1808_s29 + $0x3a0] sm:$0xff]  ;;  %840 = vmatpush.msra.mxu3 %v494_v10 }
  0x20   : > { %v294_v12 = vld [vmem:[%s1808_s29 + $0x180] sm:$0xff]  ;;  %801 = vmatpush.msra.mxu1 %v362_v11 }
  0x21   : > { %v422_v13 = vld [vmem:[%s1808_s29 + $0x580] sm:$0xff]  ;;  %782 = vmatpush.msra.mxu0 %v294_v12 }
  0x22   : > { %v490_v14 = vld [vmem:[%s1808_s29 + $0x7a0] sm:$0xff]  ;;  %822 = vmatpush.msra.mxu2 %v422_v13 }
  0x23   : > { %v358_v15 = vld [vmem:[%s1808_s29 + $0x380] sm:$0xff]  ;;  %841 = vmatpush.msra.mxu3 %v490_v14 }
  0x24   : > { %v486_v16 = vld [vmem:[%s1808_s29 + $0x780] sm:$0xff]  ;;  %802 = vmatpush.msra.mxu1 %v358_v15 }
  0x25   : > { %v290_v17 = vld [vmem:[%s1808_s29 + $0x160] sm:$0xff]  ;;  %842 = vmatpush.msra.mxu3 %v486_v16 }
  0x26   : > { %v418_v18 = vld [vmem:[%s1808_s29 + $0x560] sm:$0xff]  ;;  %783 = vmatpush.msra.mxu0 %v290_v17 }
  0x27   : > { %v354_v19 = vld [vmem:[%s1808_s29 + $0x360] sm:$0xff]  ;;  %823 = vmatpush.msra.mxu2 %v418_v18 }
  0x28   : > { %v482_v20 = vld [vmem:[%s1808_s29 + $0x760] sm:$0xff]  ;;  %803 = vmatpush.msra.mxu1 %v354_v19 }
  0x29   : > { %v286_v21 = vld [vmem:[%s1808_s29 + $0x140] sm:$0xff]  ;;  %843 = vmatpush.msra.mxu3 %v482_v20 }
  0x2a   : > { %v414_v22 = vld [vmem:[%s1808_s29 + $0x540] sm:$0xff]  ;;  %784 = vmatpush.msra.mxu0 %v286_v21 }
  0x2b   : > { %v350_v23 = vld [vmem:[%s1808_s29 + $0x340] sm:$0xff]  ;;  %824 = vmatpush.msra.mxu2 %v414_v22 }
  0x2c   : > { %v478_v24 = vld [vmem:[%s1808_s29 + $0x740] sm:$0xff]  ;;  %804 = vmatpush.msra.mxu1 %v350_v23 }
  0x2d   : > { %v282_v25 = vld [vmem:[%s1808_s29 + $0x120] sm:$0xff]  ;;  %844 = vmatpush.msra.mxu3 %v478_v24 }
  0x2e   : > { %v410_v26 = vld [vmem:[%s1808_s29 + $0x520] sm:$0xff]  ;;  %785 = vmatpush.msra.mxu0 %v282_v25 }
  0x2f   : > { %v346_v27 = vld [vmem:[%s1808_s29 + $0x320] sm:$0xff]  ;;  %825 = vmatpush.msra.mxu2 %v410_v26 }
  0x30   : > { %v474_v28 = vld [vmem:[%s1808_s29 + $0x720] sm:$0xff]  ;;  %805 = vmatpush.msra.mxu1 %v346_v27 }
  0x31   : > { %v278_v29 = vld [vmem:[%s1808_s29 + $0x100] sm:$0xff]  ;;  %845 = vmatpush.msra.mxu3 %v474_v28 }
  0x32   : > { %v406_v30 = vld [vmem:[%s1808_s29 + $0x500] sm:$0xff]  ;;  %786 = vmatpush.msra.mxu0 %v278_v29 }
  0x33   : > { %v342_v31 = vld [vmem:[%s1808_s29 + $0x300] sm:$0xff]  ;;  %826 = vmatpush.msra.mxu2 %v406_v30 }
  0x34   : > { %v470_v32 = vld [vmem:[%s1808_s29 + $0x700] sm:$0xff]  ;;  %806 = vmatpush.msra.mxu1 %v342_v31 }
  0x35   : > { %v274_v33 = vld [vmem:[%s1808_s29 + $0xe0] sm:$0xff]  ;;  %846 = vmatpush.msra.mxu3 %v470_v32 }
  0x36   : > { %v402_v34 = vld [vmem:[%s1808_s29 + $0x4e0] sm:$0xff]  ;;  %787 = vmatpush.msra.mxu0 %v274_v33 }
  0x37   : > { %v338_v35 = vld [vmem:[%s1808_s29 + $0x2e0] sm:$0xff]  ;;  %827 = vmatpush.msra.mxu2 %v402_v34 }
  0x38   : > { %v466_v36 = vld [vmem:[%s1808_s29 + $0x6e0] sm:$0xff]  ;;  %807 = vmatpush.msra.mxu1 %v338_v35 }
  0x39   : > { %v270_v37 = vld [vmem:[%s1808_s29 + $0xc0] sm:$0xff]  ;;  %847 = vmatpush.msra.mxu3 %v466_v36  ;;  %v245_v36 = vld [vmem:[%s1803_s25 + $0x8] sm:$0xff] }
  0x3a   : > { %v398_v38 = vld [vmem:[%s1808_s29 + $0x4c0] sm:$0xff]  ;;  %788 = vmatpush.msra.mxu0 %v270_v37  ;;  %762 = vst [vmem:[#allocation1 + $0x20] ss:$4 sm:$0xff] %v245_v36  ;;  %v479_v36 = vld [vmem:[%s1808_s29 + $0x748] sm:$0xff] }
  0x3b   : > { %v334_v39 = vld [vmem:[%s1808_s29 + $0x2c0] sm:$0xff]  ;;  %828 = vmatpush.msra.mxu2 %v398_v38 }
  0x3c   : > { %v462_v40 = vld [vmem:[%s1808_s29 + $0x6c0] sm:$0xff]  ;;  %808 = vmatpush.msra.mxu1 %v334_v39 }
  0x3d   : > { %v266_v41 = vld [vmem:[%s1808_s29 + $0xa0] sm:$0xff]  ;;  %848 = vmatpush.msra.mxu3 %v462_v40 }
  0x3e   : > { %v394_v42 = vld [vmem:[%s1808_s29 + $0x4a0] sm:$0xff]  ;;  %789 = vmatpush.msra.mxu0 %v266_v41 }
  0x3f   : > { %v330_v43 = vld [vmem:[%s1808_s29 + $0x2a0] sm:$0xff]  ;;  %829 = vmatpush.msra.mxu2 %v394_v42 }
  0x40   : > { %v458_v44 = vld [vmem:[%s1808_s29 + $0x6a0] sm:$0xff]  ;;  %809 = vmatpush.msra.mxu1 %v330_v43 }
  0x41   : > { %v262_v45 = vld [vmem:[%s1808_s29 + $0x80] sm:$0xff]  ;;  %849 = vmatpush.msra.mxu3 %v458_v44 }
  0x42   : > { %v390_v46 = vld [vmem:[%s1808_s29 + $0x480] sm:$0xff]  ;;  %790 = vmatpush.msra.mxu0 %v262_v45 }
  0x43   : > { %v326_v47 = vld [vmem:[%s1808_s29 + $0x280] sm:$0xff]  ;;  %830 = vmatpush.msra.mxu2 %v390_v46 }
  0x44   : > { %v454_v48 = vld [vmem:[%s1808_s29 + $0x680] sm:$0xff]  ;;  %810 = vmatpush.msra.mxu1 %v326_v47 }
  0x45   : > { %v258_v49 = vld [vmem:[%s1808_s29 + $0x60] sm:$0xff]  ;;  %850 = vmatpush.msra.mxu3 %v454_v48 }
  0x46   : > { %v386_v50 = vld [vmem:[%s1808_s29 + $0x460] sm:$0xff]  ;;  %791 = vmatpush.msra.mxu0 %v258_v49 }
  0x47   : > { %v322_v51 = vld [vmem:[%s1808_s29 + $0x260] sm:$0xff]  ;;  %831 = vmatpush.msra.mxu2 %v386_v50 }
  0x48   : > { %v450_v52 = vld [vmem:[%s1808_s29 + $0x660] sm:$0xff]  ;;  %811 = vmatpush.msra.mxu1 %v322_v51 }
  0x49   : > { %v254_v53 = vld [vmem:[%s1808_s29 + $0x40] sm:$0xff]  ;;  %851 = vmatpush.msra.mxu3 %v450_v52 }
  0x4a   : > { %v382_v54 = vld [vmem:[%s1808_s29 + $0x440] sm:$0xff]  ;;  %792 = vmatpush.msra.mxu0 %v254_v53 }
  0x4b   : > { %v318_v55 = vld [vmem:[%s1808_s29 + $0x240] sm:$0xff]  ;;  %832 = vmatpush.msra.mxu2 %v382_v54 }
  0x4c   : > { %v446_v56 = vld [vmem:[%s1808_s29 + $0x640] sm:$0xff]  ;;  %812 = vmatpush.msra.mxu1 %v318_v55 }
  0x4d   : > { %v250_v57 = vld [vmem:[%s1808_s29 + $0x20] sm:$0xff]  ;;  %852 = vmatpush.msra.mxu3 %v446_v56 }
  0x4e   : > { %v378_v58 = vld [vmem:[%s1808_s29 + $0x420] sm:$0xff]  ;;  %793 = vmatpush.msra.mxu0 %v250_v57 }
  0x4f   : > { %v314_v59 = vld [vmem:[%s1808_s29 + $0x220] sm:$0xff]  ;;  %833 = vmatpush.msra.mxu2 %v378_v58 }
  0x50   : > { %v442_v60 = vld [vmem:[%s1808_s29 + $0x620] sm:$0xff]  ;;  %813 = vmatpush.msra.mxu1 %v314_v59 }
  0x51   : > { %v246_v61 = vld [vmem:[%s1808_s29] sm:$0xff]  ;;  %853 = vmatpush.msra.mxu3 %v442_v60 }
  0x52   : > { %v374_v62 = vld [vmem:[%s1808_s29 + $0x400] sm:$0xff]  ;;  %794 = vmatpush.msra.mxu0 %v246_v61 }
  0x53   : > { %v562_v63 = vld [vmem:[%s1808_s29 + $0x9e0] sm:$0xff]  ;;  %834 = vmatpush.msra.mxu2 %v374_v62 }
  0x54   : > { %v690_v0 = vld [vmem:[%s1808_s29 + $0xde0] sm:$0xff]  ;;  %859 = vmatpush.msrb.mxu0 %v562_v63 }
  0x55   : > { %v310_v1 = vld [vmem:[%s1808_s29 + $0x200] sm:$0xff]  ;;  %899 = vmatpush.msrb.mxu2 %v690_v0 }
  0x56   : > { %v438_v2 = vld [vmem:[%s1808_s29 + $0x600] sm:$0xff]  ;;  %814 = vmatpush.msra.mxu1 %v310_v1 }
  0x57   : > { %v558_v3 = vld [vmem:[%s1808_s29 + $0x9c0] sm:$0xff]  ;;  %854 = vmatpush.msra.mxu3 %v438_v2 }
  0x58   : > { %v626_v4 = vld [vmem:[%s1808_s29 + $0xbe0] sm:$0xff]  ;;  %860 = vmatpush.msrb.mxu0 %v558_v3 }
  0x59   : > { %v686_v5 = vld [vmem:[%s1808_s29 + $0xdc0] sm:$0xff]  ;;  %879 = vmatpush.msrb.mxu1 %v626_v4  ;;  %v307_v4 = vld [vmem:[%s1808_s29 + $0x1e8] sm:$0xff] }
  0x5a   : > { %v754_v6 = vld [vmem:[%s1808_s29 + $0xfe0] sm:$0xff]  ;;  %900 = vmatpush.msrb.mxu2 %v686_v5  ;;  %v435_v5 = vld [vmem:[%s1808_s29 + $0x5e8] sm:$0xff] }
  0x5b   : > { %v554_v7 = vld [vmem:[%s1808_s29 + $0x9a0] sm:$0xff]  ;;  %919 = vmatpush.msrb.mxu3 %v754_v6 }
  0x5c   : > { %v622_v8 = vld [vmem:[%s1808_s29 + $0xbc0] sm:$0xff]  ;;  %861 = vmatpush.msrb.mxu0 %v554_v7 }
  0x5d   : > { %v682_v9 = vld [vmem:[%s1808_s29 + $0xda0] sm:$0xff]  ;;  %880 = vmatpush.msrb.mxu1 %v622_v8 }
  0x5e   : > { %v750_v10 = vld [vmem:[%s1808_s29 + $0xfc0] sm:$0xff]  ;;  %901 = vmatpush.msrb.mxu2 %v682_v9  ;;  %v303_v9 = vld [vmem:[%s1808_s29 + $0x1c8] sm:$0xff] }
  0x5f   : > { %v550_v11 = vld [vmem:[%s1808_s29 + $0x980] sm:$0xff]  ;;  %920 = vmatpush.msrb.mxu3 %v750_v10  ;;  %v371_v10 = vld [vmem:[%s1808_s29 + $0x3e8] sm:$0xff] }
  0x60   : > { %v618_v12 = vld [vmem:[%s1808_s29 + $0xba0] sm:$0xff]  ;;  %862 = vmatpush.msrb.mxu0 %v550_v11  ;;  %v431_v11 = vld [vmem:[%s1808_s29 + $0x5c8] sm:$0xff] }
  0x61   : > { %v678_v13 = vld [vmem:[%s1808_s29 + $0xd80] sm:$0xff]  ;;  %881 = vmatpush.msrb.mxu1 %v618_v12  ;;  %v499_v12 = vld [vmem:[%s1808_s29 + $0x7e8] sm:$0xff] }
  0x62   : > { %v746_v14 = vld [vmem:[%s1808_s29 + $0xfa0] sm:$0xff]  ;;  %902 = vmatpush.msrb.mxu2 %v678_v13  ;;  %v299_v13 = vld [vmem:[%s1808_s29 + $0x1a8] sm:$0xff] }
  0x63   : > { %v546_v15 = vld [vmem:[%s1808_s29 + $0x960] sm:$0xff]  ;;  %921 = vmatpush.msrb.mxu3 %v746_v14  ;;  %v367_v14 = vld [vmem:[%s1808_s29 + $0x3c8] sm:$0xff] }
  0x64   : > { %v614_v16 = vld [vmem:[%s1808_s29 + $0xb80] sm:$0xff]  ;;  %863 = vmatpush.msrb.mxu0 %v546_v15  ;;  %v427_v15 = vld [vmem:[%s1808_s29 + $0x5a8] sm:$0xff] }
  0x65   : > { %v674_v17 = vld [vmem:[%s1808_s29 + $0xd60] sm:$0xff]  ;;  %882 = vmatpush.msrb.mxu1 %v614_v16  ;;  %v495_v16 = vld [vmem:[%s1808_s29 + $0x7c8] sm:$0xff] }
  0x66   : > { %v742_v18 = vld [vmem:[%s1808_s29 + $0xf80] sm:$0xff]  ;;  %903 = vmatpush.msrb.mxu2 %v674_v17  ;;  %v1963_v17 = vld.sshfl [vmem:[#allocation1 + $0x30] sm:$0xff pattern:$0x73625140] }
  0x67   : > { %v542_v19 = vld [vmem:[%s1808_s29 + $0x940] sm:$0xff]  ;;  %922 = vmatpush.msrb.mxu3 %v742_v18  ;;  %v295_v18 = vld [vmem:[%s1808_s29 + $0x188] sm:$0xff] }
  0x68   : > { %v610_v20 = vld [vmem:[%s1808_s29 + $0xb60] sm:$0xff]  ;;  %864 = vmatpush.msrb.mxu0 %v542_v19  ;;  %v363_v19 = vld [vmem:[%s1808_s29 + $0x3a8] sm:$0xff] }
  0x69   : > { %v670_v21 = vld [vmem:[%s1808_s29 + $0xd40] sm:$0xff]  ;;  %883 = vmatpush.msrb.mxu1 %v610_v20  ;;  %v423_v20 = vld [vmem:[%s1808_s29 + $0x588] sm:$0xff] }
  0x6a   : > { %v738_v22 = vld [vmem:[%s1808_s29 + $0xf60] sm:$0xff]  ;;  %904 = vmatpush.msrb.mxu2 %v670_v21  ;;  %v491_v21 = vld [vmem:[%s1808_s29 + $0x7a8] sm:$0xff] }
  0x6b   : > { %v244_v23 = vld [vmem:[%s1803_s25] sm:$0xff]  ;;  %923 = vmatpush.msrb.mxu3 %v738_v22 }
  0x6c   : > { %v538_v24 = vld [vmem:[%s1808_s29 + $0x920] sm:$0xff]  ;;  %760 = vst [vmem:[#allocation1] ss:$4 sm:$0xff] %v244_v23  ;;  %v1972_v23 = vld.sshfl [vmem:[#allocation1 + $0x38] sm:$0xff pattern:$0x73625140] }
  0x6d   : > { %v606_v25 = vld [vmem:[%s1808_s29 + $0xb40] sm:$0xff]  ;;  %865 = vmatpush.msrb.mxu0 %v538_v24  ;;  %v291_v24 = vld [vmem:[%s1808_s29 + $0x168] sm:$0xff] }
  0x6e   : > { %v666_v26 = vld [vmem:[%s1808_s29 + $0xd20] sm:$0xff]  ;;  %884 = vmatpush.msrb.mxu1 %v606_v25  ;;  %v359_v25 = vld [vmem:[%s1808_s29 + $0x388] sm:$0xff] }
  0x6f   : > { %v734_v27 = vld [vmem:[%s1808_s29 + $0xf40] sm:$0xff]  ;;  %905 = vmatpush.msrb.mxu2 %v666_v26  ;;  %v419_v26 = vld [vmem:[%s1808_s29 + $0x568] sm:$0xff] }
  0x70   : > { %v534_v28 = vld [vmem:[%s1808_s29 + $0x900] sm:$0xff]  ;;  %924 = vmatpush.msrb.mxu3 %v734_v27  ;;  %v487_v27 = vld [vmem:[%s1808_s29 + $0x788] sm:$0xff] }
  0x71   : > { %v602_v29 = vld [vmem:[%s1808_s29 + $0xb20] sm:$0xff]  ;;  %866 = vmatpush.msrb.mxu0 %v534_v28  ;;  %v1979_v28 = vld.sshfl [vmem:[#allocation1 + $0x28] sm:$0xff pattern:$0x73625140] }
  0x72   : > { %v662_v30 = vld [vmem:[%s1808_s29 + $0xd00] sm:$0xff]  ;;  %885 = vmatpush.msrb.mxu1 %v602_v29  ;;  %v287_v29 = vld [vmem:[%s1808_s29 + $0x148] sm:$0xff] }
  0x73   : > { %v730_v31 = vld [vmem:[%s1808_s29 + $0xf20] sm:$0xff]  ;;  %906 = vmatpush.msrb.mxu2 %v662_v30  ;;  %v1935_v61 = vld.sshfl [vmem:[#allocation1 + $0x10] sm:$0xff pattern:$0x73625140]  ;;  %v355_v30 = vld [vmem:[%s1808_s29 + $0x368] sm:$0xff] }
  0x74   : > { %v530_v32 = vld [vmem:[%s1808_s29 + $0x8e0] sm:$0xff]  ;;  %925 = vmatpush.msrb.mxu3 %v730_v31  ;;  %835 = vmatmul.f32.vlgmr.msra.gmra.mxu2 %v1935_v61  ;;  %v1944_v3 = vld.sshfl [vmem:[#allocation1 + $0x18] sm:$0xff pattern:$0x73625140]  ;;  %v415_v31 = vld [vmem:[%s1808_s29 + $0x548] sm:$0xff] }
  0x75   : > { %v598_v33 = vld [vmem:[%s1808_s29 + $0xb00] sm:$0xff]  ;;  %867 = vmatpush.msrb.mxu0 %v530_v32  ;;  %v1951_v8 = vld.sshfl [vmem:[#allocation1 + $0x8] sm:$0xff pattern:$0x73625140]  ;;  %855 = vmatmul.f32.vlgmr.msra.gmra.mxu3 %v1944_v3 }
  0x76   : > { %v658_v34 = vld [vmem:[%s1808_s29 + $0xce0] sm:$0xff]  ;;  %886 = vmatpush.msrb.mxu1 %v598_v33  ;;  %v483_v32 = vld [vmem:[%s1808_s29 + $0x768] sm:$0xff] }
  0x77   : > { %v726_v35 = vld [vmem:[%s1808_s29 + $0xf00] sm:$0xff]  ;;  %907 = vmatpush.msrb.mxu2 %v658_v34  ;;  %815 = vmatmul.f32.vlgmr.msra.gmra.mxu1 %v1951_v8  ;;  %v283_v33 = vld [vmem:[%s1808_s29 + $0x128] sm:$0xff] }
  0x78   : > { %v526_v37 = vld [vmem:[%s1808_s29 + $0x8c0] sm:$0xff]  ;;  %926 = vmatpush.msrb.mxu3 %v726_v35  ;;  %v351_v34 = vld [vmem:[%s1808_s29 + $0x348] sm:$0xff] }
  0x79   : > { %v594_v38 = vld [vmem:[%s1808_s29 + $0xae0] sm:$0xff]  ;;  %868 = vmatpush.msrb.mxu0 %v526_v37  ;;  %v411_v35 = vld [vmem:[%s1808_s29 + $0x528] sm:$0xff] }
  0x7a   : > { %v654_v39 = vld [vmem:[%s1808_s29 + $0xcc0] sm:$0xff]  ;;  %887 = vmatpush.msrb.mxu1 %v594_v38  ;;  %v279_v37 = vld [vmem:[%s1808_s29 + $0x108] sm:$0xff] }
  0x7b   : > { %v722_v40 = vld [vmem:[%s1808_s29 + $0xee0] sm:$0xff]  ;;  %908 = vmatpush.msrb.mxu2 %v654_v39  ;;  %v347_v38 = vld [vmem:[%s1808_s29 + $0x328] sm:$0xff] }
  0x7c   : > { %v522_v41 = vld [vmem:[%s1808_s29 + $0x8a0] sm:$0xff]  ;;  %927 = vmatpush.msrb.mxu3 %v722_v40  ;;  %v407_v39 = vld [vmem:[%s1808_s29 + $0x508] sm:$0xff] }
  0x7d   : > { %v590_v42 = vld [vmem:[%s1808_s29 + $0xac0] sm:$0xff]  ;;  %869 = vmatpush.msrb.mxu0 %v522_v41  ;;  %v475_v40 = vld [vmem:[%s1808_s29 + $0x728] sm:$0xff] }
  0x7e   : > { %v650_v43 = vld [vmem:[%s1808_s29 + $0xca0] sm:$0xff]  ;;  %888 = vmatpush.msrb.mxu1 %v590_v42  ;;  %v275_v41 = vld [vmem:[%s1808_s29 + $0xe8] sm:$0xff] }
  0x7f   : > { %v718_v44 = vld [vmem:[%s1808_s29 + $0xec0] sm:$0xff]  ;;  %909 = vmatpush.msrb.mxu2 %v650_v43  ;;  %v343_v42 = vld [vmem:[%s1808_s29 + $0x308] sm:$0xff] }
  0x80   : > { %v518_v45 = vld [vmem:[%s1808_s29 + $0x880] sm:$0xff]  ;;  %928 = vmatpush.msrb.mxu3 %v718_v44  ;;  %v403_v43 = vld [vmem:[%s1808_s29 + $0x4e8] sm:$0xff] }
  0x81   : > { %v586_v46 = vld [vmem:[%s1808_s29 + $0xaa0] sm:$0xff]  ;;  %870 = vmatpush.msrb.mxu0 %v518_v45  ;;  %v471_v44 = vld [vmem:[%s1808_s29 + $0x708] sm:$0xff] }
  0x82   : > { %v646_v47 = vld [vmem:[%s1808_s29 + $0xc80] sm:$0xff]  ;;  %889 = vmatpush.msrb.mxu1 %v586_v46  ;;  %v271_v45 = vld [vmem:[%s1808_s29 + $0xc8] sm:$0xff] }
  0x83   : > { %v714_v48 = vld [vmem:[%s1808_s29 + $0xea0] sm:$0xff]  ;;  %910 = vmatpush.msrb.mxu2 %v646_v47  ;;  %v339_v46 = vld [vmem:[%s1808_s29 + $0x2e8] sm:$0xff] }
  0x84   : > { %v514_v49 = vld [vmem:[%s1808_s29 + $0x860] sm:$0xff]  ;;  %929 = vmatpush.msrb.mxu3 %v714_v48  ;;  %v399_v47 = vld [vmem:[%s1808_s29 + $0x4c8] sm:$0xff] }
  0x85   : > { %v582_v50 = vld [vmem:[%s1808_s29 + $0xa80] sm:$0xff]  ;;  %871 = vmatpush.msrb.mxu0 %v514_v49  ;;  %v467_v48 = vld [vmem:[%s1808_s29 + $0x6e8] sm:$0xff] }
  0x86   : > { %v642_v51 = vld [vmem:[%s1808_s29 + $0xc60] sm:$0xff]  ;;  %890 = vmatpush.msrb.mxu1 %v582_v50  ;;  %v267_v49 = vld [vmem:[%s1808_s29 + $0xa8] sm:$0xff] }
  0x87   : > { %v710_v52 = vld [vmem:[%s1808_s29 + $0xe80] sm:$0xff]  ;;  %911 = vmatpush.msrb.mxu2 %v642_v51  ;;  %v335_v50 = vld [vmem:[%s1808_s29 + $0x2c8] sm:$0xff] }
  0x88   : > { %v510_v53 = vld [vmem:[%s1808_s29 + $0x840] sm:$0xff]  ;;  %930 = vmatpush.msrb.mxu3 %v710_v52  ;;  %v395_v51 = vld [vmem:[%s1808_s29 + $0x4a8] sm:$0xff] }
  0x89   : > { %v578_v54 = vld [vmem:[%s1808_s29 + $0xa60] sm:$0xff]  ;;  %872 = vmatpush.msrb.mxu0 %v510_v53  ;;  %v463_v52 = vld [vmem:[%s1808_s29 + $0x6c8] sm:$0xff] }
  0x8a   : > { %v638_v55 = vld [vmem:[%s1808_s29 + $0xc40] sm:$0xff]  ;;  %891 = vmatpush.msrb.mxu1 %v578_v54  ;;  %v263_v53 = vld [vmem:[%s1808_s29 + $0x88] sm:$0xff] }
  0x8b   : > { %v706_v56 = vld [vmem:[%s1808_s29 + $0xe60] sm:$0xff]  ;;  %912 = vmatpush.msrb.mxu2 %v638_v55  ;;  %v331_v54 = vld [vmem:[%s1808_s29 + $0x2a8] sm:$0xff] }
  0x8c   : > { %v506_v57 = vld [vmem:[%s1808_s29 + $0x820] sm:$0xff]  ;;  %931 = vmatpush.msrb.mxu3 %v706_v56  ;;  %v391_v55 = vld [vmem:[%s1808_s29 + $0x488] sm:$0xff] }
  0x8d   : > { %v574_v58 = vld [vmem:[%s1808_s29 + $0xa40] sm:$0xff]  ;;  %873 = vmatpush.msrb.mxu0 %v506_v57  ;;  %v459_v56 = vld [vmem:[%s1808_s29 + $0x6a8] sm:$0xff] }
  0x8e   : > { %v634_v59 = vld [vmem:[%s1808_s29 + $0xc20] sm:$0xff]  ;;  %892 = vmatpush.msrb.mxu1 %v574_v58  ;;  %v259_v57 = vld [vmem:[%s1808_s29 + $0x68] sm:$0xff] }
  0x8f   : > { %v702_v60 = vld [vmem:[%s1808_s29 + $0xe40] sm:$0xff]  ;;  %913 = vmatpush.msrb.mxu2 %v634_v59  ;;  %v327_v58 = vld [vmem:[%s1808_s29 + $0x288] sm:$0xff] }
  0x90   : > { %v502_v62 = vld [vmem:[%s1808_s29 + $0x800] sm:$0xff]  ;;  %932 = vmatpush.msrb.mxu3 %v702_v60  ;;  %v387_v59 = vld [vmem:[%s1808_s29 + $0x468] sm:$0xff] }
  0x91   : > { %v570_v63 = vld [vmem:[%s1808_s29 + $0xa20] sm:$0xff]  ;;  %874 = vmatpush.msrb.mxu0 %v502_v62  ;;  %v455_v60 = vld [vmem:[%s1808_s29 + $0x688] sm:$0xff] }
  0x92   : > { %v630_v0 = vld [vmem:[%s1808_s29 + $0xc00] sm:$0xff]  ;;  %893 = vmatpush.msrb.mxu1 %v570_v63  ;;  %v255_v62 = vld [vmem:[%s1808_s29 + $0x48] sm:$0xff] }
  0x93   : > { %v698_v1 = vld [vmem:[%s1808_s29 + $0xe20] sm:$0xff]  ;;  %914 = vmatpush.msrb.mxu2 %v630_v0  ;;  %v323_v63 = vld [vmem:[%s1808_s29 + $0x268] sm:$0xff] }
  0x94   : > { %v1941_v2 = vld.sshfl [vmem:[#allocation1] sm:$0xff pattern:$0x73625140]  ;;  %933 = vmatpush.msrb.mxu3 %v698_v1  ;;  %915 = vmatmul.f32.vlgmr.msrb.gmra.mxu2 %v1963_v17  ;;  %v383_v0 = vld [vmem:[%s1808_s29 + $0x448] sm:$0xff] }
  0x95   : > { %v566_v6 = vld [vmem:[%s1808_s29 + $0xa00] sm:$0xff]  ;;  %795 = vmatmul.f32.vlgmr.msra.gmra.mxu0 %v1941_v2  ;;  %979 = vmatpush.msra.mxu2 %v435_v5  ;;  %v451_v1 = vld [vmem:[%s1808_s29 + $0x668] sm:$0xff] }
  0x96   : > { %v694_v7 = vld [vmem:[%s1808_s29 + $0xe00] sm:$0xff]  ;;  %939 = vmatpush.msra.mxu0 %v307_v4  ;;  %894 = vmatpush.msrb.mxu1 %v566_v6  ;;  %v251_v4 = vld [vmem:[%s1808_s29 + $0x28] sm:$0xff] }
  0x97   : > { %934 = vmatpush.msrb.mxu3 %v694_v7  ;;  %980 = vmatpush.msra.mxu2 %v431_v11  ;;  %v1969_v22 = vld.sshfl [vmem:[#allocation1 + $0x20] sm:$0xff pattern:$0x73625140]  ;;  %v319_v5 = vld [vmem:[%s1808_s29 + $0x248] sm:$0xff] }
  0x98   : > { %940 = vmatpush.msra.mxu0 %v303_v9  ;;  %959 = vmatpush.msra.mxu1 %v371_v10  ;;  %v379_v6 = vld [vmem:[%s1808_s29 + $0x428] sm:$0xff] }
  0x99   : > { %999 = vmatpush.msra.mxu3 %v499_v12  ;;  %981 = vmatpush.msra.mxu2 %v427_v15  ;;  %v447_v7 = vld [vmem:[%s1808_s29 + $0x648] sm:$0xff] }
  0x9a   : > { %941 = vmatpush.msra.mxu0 %v299_v13  ;;  %960 = vmatpush.msra.mxu1 %v367_v14  ;;  %v247_v9 = vld [vmem:[%s1808_s29 + $0x8] sm:$0xff] }
  0x9b   : > { %1000 = vmatpush.msra.mxu3 %v495_v16  ;;  %982 = vmatpush.msra.mxu2 %v423_v20  ;;  %v315_v10 = vld [vmem:[%s1808_s29 + $0x228] sm:$0xff] }
  0x9c   : > { %942 = vmatpush.msra.mxu0 %v295_v18  ;;  %961 = vmatpush.msra.mxu1 %v363_v19  ;;  %v375_v11 = vld [vmem:[%s1808_s29 + $0x408] sm:$0xff] }
  0x9d   : > { %1001 = vmatpush.msra.mxu3 %v491_v21  ;;  %875 = vmatmul.f32.vlgmr.msrb.gmra.mxu0 %v1969_v22  ;;  %v443_v12 = vld [vmem:[%s1808_s29 + $0x628] sm:$0xff] }
  0x9e   : > { %935 = vmatmul.f32.vlgmr.msrb.gmra.mxu3 %v1972_v23  ;;  %943 = vmatpush.msra.mxu0 %v291_v24  ;;  %v563_v13 = vld [vmem:[%s1808_s29 + $0x9e8] sm:$0xff] }
  0x9f   : > { %962 = vmatpush.msra.mxu1 %v359_v25  ;;  %983 = vmatpush.msra.mxu2 %v419_v26  ;;  %v691_v14 = vld [vmem:[%s1808_s29 + $0xde8] sm:$0xff] }
  0xa0   : > { %1002 = vmatpush.msra.mxu3 %v487_v27  ;;  %895 = vmatmul.f32.vlgmr.msrb.gmra.mxu1 %v1979_v28  ;;  %v311_v15 = vld [vmem:[%s1808_s29 + $0x208] sm:$0xff] }
  0xa1   : > { %944 = vmatpush.msra.mxu0 %v287_v29  ;;  %963 = vmatpush.msra.mxu1 %v355_v30  ;;  %v439_v16 = vld [vmem:[%s1808_s29 + $0x608] sm:$0xff] }
  0xa2   : > { %984 = vmatpush.msra.mxu2 %v415_v31  ;;  %1003 = vmatpush.msra.mxu3 %v483_v32  ;;  %v559_v18 = vld [vmem:[%s1808_s29 + $0x9c8] sm:$0xff] }
  0xa3   : > { %945 = vmatpush.msra.mxu0 %v283_v33  ;;  %964 = vmatpush.msra.mxu1 %v351_v34  ;;  %v627_v19 = vld [vmem:[%s1808_s29 + $0xbe8] sm:$0xff] }
  0xa4   : > { %985 = vmatpush.msra.mxu2 %v411_v35  ;;  %1004 = vmatpush.msra.mxu3 %v479_v36  ;;  %v687_v20 = vld [vmem:[%s1808_s29 + $0xdc8] sm:$0xff] }
  0xa5   : > { %946 = vmatpush.msra.mxu0 %v279_v37  ;;  %965 = vmatpush.msra.mxu1 %v347_v38  ;;  %v755_v21 = vld [vmem:[%s1808_s29 + $0xfe8] sm:$0xff] }
  0xa6   : > { %986 = vmatpush.msra.mxu2 %v407_v39  ;;  %1005 = vmatpush.msra.mxu3 %v475_v40  ;;  %v555_v24 = vld [vmem:[%s1808_s29 + $0x9a8] sm:$0xff] }
  0xa7   : > { %947 = vmatpush.msra.mxu0 %v275_v41  ;;  %966 = vmatpush.msra.mxu1 %v343_v42  ;;  %v623_v25 = vld [vmem:[%s1808_s29 + $0xbc8] sm:$0xff] }
  0xa8   : > { %987 = vmatpush.msra.mxu2 %v403_v43  ;;  %1006 = vmatpush.msra.mxu3 %v471_v44  ;;  %v683_v26 = vld [vmem:[%s1808_s29 + $0xda8] sm:$0xff] }
  0xa9   : > { %948 = vmatpush.msra.mxu0 %v271_v45  ;;  %967 = vmatpush.msra.mxu1 %v339_v46  ;;  %v751_v27 = vld [vmem:[%s1808_s29 + $0xfc8] sm:$0xff] }
  0xaa   : > { %988 = vmatpush.msra.mxu2 %v399_v47  ;;  %1007 = vmatpush.msra.mxu3 %v467_v48  ;;  %v551_v29 = vld [vmem:[%s1808_s29 + $0x988] sm:$0xff] }
  0xab   : > { %949 = vmatpush.msra.mxu0 %v267_v49  ;;  %968 = vmatpush.msra.mxu1 %v335_v50  ;;  %v619_v30 = vld [vmem:[%s1808_s29 + $0xba8] sm:$0xff] }
  0xac   : > { %989 = vmatpush.msra.mxu2 %v395_v51  ;;  %1008 = vmatpush.msra.mxu3 %v463_v52  ;;  %v679_v31 = vld [vmem:[%s1808_s29 + $0xd88] sm:$0xff] }
  0xad   : > { %950 = vmatpush.msra.mxu0 %v263_v53  ;;  %969 = vmatpush.msra.mxu1 %v331_v54  ;;  %v747_v32 = vld [vmem:[%s1808_s29 + $0xfa8] sm:$0xff] }
  0xae   : > { %990 = vmatpush.msra.mxu2 %v391_v55  ;;  %1009 = vmatpush.msra.mxu3 %v459_v56  ;;  %v547_v33 = vld [vmem:[%s1808_s29 + $0x968] sm:$0xff] }
  0xaf   : > { %951 = vmatpush.msra.mxu0 %v259_v57  ;;  %970 = vmatpush.msra.mxu1 %v327_v58  ;;  %v615_v34 = vld [vmem:[%s1808_s29 + $0xb88] sm:$0xff] }
  0xb0   : > { %991 = vmatpush.msra.mxu2 %v387_v59  ;;  %1010 = vmatpush.msra.mxu3 %v455_v60  ;;  %v675_v35 = vld [vmem:[%s1808_s29 + $0xd68] sm:$0xff] }
  0xb1   : > { %952 = vmatpush.msra.mxu0 %v255_v62  ;;  %971 = vmatpush.msra.mxu1 %v323_v63  ;;  %v743_v36 = vld [vmem:[%s1808_s29 + $0xf88] sm:$0xff] }
  0xb2   : > { %992 = vmatpush.msra.mxu2 %v383_v0  ;;  %1011 = vmatpush.msra.mxu3 %v451_v1  ;;  %v543_v37 = vld [vmem:[%s1808_s29 + $0x948] sm:$0xff] }
  0xb3   : > { %953 = vmatpush.msra.mxu0 %v251_v4  ;;  %972 = vmatpush.msra.mxu1 %v319_v5  ;;  %v611_v38 = vld [vmem:[%s1808_s29 + $0xb68] sm:$0xff] }
  0xb4   : > { %993 = vmatpush.msra.mxu2 %v379_v6  ;;  %1012 = vmatpush.msra.mxu3 %v447_v7  ;;  %v671_v39 = vld [vmem:[%s1808_s29 + $0xd48] sm:$0xff] }
  0xb5   : > { %954 = vmatpush.msra.mxu0 %v247_v9  ;;  %973 = vmatpush.msra.mxu1 %v315_v10  ;;  %v739_v40 = vld [vmem:[%s1808_s29 + $0xf68] sm:$0xff] }
  0xb6   : > { %994 = vmatpush.msra.mxu2 %v375_v11  ;;  %1013 = vmatpush.msra.mxu3 %v443_v12  ;;  %v539_v41 = vld [vmem:[%s1808_s29 + $0x928] sm:$0xff] }
  0xb7   : > { %1019 = vmatpush.msrb.mxu0 %v563_v13  ;;  %974 = vmatpush.msra.mxu1 %v311_v15  ;;  %v607_v42 = vld [vmem:[%s1808_s29 + $0xb48] sm:$0xff] }
  0xb8   : > { %1059 = vmatpush.msrb.mxu2 %v691_v14  ;;  %1014 = vmatpush.msra.mxu3 %v439_v16  ;;  %v667_v43 = vld [vmem:[%s1808_s29 + $0xd28] sm:$0xff] }
  0xb9   : > { %1020 = vmatpush.msrb.mxu0 %v559_v18  ;;  %1039 = vmatpush.msrb.mxu1 %v627_v19  ;;  %v735_v44 = vld [vmem:[%s1808_s29 + $0xf48] sm:$0xff]  ;;  %v308_v19 = vld [vmem:[%s1808_s29 + $0x1f0] sm:$0xff] }
  0xba   : > { %1060 = vmatpush.msrb.mxu2 %v687_v20  ;;  %1079 = vmatpush.msrb.mxu3 %v755_v21  ;;  %v535_v45 = vld [vmem:[%s1808_s29 + $0x908] sm:$0xff]  ;;  %v436_v20 = vld [vmem:[%s1808_s29 + $0x5f0] sm:$0xff] }
  0xbb   : > { %1021 = vmatpush.msrb.mxu0 %v555_v24  ;;  %1040 = vmatpush.msrb.mxu1 %v623_v25  ;;  %v603_v46 = vld [vmem:[%s1808_s29 + $0xb28] sm:$0xff]  ;;  %v304_v24 = vld [vmem:[%s1808_s29 + $0x1d0] sm:$0xff] }
  0xbc   : > { %1061 = vmatpush.msrb.mxu2 %v683_v26  ;;  %1080 = vmatpush.msrb.mxu3 %v751_v27  ;;  %v663_v47 = vld [vmem:[%s1808_s29 + $0xd08] sm:$0xff]  ;;  %v372_v25 = vld [vmem:[%s1808_s29 + $0x3f0] sm:$0xff] }
  0xbd   : > { %1022 = vmatpush.msrb.mxu0 %v551_v29  ;;  %1041 = vmatpush.msrb.mxu1 %v619_v30  ;;  %v731_v48 = vld [vmem:[%s1808_s29 + $0xf28] sm:$0xff]  ;;  %v432_v26 = vld [vmem:[%s1808_s29 + $0x5d0] sm:$0xff] }
  0xbe   : > { %1062 = vmatpush.msrb.mxu2 %v679_v31  ;;  %1081 = vmatpush.msrb.mxu3 %v747_v32  ;;  %v531_v49 = vld [vmem:[%s1808_s29 + $0x8e8] sm:$0xff]  ;;  %v500_v27 = vld [vmem:[%s1808_s29 + $0x7f0] sm:$0xff] }
  0xbf   : > { %1023 = vmatpush.msrb.mxu0 %v547_v33  ;;  %1042 = vmatpush.msrb.mxu1 %v615_v34  ;;  %v599_v50 = vld [vmem:[%s1808_s29 + $0xb08] sm:$0xff]  ;;  %v368_v29 = vld [vmem:[%s1808_s29 + $0x3d0] sm:$0xff] }
  0xc0   : > { %1063 = vmatpush.msrb.mxu2 %v675_v35  ;;  %1082 = vmatpush.msrb.mxu3 %v743_v36  ;;  %v659_v51 = vld [vmem:[%s1808_s29 + $0xce8] sm:$0xff]  ;;  %v428_v30 = vld [vmem:[%s1808_s29 + $0x5b0] sm:$0xff] }
  0xc1   : > { %1024 = vmatpush.msrb.mxu0 %v543_v37  ;;  %1043 = vmatpush.msrb.mxu1 %v611_v38  ;;  %v727_v52 = vld [vmem:[%s1808_s29 + $0xf08] sm:$0xff]  ;;  %v496_v31 = vld [vmem:[%s1808_s29 + $0x7d0] sm:$0xff] }
  0xc2   : > { %1064 = vmatpush.msrb.mxu2 %v671_v39  ;;  %1083 = vmatpush.msrb.mxu3 %v739_v40  ;;  %v527_v53 = vld [vmem:[%s1808_s29 + $0x8c8] sm:$0xff]  ;;  %v364_v32 = vld [vmem:[%s1808_s29 + $0x3b0] sm:$0xff] }
  0xc3   : > { %1025 = vmatpush.msrb.mxu0 %v539_v41  ;;  %1044 = vmatpush.msrb.mxu1 %v607_v42  ;;  %v595_v54 = vld [vmem:[%s1808_s29 + $0xae8] sm:$0xff]  ;;  %v492_v33 = vld [vmem:[%s1808_s29 + $0x7b0] sm:$0xff] }
  0xc4   : > { %1065 = vmatpush.msrb.mxu2 %v667_v43  ;;  %1084 = vmatpush.msrb.mxu3 %v735_v44  ;;  %v655_v55 = vld [vmem:[%s1808_s29 + $0xcc8] sm:$0xff]  ;;  %v292_v34 = vld [vmem:[%s1808_s29 + $0x170] sm:$0xff] }
  0xc5   : > { %1026 = vmatpush.msrb.mxu0 %v535_v45  ;;  %1045 = vmatpush.msrb.mxu1 %v603_v46  ;;  %v723_v56 = vld [vmem:[%s1808_s29 + $0xee8] sm:$0xff]  ;;  %v360_v35 = vld [vmem:[%s1808_s29 + $0x390] sm:$0xff] }
  0xc6   : > { %1066 = vmatpush.msrb.mxu2 %v663_v47  ;;  %1085 = vmatpush.msrb.mxu3 %v731_v48  ;;  %v523_v57 = vld [vmem:[%s1808_s29 + $0x8a8] sm:$0xff]  ;;  %v420_v36 = vld [vmem:[%s1808_s29 + $0x570] sm:$0xff] }
  0xc7   : > { %1027 = vmatpush.msrb.mxu0 %v531_v49  ;;  %1046 = vmatpush.msrb.mxu1 %v599_v50  ;;  %v591_v58 = vld [vmem:[%s1808_s29 + $0xac8] sm:$0xff]  ;;  %v288_v37 = vld [vmem:[%s1808_s29 + $0x150] sm:$0xff] }
  0xc8   : > { %1067 = vmatpush.msrb.mxu2 %v659_v51  ;;  %1086 = vmatpush.msrb.mxu3 %v727_v52  ;;  %v651_v59 = vld [vmem:[%s1808_s29 + $0xca8] sm:$0xff]  ;;  %v356_v38 = vld [vmem:[%s1808_s29 + $0x370] sm:$0xff] }
  0xc9   : > { %1028 = vmatpush.msrb.mxu0 %v527_v53  ;;  %1047 = vmatpush.msrb.mxu1 %v595_v54  ;;  %v719_v60 = vld [vmem:[%s1808_s29 + $0xec8] sm:$0xff]  ;;  %v416_v39 = vld [vmem:[%s1808_s29 + $0x550] sm:$0xff] }
  0xca   : > { %1068 = vmatpush.msrb.mxu2 %v655_v55  ;;  %1087 = vmatpush.msrb.mxu3 %v723_v56  ;;  %v519_v62 = vld [vmem:[%s1808_s29 + $0x888] sm:$0xff]  ;;  %v484_v40 = vld [vmem:[%s1808_s29 + $0x770] sm:$0xff] }
  0xcb   : > { %v587_v63 = vld [vmem:[%s1808_s29 + $0xaa8] sm:$0xff]  ;;  %1029 = vmatpush.msrb.mxu0 %v523_v57  ;;  %1048 = vmatpush.msrb.mxu1 %v591_v58  ;;  %v284_v41 = vld [vmem:[%s1808_s29 + $0x130] sm:$0xff] }
  0xcc   : > { %v647_v0 = vld [vmem:[%s1808_s29 + $0xc88] sm:$0xff]  ;;  %1069 = vmatpush.msrb.mxu2 %v651_v59  ;;  %1088 = vmatpush.msrb.mxu3 %v719_v60  ;;  %v352_v42 = vld [vmem:[%s1808_s29 + $0x350] sm:$0xff] }
  0xcd   : > { %v715_v1 = vld [vmem:[%s1808_s29 + $0xea8] sm:$0xff]  ;;  %1030 = vmatpush.msrb.mxu0 %v519_v62  ;;  %1049 = vmatpush.msrb.mxu1 %v587_v63  ;;  %v412_v43 = vld [vmem:[%s1808_s29 + $0x530] sm:$0xff] }
  0xce   : > { %v515_v4 = vld [vmem:[%s1808_s29 + $0x868] sm:$0xff]  ;;  %1070 = vmatpush.msrb.mxu2 %v647_v0  ;;  %1089 = vmatpush.msrb.mxu3 %v715_v1  ;;  %v480_v44 = vld [vmem:[%s1808_s29 + $0x750] sm:$0xff] }
  0xcf   : > { %v583_v5 = vld [vmem:[%s1808_s29 + $0xa88] sm:$0xff]  ;;  %995 = vmatmul.f32.vlgmr.msra.gmra.mxu2 %v1935_v61  ;;  %1031 = vmatpush.msrb.mxu0 %v515_v4  ;;  %v280_v45 = vld [vmem:[%s1808_s29 + $0x110] sm:$0xff] }
  0xd0   : > { %v643_v6 = vld [vmem:[%s1808_s29 + $0xc68] sm:$0xff]  ;;  %1050 = vmatpush.msrb.mxu1 %v583_v5  ;;  %955 = vmatmul.f32.vlgmr.msra.gmra.mxu0 %v1941_v2  ;;  %v348_v46 = vld [vmem:[%s1808_s29 + $0x330] sm:$0xff] }
  0xd1   : > { %v711_v7 = vld [vmem:[%s1808_s29 + $0xe88] sm:$0xff]  ;;  %1071 = vmatpush.msrb.mxu2 %v643_v6  ;;  %1015 = vmatmul.f32.vlgmr.msra.gmra.mxu3 %v1944_v3  ;;  %v408_v47 = vld [vmem:[%s1808_s29 + $0x510] sm:$0xff] }
  0xd2   : > { %v511_v9 = vld [vmem:[%s1808_s29 + $0x848] sm:$0xff]  ;;  %1090 = vmatpush.msrb.mxu3 %v711_v7  ;;  %975 = vmatmul.f32.vlgmr.msra.gmra.mxu1 %v1951_v8  ;;  %v476_v48 = vld [vmem:[%s1808_s29 + $0x730] sm:$0xff] }
  0xd3   : > { %v579_v10 = vld [vmem:[%s1808_s29 + $0xa68] sm:$0xff]  ;;  %1032 = vmatpush.msrb.mxu0 %v511_v9  ;;  %v276_v49 = vld [vmem:[%s1808_s29 + $0xf0] sm:$0xff] }
  0xd4   : > { %v639_v11 = vld [vmem:[%s1808_s29 + $0xc48] sm:$0xff]  ;;  %1051 = vmatpush.msrb.mxu1 %v579_v10  ;;  %v344_v50 = vld [vmem:[%s1808_s29 + $0x310] sm:$0xff] }
  0xd5   : > { %v707_v12 = vld [vmem:[%s1808_s29 + $0xe68] sm:$0xff]  ;;  %1072 = vmatpush.msrb.mxu2 %v639_v11  ;;  %v404_v51 = vld [vmem:[%s1808_s29 + $0x4f0] sm:$0xff] }
  0xd6   : > { %v507_v61 = vld [vmem:[%s1808_s29 + $0x828] sm:$0xff]  ;;  %1091 = vmatpush.msrb.mxu3 %v707_v12  ;;  %v472_v52 = vld [vmem:[%s1808_s29 + $0x710] sm:$0xff] }
  0xd7   : > { %v575_v13 = vld [vmem:[%s1808_s29 + $0xa48] sm:$0xff]  ;;  %1033 = vmatpush.msrb.mxu0 %v507_v61  ;;  %v272_v53 = vld [vmem:[%s1808_s29 + $0xd0] sm:$0xff] }
  0xd8   : > { %v635_v14 = vld [vmem:[%s1808_s29 + $0xc28] sm:$0xff]  ;;  %1052 = vmatpush.msrb.mxu1 %v575_v13  ;;  %v340_v54 = vld [vmem:[%s1808_s29 + $0x2f0] sm:$0xff] }
  0xd9   : > { %v703_v15 = vld [vmem:[%s1808_s29 + $0xe48] sm:$0xff]  ;;  %1073 = vmatpush.msrb.mxu2 %v635_v14  ;;  %v400_v55 = vld [vmem:[%s1808_s29 + $0x4d0] sm:$0xff] }
  0xda   : > { %v503_v2 = vld [vmem:[%s1808_s29 + $0x808] sm:$0xff]  ;;  %1092 = vmatpush.msrb.mxu3 %v703_v15  ;;  %v468_v56 = vld [vmem:[%s1808_s29 + $0x6f0] sm:$0xff] }
  0xdb   : > { %v571_v16 = vld [vmem:[%s1808_s29 + $0xa28] sm:$0xff]  ;;  %1034 = vmatpush.msrb.mxu0 %v503_v2  ;;  %v268_v57 = vld [vmem:[%s1808_s29 + $0xb0] sm:$0xff] }
  0xdc   : > { %v631_v3 = vld [vmem:[%s1808_s29 + $0xc08] sm:$0xff]  ;;  %1053 = vmatpush.msrb.mxu1 %v571_v16  ;;  %1035 = vmatmul.f32.vlgmr.msrb.gmra.mxu0 %v1969_v22  ;;  %v296_v22 = vld [vmem:[%s1808_s29 + $0x190] sm:$0xff] }
  0xdd   : > { %v699_v18 = vld [vmem:[%s1808_s29 + $0xe28] sm:$0xff]  ;;  %1074 = vmatpush.msrb.mxu2 %v631_v3  ;;  %1099 = vmatpush.msra.mxu0 %v308_v19  ;;  %v336_v58 = vld [vmem:[%s1808_s29 + $0x2d0] sm:$0xff] }
  0xde   : > { %v567_v21 = vld [vmem:[%s1808_s29 + $0xa08] sm:$0xff]  ;;  %1093 = vmatpush.msrb.mxu3 %v699_v18  ;;  %1075 = vmatmul.f32.vlgmr.msrb.gmra.mxu2 %v1963_v17  ;;  %v300_v17 = vld [vmem:[%s1808_s29 + $0x1b0] sm:$0xff] }
  0xdf   : > { %v695_v8 = vld [vmem:[%s1808_s29 + $0xe08] sm:$0xff]  ;;  %1139 = vmatpush.msra.mxu2 %v436_v20  ;;  %1054 = vmatpush.msrb.mxu1 %v567_v21  ;;  %v396_v59 = vld [vmem:[%s1808_s29 + $0x4b0] sm:$0xff] }
  0xe0   : > { %1094 = vmatpush.msrb.mxu3 %v695_v8  ;;  %1100 = vmatpush.msra.mxu0 %v304_v24  ;;  %v464_v60 = vld [vmem:[%s1808_s29 + $0x6d0] sm:$0xff] }
  0xe1   : > { %1095 = vmatmul.f32.vlgmr.msrb.gmra.mxu3 %v1972_v23  ;;  %1119 = vmatpush.msra.mxu1 %v372_v25  ;;  %v424_v23 = vld [vmem:[%s1808_s29 + $0x590] sm:$0xff] }
  0xe2   : > { %1140 = vmatpush.msra.mxu2 %v432_v26  ;;  %1159 = vmatpush.msra.mxu3 %v500_v27  ;;  %v264_v62 = vld [vmem:[%s1808_s29 + $0x90] sm:$0xff] }
  0xe3   : > { %1055 = vmatmul.f32.vlgmr.msrb.gmra.mxu1 %v1979_v28  ;;  %1101 = vmatpush.msra.mxu0 %v300_v17  ;;  %v488_v28 = vld [vmem:[%s1808_s29 + $0x790] sm:$0xff] }
  0xe4   : > { %1120 = vmatpush.msra.mxu1 %v368_v29  ;;  %1141 = vmatpush.msra.mxu2 %v428_v30  ;;  %v332_v63 = vld [vmem:[%s1808_s29 + $0x2b0] sm:$0xff] }
  0xe5   : > { %1160 = vmatpush.msra.mxu3 %v496_v31  ;;  %1102 = vmatpush.msra.mxu0 %v296_v22  ;;  %v392_v0 = vld [vmem:[%s1808_s29 + $0x490] sm:$0xff] }
  0xe6   : > { %1121 = vmatpush.msra.mxu1 %v364_v32  ;;  %1142 = vmatpush.msra.mxu2 %v424_v23  ;;  %v460_v1 = vld [vmem:[%s1808_s29 + $0x6b0] sm:$0xff] }
  0xe7   : > { %1161 = vmatpush.msra.mxu3 %v492_v33  ;;  %1103 = vmatpush.msra.mxu0 %v292_v34  ;;  %v260_v4 = vld [vmem:[%s1808_s29 + $0x70] sm:$0xff] }
  0xe8   : > { %1122 = vmatpush.msra.mxu1 %v360_v35  ;;  %1143 = vmatpush.msra.mxu2 %v420_v36  ;;  %v328_v5 = vld [vmem:[%s1808_s29 + $0x290] sm:$0xff] }
  0xe9   : > { %1162 = vmatpush.msra.mxu3 %v488_v28  ;;  %1104 = vmatpush.msra.mxu0 %v288_v37  ;;  %v388_v6 = vld [vmem:[%s1808_s29 + $0x470] sm:$0xff] }
  0xea   : > { %1123 = vmatpush.msra.mxu1 %v356_v38  ;;  %1144 = vmatpush.msra.mxu2 %v416_v39  ;;  %v456_v7 = vld [vmem:[%s1808_s29 + $0x690] sm:$0xff] }
  0xeb   : > { %1163 = vmatpush.msra.mxu3 %v484_v40  ;;  %1105 = vmatpush.msra.mxu0 %v284_v41  ;;  %v256_v9 = vld [vmem:[%s1808_s29 + $0x50] sm:$0xff] }
  0xec   : > { %1124 = vmatpush.msra.mxu1 %v352_v42  ;;  %1145 = vmatpush.msra.mxu2 %v412_v43  ;;  %v324_v10 = vld [vmem:[%s1808_s29 + $0x270] sm:$0xff] }
  0xed   : > { %1164 = vmatpush.msra.mxu3 %v480_v44  ;;  %1106 = vmatpush.msra.mxu0 %v280_v45  ;;  %v384_v11 = vld [vmem:[%s1808_s29 + $0x450] sm:$0xff] }
  0xee   : > { %1125 = vmatpush.msra.mxu1 %v348_v46  ;;  %1146 = vmatpush.msra.mxu2 %v408_v47  ;;  %v452_v12 = vld [vmem:[%s1808_s29 + $0x670] sm:$0xff] }
  0xef   : > { %1165 = vmatpush.msra.mxu3 %v476_v48  ;;  %1107 = vmatpush.msra.mxu0 %v276_v49  ;;  %v252_v61 = vld [vmem:[%s1808_s29 + $0x30] sm:$0xff] }
  0xf0   : > { %1126 = vmatpush.msra.mxu1 %v344_v50  ;;  %1147 = vmatpush.msra.mxu2 %v404_v51  ;;  %v320_v13 = vld [vmem:[%s1808_s29 + $0x250] sm:$0xff] }
  0xf1   : > { %1166 = vmatpush.msra.mxu3 %v472_v52  ;;  %1108 = vmatpush.msra.mxu0 %v272_v53  ;;  %v380_v14 = vld [vmem:[%s1808_s29 + $0x430] sm:$0xff] }
  0xf2   : > { %1127 = vmatpush.msra.mxu1 %v340_v54  ;;  %1148 = vmatpush.msra.mxu2 %v400_v55  ;;  %v448_v15 = vld [vmem:[%s1808_s29 + $0x650] sm:$0xff] }
  0xf3   : > { %1167 = vmatpush.msra.mxu3 %v468_v56  ;;  %1109 = vmatpush.msra.mxu0 %v268_v57  ;;  %v248_v2 = vld [vmem:[%s1808_s29 + $0x10] sm:$0xff] }
  0xf4   : > { %1128 = vmatpush.msra.mxu1 %v336_v58  ;;  %1149 = vmatpush.msra.mxu2 %v396_v59  ;;  %v316_v16 = vld [vmem:[%s1808_s29 + $0x230] sm:$0xff] }
  0xf5   : > { %1168 = vmatpush.msra.mxu3 %v464_v60  ;;  %1110 = vmatpush.msra.mxu0 %v264_v62  ;;  %v376_v3 = vld [vmem:[%s1808_s29 + $0x410] sm:$0xff] }
  0xf6   : > { %1129 = vmatpush.msra.mxu1 %v332_v63  ;;  %1150 = vmatpush.msra.mxu2 %v392_v0  ;;  %v444_v18 = vld [vmem:[%s1808_s29 + $0x630] sm:$0xff] }
  0xf7   : > { %1169 = vmatpush.msra.mxu3 %v460_v1  ;;  %1111 = vmatpush.msra.mxu0 %v260_v4  ;;  %v564_v19 = vld [vmem:[%s1808_s29 + $0x9f0] sm:$0xff] }
  0xf8   : > { %1130 = vmatpush.msra.mxu1 %v328_v5  ;;  %1151 = vmatpush.msra.mxu2 %v388_v6  ;;  %v692_v20 = vld [vmem:[%s1808_s29 + $0xdf0] sm:$0xff] }
  0xf9   : > { %1170 = vmatpush.msra.mxu3 %v456_v7  ;;  %1112 = vmatpush.msra.mxu0 %v256_v9  ;;  %v312_v21 = vld [vmem:[%s1808_s29 + $0x210] sm:$0xff] }
  0xfa   : > { %1131 = vmatpush.msra.mxu1 %v324_v10  ;;  %1152 = vmatpush.msra.mxu2 %v384_v11  ;;  %v440_v8 = vld [vmem:[%s1808_s29 + $0x610] sm:$0xff] }
  0xfb   : > { %1171 = vmatpush.msra.mxu3 %v452_v12  ;;  %1113 = vmatpush.msra.mxu0 %v252_v61  ;;  %v560_v24 = vld [vmem:[%s1808_s29 + $0x9d0] sm:$0xff] }
  0xfc   : > { %1132 = vmatpush.msra.mxu1 %v320_v13  ;;  %1153 = vmatpush.msra.mxu2 %v380_v14  ;;  %v628_v25 = vld [vmem:[%s1808_s29 + $0xbf0] sm:$0xff] }
  0xfd   : > { %1172 = vmatpush.msra.mxu3 %v448_v15  ;;  %1114 = vmatpush.msra.mxu0 %v248_v2  ;;  %v688_v26 = vld [vmem:[%s1808_s29 + $0xdd0] sm:$0xff] }
  0xfe   : > { %1133 = vmatpush.msra.mxu1 %v316_v16  ;;  %1154 = vmatpush.msra.mxu2 %v376_v3  ;;  %v756_v27 = vld [vmem:[%s1808_s29 + $0xff0] sm:$0xff] }
  0xff   : > { %1173 = vmatpush.msra.mxu3 %v444_v18  ;;  %1179 = vmatpush.msrb.mxu0 %v564_v19  ;;  %v556_v17 = vld [vmem:[%s1808_s29 + $0x9b0] sm:$0xff] }
 0x100   : > { %1219 = vmatpush.msrb.mxu2 %v692_v20  ;;  %1134 = vmatpush.msra.mxu1 %v312_v21  ;;  %v624_v29 = vld [vmem:[%s1808_s29 + $0xbd0] sm:$0xff]  ;;  %v309_v20 = vld [vmem:[%s1808_s29 + $0x1f8] sm:$0xff] }
 0x101   : > { %1174 = vmatpush.msra.mxu3 %v440_v8  ;;  %1180 = vmatpush.msrb.mxu0 %v560_v24  ;;  %v684_v30 = vld [vmem:[%s1808_s29 + $0xdb0] sm:$0xff]  ;;  %v437_v21 = vld [vmem:[%s1808_s29 + $0x5f8] sm:$0xff]  ;;  %v2233_v24 = vld.sshfl [vmem:[#allocation1] sm:$0xff pattern:$0x73625140] }
 0x102   : > { %1199 = vmatpush.msrb.mxu1 %v628_v25  ;;  %v752_v31 = vld [vmem:[%s1808_s29 + $0xfd0] sm:$0xff]  ;;  %1220 = vmatpush.msrb.mxu2 %v688_v26  ;;  %v2237_v26 = vld.sshfl [vmem:[#allocation1 + $0x18] sm:$0xff pattern:$0x73625140] }
 0x103   : > { %1239 = vmatpush.msrb.mxu3 %v756_v27  ;;  %v552_v22 = vld [vmem:[%s1808_s29 + $0x990] sm:$0xff]  ;;  %1181 = vmatpush.msrb.mxu0 %v556_v17  ;;  %v305_v27 = vld [vmem:[%s1808_s29 + $0x1d8] sm:$0xff] }
 0x104   : > { %v620_v32 = vld [vmem:[%s1808_s29 + $0xbb0] sm:$0xff]  ;;  %1200 = vmatpush.msrb.mxu1 %v624_v29  ;;  %1221 = vmatpush.msrb.mxu2 %v684_v30  ;;  %v373_v17 = vld [vmem:[%s1808_s29 + $0x3f8] sm:$0xff] }
 0x105   : > { %v680_v23 = vld [vmem:[%s1808_s29 + $0xd90] sm:$0xff]  ;;  %1240 = vmatpush.msrb.mxu3 %v752_v31  ;;  %1182 = vmatpush.msrb.mxu0 %v552_v22  ;;  %v433_v29 = vld [vmem:[%s1808_s29 + $0x5d8] sm:$0xff]  ;;  %v2244_v31 = vld.sshfl [vmem:[#allocation1 + $0x8] sm:$0xff pattern:$0x73625140] }
 0x106   : > { %v748_v33 = vld [vmem:[%s1808_s29 + $0xfb0] sm:$0xff]  ;;  %1201 = vmatpush.msrb.mxu1 %v620_v32  ;;  %1222 = vmatpush.msrb.mxu2 %v680_v23  ;;  %v501_v30 = vld [vmem:[%s1808_s29 + $0x7f8] sm:$0xff] }
 0x107   : > { %v548_v34 = vld [vmem:[%s1808_s29 + $0x970] sm:$0xff]  ;;  %1241 = vmatpush.msrb.mxu3 %v748_v33  ;;  %1115 = vmatmul.f32.vlgmr.msra.gmra.mxu0 %v2233_v24  ;;  %v301_v22 = vld [vmem:[%s1808_s29 + $0x1b8] sm:$0xff] }
 0x108   : > { %v616_v35 = vld [vmem:[%s1808_s29 + $0xb90] sm:$0xff]  ;;  %1183 = vmatpush.msrb.mxu0 %v548_v34  ;;  %1175 = vmatmul.f32.vlgmr.msra.gmra.mxu3 %v2237_v26  ;;  %v369_v32 = vld [vmem:[%s1808_s29 + $0x3d8] sm:$0xff] }
 0x109   : > { %v676_v36 = vld [vmem:[%s1808_s29 + $0xd70] sm:$0xff]  ;;  %1202 = vmatpush.msrb.mxu1 %v616_v35  ;;  %v429_v23 = vld [vmem:[%s1808_s29 + $0x5b8] sm:$0xff] }
 0x10a   : > { %v744_v28 = vld [vmem:[%s1808_s29 + $0xf90] sm:$0xff]  ;;  %1223 = vmatpush.msrb.mxu2 %v676_v36  ;;  %1135 = vmatmul.f32.vlgmr.msra.gmra.mxu1 %v2244_v31  ;;  %v497_v33 = vld [vmem:[%s1808_s29 + $0x7d8] sm:$0xff] }
 0x10b   : > { %v544_v37 = vld [vmem:[%s1808_s29 + $0x950] sm:$0xff]  ;;  %1242 = vmatpush.msrb.mxu3 %v744_v28  ;;  %v297_v34 = vld [vmem:[%s1808_s29 + $0x198] sm:$0xff] }
 0x10c   : > { %v612_v38 = vld [vmem:[%s1808_s29 + $0xb70] sm:$0xff]  ;;  %1184 = vmatpush.msrb.mxu0 %v544_v37  ;;  %v365_v35 = vld [vmem:[%s1808_s29 + $0x3b8] sm:$0xff] }
 0x10d   : > { %v672_v39 = vld [vmem:[%s1808_s29 + $0xd50] sm:$0xff]  ;;  %1203 = vmatpush.msrb.mxu1 %v612_v38  ;;  %v425_v36 = vld [vmem:[%s1808_s29 + $0x598] sm:$0xff] }
 0x10e   : > { %v740_v40 = vld [vmem:[%s1808_s29 + $0xf70] sm:$0xff]  ;;  %1224 = vmatpush.msrb.mxu2 %v672_v39  ;;  %v493_v28 = vld [vmem:[%s1808_s29 + $0x7b8] sm:$0xff] }
 0x10f   : > { %v540_v41 = vld [vmem:[%s1808_s29 + $0x930] sm:$0xff]  ;;  %1243 = vmatpush.msrb.mxu3 %v740_v40  ;;  %v293_v38 = vld [vmem:[%s1808_s29 + $0x178] sm:$0xff] }
 0x110   : > { %v608_v42 = vld [vmem:[%s1808_s29 + $0xb50] sm:$0xff]  ;;  %1185 = vmatpush.msrb.mxu0 %v540_v41  ;;  %v361_v39 = vld [vmem:[%s1808_s29 + $0x398] sm:$0xff]  ;;  %v2261_v41 = vld.sshfl [vmem:[#allocation1 + $0x20] sm:$0xff pattern:$0x73625140] }
 0x111   : > { %v668_v43 = vld [vmem:[%s1808_s29 + $0xd30] sm:$0xff]  ;;  %1204 = vmatpush.msrb.mxu1 %v608_v42  ;;  %v421_v40 = vld [vmem:[%s1808_s29 + $0x578] sm:$0xff] }
 0x112   : > { %v736_v44 = vld [vmem:[%s1808_s29 + $0xf50] sm:$0xff]  ;;  %1225 = vmatpush.msrb.mxu2 %v668_v43  ;;  %v489_v42 = vld [vmem:[%s1808_s29 + $0x798] sm:$0xff] }
 0x113   : > { %v536_v45 = vld [vmem:[%s1808_s29 + $0x910] sm:$0xff]  ;;  %1244 = vmatpush.msrb.mxu3 %v736_v44  ;;  %v2265_v43 = vld.sshfl [vmem:[#allocation1 + $0x38] sm:$0xff pattern:$0x73625140] }
 0x114   : > { %v604_v46 = vld [vmem:[%s1808_s29 + $0xb30] sm:$0xff]  ;;  %1186 = vmatpush.msrb.mxu0 %v536_v45  ;;  %v289_v44 = vld [vmem:[%s1808_s29 + $0x158] sm:$0xff] }
 0x115   : > { %v664_v47 = vld [vmem:[%s1808_s29 + $0xd10] sm:$0xff]  ;;  %1205 = vmatpush.msrb.mxu1 %v604_v46  ;;  %v357_v45 = vld [vmem:[%s1808_s29 + $0x378] sm:$0xff] }
 0x116   : > { %v732_v48 = vld [vmem:[%s1808_s29 + $0xf30] sm:$0xff]  ;;  %1226 = vmatpush.msrb.mxu2 %v664_v47  ;;  %v417_v46 = vld [vmem:[%s1808_s29 + $0x558] sm:$0xff] }
 0x117   : > { %v532_v49 = vld [vmem:[%s1808_s29 + $0x8f0] sm:$0xff]  ;;  %1245 = vmatpush.msrb.mxu3 %v732_v48  ;;  %v485_v47 = vld [vmem:[%s1808_s29 + $0x778] sm:$0xff]  ;;  %v2272_v48 = vld.sshfl [vmem:[#allocation1 + $0x28] sm:$0xff pattern:$0x73625140] }
 0x118   : > { %v600_v50 = vld [vmem:[%s1808_s29 + $0xb10] sm:$0xff]  ;;  %1187 = vmatpush.msrb.mxu0 %v532_v49  ;;  %v285_v49 = vld [vmem:[%s1808_s29 + $0x138] sm:$0xff] }
 0x119   : > { %v660_v51 = vld [vmem:[%s1808_s29 + $0xcf0] sm:$0xff]  ;;  %1206 = vmatpush.msrb.mxu1 %v600_v50  ;;  %v353_v50 = vld [vmem:[%s1808_s29 + $0x358] sm:$0xff] }
 0x11a   : > { %v728_v52 = vld [vmem:[%s1808_s29 + $0xf10] sm:$0xff]  ;;  %1227 = vmatpush.msrb.mxu2 %v660_v51  ;;  %v413_v51 = vld [vmem:[%s1808_s29 + $0x538] sm:$0xff] }
 0x11b   : > { %v528_v53 = vld [vmem:[%s1808_s29 + $0x8d0] sm:$0xff]  ;;  %1246 = vmatpush.msrb.mxu3 %v728_v52  ;;  %v481_v52 = vld [vmem:[%s1808_s29 + $0x758] sm:$0xff] }
 0x11c   : > { %v596_v54 = vld [vmem:[%s1808_s29 + $0xaf0] sm:$0xff]  ;;  %1188 = vmatpush.msrb.mxu0 %v528_v53  ;;  %v281_v53 = vld [vmem:[%s1808_s29 + $0x118] sm:$0xff] }
 0x11d   : > { %v656_v55 = vld [vmem:[%s1808_s29 + $0xcd0] sm:$0xff]  ;;  %1207 = vmatpush.msrb.mxu1 %v596_v54  ;;  %v349_v54 = vld [vmem:[%s1808_s29 + $0x338] sm:$0xff] }
 0x11e   : > { %v724_v56 = vld [vmem:[%s1808_s29 + $0xef0] sm:$0xff]  ;;  %1228 = vmatpush.msrb.mxu2 %v656_v55  ;;  %v409_v55 = vld [vmem:[%s1808_s29 + $0x518] sm:$0xff] }
 0x11f   : > { %v524_v57 = vld [vmem:[%s1808_s29 + $0x8b0] sm:$0xff]  ;;  %1247 = vmatpush.msrb.mxu3 %v724_v56  ;;  %v477_v56 = vld [vmem:[%s1808_s29 + $0x738] sm:$0xff] }
 0x120   : > { %v592_v58 = vld [vmem:[%s1808_s29 + $0xad0] sm:$0xff]  ;;  %1189 = vmatpush.msrb.mxu0 %v524_v57  ;;  %v277_v57 = vld [vmem:[%s1808_s29 + $0xf8] sm:$0xff] }
 0x121   : > { %v652_v59 = vld [vmem:[%s1808_s29 + $0xcb0] sm:$0xff]  ;;  %1208 = vmatpush.msrb.mxu1 %v592_v58  ;;  %v345_v58 = vld [vmem:[%s1808_s29 + $0x318] sm:$0xff] }
 0x122   : > { %v720_v60 = vld [vmem:[%s1808_s29 + $0xed0] sm:$0xff]  ;;  %1229 = vmatpush.msrb.mxu2 %v652_v59  ;;  %v405_v59 = vld [vmem:[%s1808_s29 + $0x4f8] sm:$0xff] }
 0x123   : > { %v520_v62 = vld [vmem:[%s1808_s29 + $0x890] sm:$0xff]  ;;  %1248 = vmatpush.msrb.mxu3 %v720_v60  ;;  %v473_v60 = vld [vmem:[%s1808_s29 + $0x718] sm:$0xff] }
 0x124   : > { %v588_v63 = vld [vmem:[%s1808_s29 + $0xab0] sm:$0xff]  ;;  %1190 = vmatpush.msrb.mxu0 %v520_v62  ;;  %v273_v62 = vld [vmem:[%s1808_s29 + $0xd8] sm:$0xff] }
 0x125   : > { %v648_v0 = vld [vmem:[%s1808_s29 + $0xc90] sm:$0xff]  ;;  %1209 = vmatpush.msrb.mxu1 %v588_v63  ;;  %v341_v63 = vld [vmem:[%s1808_s29 + $0x2f8] sm:$0xff] }
 0x126   : > { %v716_v1 = vld [vmem:[%s1808_s29 + $0xeb0] sm:$0xff]  ;;  %1230 = vmatpush.msrb.mxu2 %v648_v0  ;;  %v401_v0 = vld [vmem:[%s1808_s29 + $0x4d8] sm:$0xff] }
 0x127   : > { %v516_v4 = vld [vmem:[%s1808_s29 + $0x870] sm:$0xff]  ;;  %1249 = vmatpush.msrb.mxu3 %v716_v1  ;;  %v469_v1 = vld [vmem:[%s1808_s29 + $0x6f8] sm:$0xff] }
 0x128   : > { %v584_v5 = vld [vmem:[%s1808_s29 + $0xa90] sm:$0xff]  ;;  %1191 = vmatpush.msrb.mxu0 %v516_v4  ;;  %v269_v4 = vld [vmem:[%s1808_s29 + $0xb8] sm:$0xff] }
 0x129   : > { %v644_v6 = vld [vmem:[%s1808_s29 + $0xc70] sm:$0xff]  ;;  %1210 = vmatpush.msrb.mxu1 %v584_v5  ;;  %v337_v5 = vld [vmem:[%s1808_s29 + $0x2d8] sm:$0xff] }
 0x12a   : > { %v712_v7 = vld [vmem:[%s1808_s29 + $0xe90] sm:$0xff]  ;;  %1231 = vmatpush.msrb.mxu2 %v644_v6  ;;  %v397_v6 = vld [vmem:[%s1808_s29 + $0x4b8] sm:$0xff] }
 0x12b   : > { %v512_v9 = vld [vmem:[%s1808_s29 + $0x850] sm:$0xff]  ;;  %1250 = vmatpush.msrb.mxu3 %v712_v7  ;;  %v465_v7 = vld [vmem:[%s1808_s29 + $0x6d8] sm:$0xff] }
 0x12c   : > { %v580_v10 = vld [vmem:[%s1808_s29 + $0xa70] sm:$0xff]  ;;  %1192 = vmatpush.msrb.mxu0 %v512_v9  ;;  %v265_v9 = vld [vmem:[%s1808_s29 + $0x98] sm:$0xff] }
 0x12d   : > { %v640_v11 = vld [vmem:[%s1808_s29 + $0xc50] sm:$0xff]  ;;  %1211 = vmatpush.msrb.mxu1 %v580_v10  ;;  %v333_v10 = vld [vmem:[%s1808_s29 + $0x2b8] sm:$0xff] }
 0x12e   : > { %v708_v12 = vld [vmem:[%s1808_s29 + $0xe70] sm:$0xff]  ;;  %1232 = vmatpush.msrb.mxu2 %v640_v11  ;;  %v393_v11 = vld [vmem:[%s1808_s29 + $0x498] sm:$0xff] }
 0x12f   : > { %v508_v61 = vld [vmem:[%s1808_s29 + $0x830] sm:$0xff]  ;;  %1251 = vmatpush.msrb.mxu3 %v708_v12  ;;  %v461_v12 = vld [vmem:[%s1808_s29 + $0x6b8] sm:$0xff] }
 0x130   : > { %v576_v13 = vld [vmem:[%s1808_s29 + $0xa50] sm:$0xff]  ;;  %1193 = vmatpush.msrb.mxu0 %v508_v61  ;;  %v261_v61 = vld [vmem:[%s1808_s29 + $0x78] sm:$0xff] }
 0x131   : > { %v636_v14 = vld [vmem:[%s1808_s29 + $0xc30] sm:$0xff]  ;;  %1212 = vmatpush.msrb.mxu1 %v576_v13  ;;  %v329_v13 = vld [vmem:[%s1808_s29 + $0x298] sm:$0xff] }
 0x132   : > { %v704_v15 = vld [vmem:[%s1808_s29 + $0xe50] sm:$0xff]  ;;  %1233 = vmatpush.msrb.mxu2 %v636_v14  ;;  %v389_v14 = vld [vmem:[%s1808_s29 + $0x478] sm:$0xff] }
 0x133   : > { %v504_v2 = vld [vmem:[%s1808_s29 + $0x810] sm:$0xff]  ;;  %1252 = vmatpush.msrb.mxu3 %v704_v15  ;;  %v457_v15 = vld [vmem:[%s1808_s29 + $0x698] sm:$0xff] }
 0x134   : > { %v572_v16 = vld [vmem:[%s1808_s29 + $0xa30] sm:$0xff]  ;;  %1194 = vmatpush.msrb.mxu0 %v504_v2  ;;  %v257_v2 = vld [vmem:[%s1808_s29 + $0x58] sm:$0xff] }
 0x135   : > { %v632_v3 = vld [vmem:[%s1808_s29 + $0xc10] sm:$0xff]  ;;  %1213 = vmatpush.msrb.mxu1 %v572_v16  ;;  %1195 = vmatmul.f32.vlgmr.msrb.gmra.mxu0 %v2261_v41  ;;  %v325_v16 = vld [vmem:[%s1808_s29 + $0x278] sm:$0xff] }
 0x136   : > { %v700_v18 = vld [vmem:[%s1808_s29 + $0xe30] sm:$0xff]  ;;  %1234 = vmatpush.msrb.mxu2 %v632_v3  ;;  %1259 = vmatpush.msra.mxu0 %v309_v20  ;;  %v385_v3 = vld [vmem:[%s1808_s29 + $0x458] sm:$0xff] }
 0x137   : > { %v2227_v19 = vld.sshfl [vmem:[#allocation1 + $0x10] sm:$0xff pattern:$0x73625140]  ;;  %1253 = vmatpush.msrb.mxu3 %v700_v18  ;;  %v453_v18 = vld [vmem:[%s1808_s29 + $0x678] sm:$0xff] }
 0x138   : > { %1155 = vmatmul.f32.vlgmr.msra.gmra.mxu2 %v2227_v19  ;;  %v568_v8 = vld [vmem:[%s1808_s29 + $0xa10] sm:$0xff]  ;;  %1260 = vmatpush.msra.mxu0 %v305_v27  ;;  %v253_v20 = vld [vmem:[%s1808_s29 + $0x38] sm:$0xff] }
 0x139   : > { %v696_v25 = vld [vmem:[%s1808_s29 + $0xe10] sm:$0xff]  ;;  %1299 = vmatpush.msra.mxu2 %v437_v21  ;;  %1214 = vmatpush.msrb.mxu1 %v568_v8  ;;  %v321_v21 = vld [vmem:[%s1808_s29 + $0x258] sm:$0xff] }
 0x13a   : > { %1254 = vmatpush.msrb.mxu3 %v696_v25  ;;  %1261 = vmatpush.msra.mxu0 %v301_v22  ;;  %v2255_v37 = vld.sshfl [vmem:[#allocation1 + $0x30] sm:$0xff pattern:$0x73625140]  ;;  %v381_v8 = vld [vmem:[%s1808_s29 + $0x438] sm:$0xff] }
 0x13b   : > { %1279 = vmatpush.msra.mxu1 %v373_v17  ;;  %1300 = vmatpush.msra.mxu2 %v433_v29  ;;  %v449_v25 = vld [vmem:[%s1808_s29 + $0x658] sm:$0xff] }
 0x13c   : > { %1319 = vmatpush.msra.mxu3 %v501_v30  ;;  %1262 = vmatpush.msra.mxu0 %v297_v34  ;;  %v249_v27 = vld [vmem:[%s1808_s29 + $0x18] sm:$0xff] }
 0x13d   : > { %1280 = vmatpush.msra.mxu1 %v369_v32  ;;  %1301 = vmatpush.msra.mxu2 %v429_v23  ;;  %v317_v17 = vld [vmem:[%s1808_s29 + $0x238] sm:$0xff] }
 0x13e   : > { %1320 = vmatpush.msra.mxu3 %v497_v33  ;;  %1263 = vmatpush.msra.mxu0 %v293_v38  ;;  %v377_v29 = vld [vmem:[%s1808_s29 + $0x418] sm:$0xff] }
 0x13f   : > { %1281 = vmatpush.msra.mxu1 %v365_v35  ;;  %1302 = vmatpush.msra.mxu2 %v425_v36  ;;  %v445_v30 = vld [vmem:[%s1808_s29 + $0x638] sm:$0xff] }
 0x140   : > { %1235 = vmatmul.f32.vlgmr.msrb.gmra.mxu2 %v2255_v37  ;;  %1321 = vmatpush.msra.mxu3 %v493_v28  ;;  %v565_v22 = vld [vmem:[%s1808_s29 + $0x9f8] sm:$0xff] }
 0x141   : > { %1255 = vmatmul.f32.vlgmr.msrb.gmra.mxu3 %v2265_v43  ;;  %1282 = vmatpush.msra.mxu1 %v361_v39  ;;  %v693_v32 = vld [vmem:[%s1808_s29 + $0xdf8] sm:$0xff] }
 0x142   : > { %1303 = vmatpush.msra.mxu2 %v421_v40  ;;  %1322 = vmatpush.msra.mxu3 %v489_v42  ;;  %v313_v23 = vld [vmem:[%s1808_s29 + $0x218] sm:$0xff] }
 0x143   : > { %1215 = vmatmul.f32.vlgmr.msrb.gmra.mxu1 %v2272_v48  ;;  %1264 = vmatpush.msra.mxu0 %v289_v44  ;;  %v441_v33 = vld [vmem:[%s1808_s29 + $0x618] sm:$0xff] }
 0x144   : > { %1283 = vmatpush.msra.mxu1 %v357_v45  ;;  %1304 = vmatpush.msra.mxu2 %v417_v46  ;;  %v561_v34 = vld [vmem:[%s1808_s29 + $0x9d8] sm:$0xff] }
 0x145   : > { %1323 = vmatpush.msra.mxu3 %v485_v47  ;;  %1265 = vmatpush.msra.mxu0 %v285_v49  ;;  %v629_v35 = vld [vmem:[%s1808_s29 + $0xbf8] sm:$0xff] }
 0x146   : > { %1284 = vmatpush.msra.mxu1 %v353_v50  ;;  %1305 = vmatpush.msra.mxu2 %v413_v51  ;;  %v689_v36 = vld [vmem:[%s1808_s29 + $0xdd8] sm:$0xff] }
 0x147   : > { %1324 = vmatpush.msra.mxu3 %v481_v52  ;;  %1266 = vmatpush.msra.mxu0 %v281_v53  ;;  %v757_v28 = vld [vmem:[%s1808_s29 + $0xff8] sm:$0xff] }
 0x148   : > { %1285 = vmatpush.msra.mxu1 %v349_v54  ;;  %1306 = vmatpush.msra.mxu2 %v409_v55  ;;  %v557_v38 = vld [vmem:[%s1808_s29 + $0x9b8] sm:$0xff] }
 0x149   : > { %1325 = vmatpush.msra.mxu3 %v477_v56  ;;  %1267 = vmatpush.msra.mxu0 %v277_v57  ;;  %v625_v39 = vld [vmem:[%s1808_s29 + $0xbd8] sm:$0xff] }
 0x14a   : > { %1286 = vmatpush.msra.mxu1 %v345_v58  ;;  %1307 = vmatpush.msra.mxu2 %v405_v59  ;;  %v685_v40 = vld [vmem:[%s1808_s29 + $0xdb8] sm:$0xff] }
 0x14b   : > { %1326 = vmatpush.msra.mxu3 %v473_v60  ;;  %1268 = vmatpush.msra.mxu0 %v273_v62  ;;  %v753_v42 = vld [vmem:[%s1808_s29 + $0xfd8] sm:$0xff] }
 0x14c   : > { %1287 = vmatpush.msra.mxu1 %v341_v63  ;;  %1308 = vmatpush.msra.mxu2 %v401_v0  ;;  %v553_v44 = vld [vmem:[%s1808_s29 + $0x998] sm:$0xff] }
 0x14d   : > { %1327 = vmatpush.msra.mxu3 %v469_v1  ;;  %1269 = vmatpush.msra.mxu0 %v269_v4  ;;  %v621_v45 = vld [vmem:[%s1808_s29 + $0xbb8] sm:$0xff] }
 0x14e   : > { %1288 = vmatpush.msra.mxu1 %v337_v5  ;;  %1309 = vmatpush.msra.mxu2 %v397_v6  ;;  %v681_v46 = vld [vmem:[%s1808_s29 + $0xd98] sm:$0xff] }
 0x14f   : > { %1328 = vmatpush.msra.mxu3 %v465_v7  ;;  %1270 = vmatpush.msra.mxu0 %v265_v9  ;;  %v749_v47 = vld [vmem:[%s1808_s29 + $0xfb8] sm:$0xff] }
 0x150   : > { %1289 = vmatpush.msra.mxu1 %v333_v10  ;;  %1310 = vmatpush.msra.mxu2 %v393_v11  ;;  %v549_v49 = vld [vmem:[%s1808_s29 + $0x978] sm:$0xff] }
 0x151   : > { %1329 = vmatpush.msra.mxu3 %v461_v12  ;;  %1271 = vmatpush.msra.mxu0 %v261_v61  ;;  %v617_v50 = vld [vmem:[%s1808_s29 + $0xb98] sm:$0xff] }
 0x152   : > { %1290 = vmatpush.msra.mxu1 %v329_v13  ;;  %1311 = vmatpush.msra.mxu2 %v389_v14  ;;  %v677_v51 = vld [vmem:[%s1808_s29 + $0xd78] sm:$0xff] }
 0x153   : > { %1330 = vmatpush.msra.mxu3 %v457_v15  ;;  %1272 = vmatpush.msra.mxu0 %v257_v2  ;;  %v745_v52 = vld [vmem:[%s1808_s29 + $0xf98] sm:$0xff] }
 0x154   : > { %1291 = vmatpush.msra.mxu1 %v325_v16  ;;  %1312 = vmatpush.msra.mxu2 %v385_v3  ;;  %v545_v53 = vld [vmem:[%s1808_s29 + $0x958] sm:$0xff] }
 0x155   : > { %1331 = vmatpush.msra.mxu3 %v453_v18  ;;  %1273 = vmatpush.msra.mxu0 %v253_v20  ;;  %v613_v54 = vld [vmem:[%s1808_s29 + $0xb78] sm:$0xff] }
 0x156   : > { %1292 = vmatpush.msra.mxu1 %v321_v21  ;;  %1313 = vmatpush.msra.mxu2 %v381_v8  ;;  %v673_v55 = vld [vmem:[%s1808_s29 + $0xd58] sm:$0xff] }
 0x157   : > { %1332 = vmatpush.msra.mxu3 %v449_v25  ;;  %1274 = vmatpush.msra.mxu0 %v249_v27  ;;  %v741_v56 = vld [vmem:[%s1808_s29 + $0xf78] sm:$0xff] }
 0x158   : > { %1293 = vmatpush.msra.mxu1 %v317_v17  ;;  %1314 = vmatpush.msra.mxu2 %v377_v29  ;;  %v541_v57 = vld [vmem:[%s1808_s29 + $0x938] sm:$0xff] }
 0x159   : > { %1333 = vmatpush.msra.mxu3 %v445_v30  ;;  %1339 = vmatpush.msrb.mxu0 %v565_v22  ;;  %v609_v58 = vld [vmem:[%s1808_s29 + $0xb58] sm:$0xff] }
 0x15a   : > { %1379 = vmatpush.msrb.mxu2 %v693_v32  ;;  %1294 = vmatpush.msra.mxu1 %v313_v23  ;;  %v669_v59 = vld [vmem:[%s1808_s29 + $0xd38] sm:$0xff] }
 0x15b   : > { %1334 = vmatpush.msra.mxu3 %v441_v33  ;;  %1340 = vmatpush.msrb.mxu0 %v561_v34  ;;  %v737_v60 = vld [vmem:[%s1808_s29 + $0xf58] sm:$0xff] }
 0x15c   : > { %1359 = vmatpush.msrb.mxu1 %v629_v35  ;;  %1380 = vmatpush.msrb.mxu2 %v689_v36  ;;  %v537_v62 = vld [vmem:[%s1808_s29 + $0x918] sm:$0xff]  ;;  %v796_v36 = vpop.f32.mrf.mxu0 }
 0x15d   : > { %1399 = vmatpush.msrb.mxu3 %v757_v28  ;;  %1341 = vmatpush.msrb.mxu0 %v557_v38  ;;  %v605_v63 = vld [vmem:[%s1808_s29 + $0xb38] sm:$0xff]  ;;  %v816_v28 = vpop.f32.mrf.mxu1  ;;  %v836_v38 = vpop.f32.mrf.mxu2 }
 0x15e   : > { %1360 = vmatpush.msrb.mxu1 %v625_v39  ;;  %1381 = vmatpush.msrb.mxu2 %v685_v40  ;;  %v665_v0 = vld [vmem:[%s1808_s29 + $0xd18] sm:$0xff]  ;;  %v856_v39 = vpop.f32.mrf.mxu3 }
 0x15f   : > { %1400 = vmatpush.msrb.mxu3 %v753_v42  ;;  %1342 = vmatpush.msrb.mxu0 %v553_v44  ;;  %v733_v1 = vld [vmem:[%s1808_s29 + $0xf38] sm:$0xff] }
 0x160   : > { %1361 = vmatpush.msrb.mxu1 %v621_v45  ;;  %1382 = vmatpush.msrb.mxu2 %v681_v46  ;;  %v533_v4 = vld [vmem:[%s1808_s29 + $0x8f8] sm:$0xff] }
 0x161   : > { %1401 = vmatpush.msrb.mxu3 %v749_v47  ;;  %1343 = vmatpush.msrb.mxu0 %v549_v49  ;;  %v601_v5 = vld [vmem:[%s1808_s29 + $0xb18] sm:$0xff] }
 0x162   : > { %1362 = vmatpush.msrb.mxu1 %v617_v50  ;;  %1383 = vmatpush.msrb.mxu2 %v677_v51  ;;  %v661_v6 = vld [vmem:[%s1808_s29 + $0xcf8] sm:$0xff] }
 0x163   : > { %1402 = vmatpush.msrb.mxu3 %v745_v52  ;;  %1344 = vmatpush.msrb.mxu0 %v545_v53  ;;  %v729_v7 = vld [vmem:[%s1808_s29 + $0xf18] sm:$0xff] }
 0x164   : > { %1363 = vmatpush.msrb.mxu1 %v613_v54  ;;  %1384 = vmatpush.msrb.mxu2 %v673_v55  ;;  %v529_v9 = vld [vmem:[%s1808_s29 + $0x8d8] sm:$0xff]  ;;  %v876_v40 = vpop.f32.mrf.mxu0 }
 0x165   : > { %1403 = vmatpush.msrb.mxu3 %v741_v56  ;;  %1345 = vmatpush.msrb.mxu0 %v541_v57  ;;  %v597_v10 = vld [vmem:[%s1808_s29 + $0xaf8] sm:$0xff]  ;;  %v896_v42 = vpop.f32.mrf.mxu1  ;;  %v916_v44 = vpop.f32.mrf.mxu2 }
 0x166   : > { %1364 = vmatpush.msrb.mxu1 %v609_v58  ;;  %1385 = vmatpush.msrb.mxu2 %v669_v59  ;;  %v657_v11 = vld [vmem:[%s1808_s29 + $0xcd8] sm:$0xff]  ;;  %v936_v45 = vpop.f32.mrf.mxu3 }
 0x167   : > { %1404 = vmatpush.msrb.mxu3 %v737_v60  ;;  %1346 = vmatpush.msrb.mxu0 %v537_v62  ;;  %v725_v12 = vld [vmem:[%s1808_s29 + $0xef8] sm:$0xff]  ;;  %v817_v62 = vadd.f32 %v816_v28, %v796_v36 }
 0x168   : > { %1365 = vmatpush.msrb.mxu1 %v605_v63  ;;  %1386 = vmatpush.msrb.mxu2 %v665_v0  ;;  %v525_v61 = vld [vmem:[%s1808_s29 + $0x8b8] sm:$0xff] }
 0x169   : > { %1405 = vmatpush.msrb.mxu3 %v733_v1  ;;  %1347 = vmatpush.msrb.mxu0 %v533_v4  ;;  %v593_v13 = vld [vmem:[%s1808_s29 + $0xad8] sm:$0xff] }
 0x16a   : > { %1366 = vmatpush.msrb.mxu1 %v601_v5  ;;  %1387 = vmatpush.msrb.mxu2 %v661_v6  ;;  %v653_v14 = vld [vmem:[%s1808_s29 + $0xcb8] sm:$0xff]  ;;  %v837_v5 = vadd.f32 %v836_v38, %v817_v62 }
 0x16b   : > { %1406 = vmatpush.msrb.mxu3 %v729_v7  ;;  %1348 = vmatpush.msrb.mxu0 %v529_v9  ;;  %v721_v15 = vld [vmem:[%s1808_s29 + $0xed8] sm:$0xff] }
 0x16c   : > { %1367 = vmatpush.msrb.mxu1 %v597_v10  ;;  %1388 = vmatpush.msrb.mxu2 %v657_v11  ;;  %v521_v2 = vld [vmem:[%s1808_s29 + $0x898] sm:$0xff]  ;;  %v956_v46 = vpop.f32.mrf.mxu0 }
 0x16d   : > { %1407 = vmatpush.msrb.mxu3 %v725_v12  ;;  %1349 = vmatpush.msrb.mxu0 %v525_v61  ;;  %v589_v16 = vld [vmem:[%s1808_s29 + $0xab8] sm:$0xff]  ;;  %v976_v47 = vpop.f32.mrf.mxu1  ;;  %v996_v49 = vpop.f32.mrf.mxu2  ;;  %v857_v12 = vadd.f32 %v856_v39, %v837_v5 }
 0x16e   : > { %1368 = vmatpush.msrb.mxu1 %v593_v13  ;;  %v649_v3 = vld [vmem:[%s1808_s29 + $0xc98] sm:$0xff]  ;;  %1389 = vmatpush.msrb.mxu2 %v653_v14  ;;  %v977_v55 = vadd.f32 %v976_v47, %v956_v46 }
 0x16f   : > { %1408 = vmatpush.msrb.mxu3 %v721_v15  ;;  %v717_v18 = vld [vmem:[%s1808_s29 + $0xeb8] sm:$0xff]  ;;  %1315 = vmatmul.f32.vlgmr.msra.gmra.mxu2 %v2227_v19 }
 0x170   : > { %1350 = vmatpush.msrb.mxu0 %v521_v2  ;;  %v517_v20 = vld [vmem:[%s1808_s29 + $0x878] sm:$0xff]  ;;  %1369 = vmatpush.msrb.mxu1 %v589_v16  ;;  %v997_v58 = vadd.f32 %v996_v49, %v977_v55  ;;  %v877_v16 = vadd.f32 %v876_v40, %v857_v12 }
 0x171   : > { %1390 = vmatpush.msrb.mxu2 %v649_v3  ;;  %v585_v21 = vld [vmem:[%s1808_s29 + $0xa98] sm:$0xff]  ;;  %1409 = vmatpush.msrb.mxu3 %v717_v18 }
 0x172   : > { %v645_v8 = vld [vmem:[%s1808_s29 + $0xc78] sm:$0xff]  ;;  %1275 = vmatmul.f32.vlgmr.msra.gmra.mxu0 %v2233_v24  ;;  %1335 = vmatmul.f32.vlgmr.msra.gmra.mxu3 %v2237_v26 }
 0x173   : > { %v713_v25 = vld [vmem:[%s1808_s29 + $0xe98] sm:$0xff]  ;;  %1351 = vmatpush.msrb.mxu0 %v517_v20  ;;  %1370 = vmatpush.msrb.mxu1 %v585_v21 }
 0x174   : > { %v513_v19 = vld [vmem:[%s1808_s29 + $0x858] sm:$0xff]  ;;  %1391 = vmatpush.msrb.mxu2 %v645_v8  ;;  %1410 = vmatpush.msrb.mxu3 %v713_v25  ;;  %v1036_v50 = vpop.f32.mrf.mxu0  ;;  %v897_v25 = vadd.f32 %v896_v42, %v877_v16 }
 0x175   : > { %v581_v27 = vld [vmem:[%s1808_s29 + $0xa78] sm:$0xff]  ;;  %1295 = vmatmul.f32.vlgmr.msra.gmra.mxu1 %v2244_v31  ;;  %1352 = vmatpush.msrb.mxu0 %v513_v19  ;;  %v1076_v51 = vpop.f32.mrf.mxu2 }
 0x176   : > { %v641_v17 = vld [vmem:[%s1808_s29 + $0xc58] sm:$0xff]  ;;  %1371 = vmatpush.msrb.mxu1 %v581_v27 }
 0x177   : > { %v709_v29 = vld [vmem:[%s1808_s29 + $0xe78] sm:$0xff]  ;;  %1392 = vmatpush.msrb.mxu2 %v641_v17 }
 0x178   : > { %v509_v24 = vld [vmem:[%s1808_s29 + $0x838] sm:$0xff]  ;;  %1411 = vmatpush.msrb.mxu3 %v709_v29 }
 0x179   : > { %v577_v30 = vld [vmem:[%s1808_s29 + $0xa58] sm:$0xff]  ;;  %1353 = vmatpush.msrb.mxu0 %v509_v24  ;;  %v917_v24 = vadd.f32 %v916_v44, %v897_v25 }
 0x17a   : > { %v637_v26 = vld [vmem:[%s1808_s29 + $0xc38] sm:$0xff]  ;;  %1372 = vmatpush.msrb.mxu1 %v577_v30 }
 0x17b   : > { %v705_v22 = vld [vmem:[%s1808_s29 + $0xe58] sm:$0xff]  ;;  %1393 = vmatpush.msrb.mxu2 %v637_v26 }
 0x17c   : > { %v505_v32 = vld [vmem:[%s1808_s29 + $0x818] sm:$0xff]  ;;  %1412 = vmatpush.msrb.mxu3 %v705_v22 }
 0x17d   : > { %v573_v23 = vld [vmem:[%s1808_s29 + $0xa38] sm:$0xff]  ;;  %1354 = vmatpush.msrb.mxu0 %v505_v32 }
 0x17e   : > { %v633_v33 = vld [vmem:[%s1808_s29 + $0xc18] sm:$0xff]  ;;  %1373 = vmatpush.msrb.mxu1 %v573_v23  ;;  %1355 = vmatmul.f32.vlgmr.msrb.gmra.mxu0 %v2261_v41  ;;  %v1016_v41 = vpop.f32.mrf.mxu3 }
 0x17f   : > { %v701_v34 = vld [vmem:[%s1808_s29 + $0xe38] sm:$0xff]  ;;  %1394 = vmatpush.msrb.mxu2 %v633_v33  ;;  %v1017_v0 = vadd.f32 %v1016_v41, %v997_v58  ;;  %v937_v33 = vadd.f32 %v936_v45, %v917_v24 }
 0x180   : > { %v569_v31 = vld [vmem:[%s1808_s29 + $0xa18] sm:$0xff]  ;;  %1413 = vmatpush.msrb.mxu3 %v701_v34  ;;  %1395 = vmatmul.f32.vlgmr.msrb.gmra.mxu2 %v2255_v37  ;;  %v1056_v37 = vpop.f32.mrf.mxu1 }
 0x181   : > { %v697_v35 = vld [vmem:[%s1808_s29 + $0xe18] sm:$0xff]  ;;  %1374 = vmatpush.msrb.mxu1 %v569_v31  ;;  %v1037_v7 = vadd.f32 %v1036_v50, %v1017_v0 }
 0x182   : > { %1414 = vmatpush.msrb.mxu3 %v697_v35  ;;  %1375 = vmatmul.f32.vlgmr.msrb.gmra.mxu1 %v2272_v48  ;;  %v243_v35 = vld [vmem:[#allocation2] sm:$0xff] }
 0x183   : > { %1415 = vmatmul.f32.vlgmr.msrb.gmra.mxu3 %v2265_v43  ;;  %v1057_v14 = vadd.f32 %v1056_v37, %v1037_v7 }
 0x184   : > { %v1116_v53 = vpop.f32.mrf.mxu0 }
 0x185   : > { %v1077_v20 = vadd.f32 %v1076_v51, %v1057_v14 }
 0x186   : > { %v1096_v52 = vpop.f32.mrf.mxu3 }
 0x187   : > { %v1097_v27 = vadd.f32 %v1096_v52, %v1077_v20 }
 0x188   : > { %v1136_v48 = vpop.f32.mrf.mxu1 }
 0x189   : > { %v1137_v57 = vadd.f32 %v1136_v48, %v1116_v53  ;;  %v1423_v32 = vrot.slane %v1097_v27, 6 }
 0x18b   : > { %v1427_v36 = vsel %vm1426_vm0, %v937_v33, %v1423_v32 }
 0x18e   : > { %v1176_v43 = vpop.f32.mrf.mxu3 }
 0x1b2   : > { %v1196_v56 = vpop.f32.mrf.mxu0 }
 0x1bb   : > { %v1156_v54 = vpop.f32.mrf.mxu2 }
 0x1bc   : > { %v1157_v63 = vadd.f32 %v1156_v54, %v1137_v57 }
 0x1be   : > { %v1177_v6 = vadd.f32 %v1176_v43, %v1157_v63 }
 0x1c0   : > { %v1216_v59 = vpop.f32.mrf.mxu1  ;;  %v1197_v61 = vadd.f32 %v1196_v56, %v1177_v6 }
 0x1c2   : > { %v1217_v3 = vadd.f32 %v1216_v59, %v1197_v61 }
 0x1c3   : > { %v1236_v60 = vpop.f32.mrf.mxu2 }
 0x1c4   : > { %v1256_v1 = vpop.f32.mrf.mxu3  ;;  %v1237_v19 = vadd.f32 %v1236_v60, %v1217_v3 }
 0x1c6   : > { %v1257_v30 = vadd.f32 %v1256_v1, %v1237_v19 }
 0x1c8   : > { %v1424_v34 = vrot.slane %v1257_v30, 4 }
 0x1ef   : > { %v1276_v4 = vpop.f32.mrf.mxu0 }
 0x1f2   : > { %v1296_v9 = vpop.f32.mrf.mxu1  ;;  %v1316_v11 = vpop.f32.mrf.mxu2 }
 0x1f3   : > { %v1297_v10 = vadd.f32 %v1296_v9, %v1276_v4 }
 0x1f5   : > { %v1317_v13 = vadd.f32 %v1316_v11, %v1297_v10  ;;  %v1336_v15 = vpop.f32.mrf.mxu3 }
 0x1f7   : > { %v1337_v2 = vadd.f32 %v1336_v15, %v1317_v13 }
 0x1fb   : > { %v1356_v18 = vpop.f32.mrf.mxu0 }
 0x1fc   : > { %v1357_v21 = vadd.f32 %v1356_v18, %v1337_v2 }
 0x1ff   : > { %v1376_v8 = vpop.f32.mrf.mxu1 }
 0x200   : > { %v1377_v17 = vadd.f32 %v1376_v8, %v1357_v21 }
 0x203   : > { %v1396_v29 = vpop.f32.mrf.mxu2 }
 0x204   : > { %v1397_v26 = vadd.f32 %v1396_v29, %v1377_v17 }
 0x206   : > { %v1416_v22 = vpop.f32.mrf.mxu3 }
 0x207   : > { %v1417_v23 = vadd.f32 %v1416_v22, %v1397_v26 }
 0x209   : > { %v1425_v31 = vrot.slane %v1417_v23, 2 }
 0x20b   : > { %v1429_v28 = vsel %vm1428_vm1, %v1424_v34, %v1425_v31  ;;  %1438 = sbr.rel (%p1685_p6) target bundleno = 699 (0x2bb), region = 48 }
 0x20c   : > { %v1431_v38 = vsel %vm1430_vm2, %v1427_v36, %v1429_v28 }
 0x20d   : > { %v1433_v39 = vadd.f32 %v1431_v38, %v243_v35 }
 0x20f   : > { %1434 = vst [vmem:[#allocation2] sm:$0xff] %v1433_v39 }
 0x210   : > { %v1502_v40 = vld [vmem:[%s2604_s3 + $0x178] sm:$0xff]  ;;  %v1501_v44 = vld [vmem:[%s2604_s3 + $0x170] sm:$0xff]  ;;  %v1500_v49 = vld [vmem:[%s2604_s3 + $0x168] sm:$0xff]  ;;  %vm1613_vm3 = vcmask 33792  }
 0x211   : > { %v1470_v42 = vld [vmem:[%s2604_s3 + $0x78] sm:$0xff]  ;;  %1573 = vmatpush.msra.mxu2 %v1502_v40  ;;  %v1469_v46 = vld [vmem:[%s2604_s3 + $0x70] sm:$0xff]  ;;  %v1468_v50 = vld [vmem:[%s2604_s3 + $0x68] sm:$0xff] }
 0x212   : > { %1533 = vmatpush.msra.mxu0 %v1470_v42  ;;  %v1518_v45 = vld [vmem:[%s2604_s3 + $0x1f8] sm:$0xff]  ;;  %v1517_v41 = vld [vmem:[%s2604_s3 + $0x1f0] sm:$0xff]  ;;  %v1516_v51 = vld [vmem:[%s2604_s3 + $0x1e8] sm:$0xff] }
 0x213   : > { %v1486_v47 = vld [vmem:[%s2604_s3 + $0xf8] sm:$0xff]  ;;  %1593 = vmatpush.msra.mxu3 %v1518_v45  ;;  %1574 = vmatpush.msra.mxu2 %v1501_v44  ;;  %v1485_v37 = vld [vmem:[%s2604_s3 + $0xf0] sm:$0xff]  ;;  %v1499_v52 = vld [vmem:[%s2604_s3 + $0x160] sm:$0xff] }
 0x214   : > { %1553 = vmatpush.msra.mxu1 %v1486_v47  ;;  %1534 = vmatpush.msra.mxu0 %v1469_v46  ;;  %v1467_v53 = vld [vmem:[%s2604_s3 + $0x60] sm:$0xff]  ;;  %v1484_v48 = vld [vmem:[%s2604_s3 + $0xe8] sm:$0xff]  ;;  %v1498_v55 = vld [vmem:[%s2604_s3 + $0x158] sm:$0xff] }
 0x215   : > { %1594 = vmatpush.msra.mxu3 %v1517_v41  ;;  %1575 = vmatpush.msra.mxu2 %v1500_v49  ;;  %v1515_v54 = vld [vmem:[%s2604_s3 + $0x1e0] sm:$0xff]  ;;  %v1466_v56 = vld [vmem:[%s2604_s3 + $0x58] sm:$0xff]  ;;  %v1497_v59 = vld [vmem:[%s2604_s3 + $0x150] sm:$0xff] }
 0x216   : > { %1554 = vmatpush.msra.mxu1 %v1485_v37  ;;  %1535 = vmatpush.msra.mxu0 %v1468_v50  ;;  %v1483_v43 = vld [vmem:[%s2604_s3 + $0xe0] sm:$0xff]  ;;  %v1514_v57 = vld [vmem:[%s2604_s3 + $0x1d8] sm:$0xff]  ;;  %v1465_v60 = vld [vmem:[%s2604_s3 + $0x50] sm:$0xff] }
 0x217   : > { %1595 = vmatpush.msra.mxu3 %v1516_v51  ;;  %1576 = vmatpush.msra.mxu2 %v1499_v52  ;;  %v1482_v58 = vld [vmem:[%s2604_s3 + $0xd8] sm:$0xff]  ;;  %v1513_v62 = vld [vmem:[%s2604_s3 + $0x1d0] sm:$0xff]  ;;  %v1496_v0 = vld [vmem:[%s2604_s3 + $0x148] sm:$0xff] }
 0x218   : > { %1555 = vmatpush.msra.mxu1 %v1484_v48  ;;  %1536 = vmatpush.msra.mxu0 %v1467_v53  ;;  %v1481_v63 = vld [vmem:[%s2604_s3 + $0xd0] sm:$0xff]  ;;  %v1464_v1 = vld [vmem:[%s2604_s3 + $0x48] sm:$0xff]  ;;  %v1495_v6 = vld [vmem:[%s2604_s3 + $0x140] sm:$0xff] }
 0x219   : > { %1596 = vmatpush.msra.mxu3 %v1515_v54  ;;  %1577 = vmatpush.msra.mxu2 %v1498_v55  ;;  %v1512_v4 = vld [vmem:[%s2604_s3 + $0x1c8] sm:$0xff]  ;;  %v1463_v7 = vld [vmem:[%s2604_s3 + $0x40] sm:$0xff]  ;;  %v1494_v11 = vld [vmem:[%s2604_s3 + $0x138] sm:$0xff] }
 0x21a   : > { %1556 = vmatpush.msra.mxu1 %v1483_v43  ;;  %1537 = vmatpush.msra.mxu0 %v1466_v56  ;;  %v1480_v5 = vld [vmem:[%s2604_s3 + $0xc8] sm:$0xff]  ;;  %v1511_v9 = vld [vmem:[%s2604_s3 + $0x1c0] sm:$0xff]  ;;  %v1462_v12 = vld [vmem:[%s2604_s3 + $0x38] sm:$0xff] }
 0x21b   : > { %1597 = vmatpush.msra.mxu3 %v1514_v57  ;;  %1578 = vmatpush.msra.mxu2 %v1497_v59  ;;  %v1479_v10 = vld [vmem:[%s2604_s3 + $0xc0] sm:$0xff]  ;;  %v1510_v61 = vld [vmem:[%s2604_s3 + $0x1b8] sm:$0xff]  ;;  %v1493_v14 = vld [vmem:[%s2604_s3 + $0x130] sm:$0xff] }
 0x21c   : > { %1557 = vmatpush.msra.mxu1 %v1482_v58  ;;  %1538 = vmatpush.msra.mxu0 %v1465_v60  ;;  %v1478_v13 = vld [vmem:[%s2604_s3 + $0xb8] sm:$0xff]  ;;  %v1461_v15 = vld [vmem:[%s2604_s3 + $0x30] sm:$0xff]  ;;  %v1492_v3 = vld [vmem:[%s2604_s3 + $0x128] sm:$0xff] }
 0x21d   : > { %1598 = vmatpush.msra.mxu3 %v1513_v62  ;;  %1579 = vmatpush.msra.mxu2 %v1496_v0  ;;  %v1509_v2 = vld [vmem:[%s2604_s3 + $0x1b0] sm:$0xff]  ;;  %v1460_v18 = vld [vmem:[%s2604_s3 + $0x28] sm:$0xff]  ;;  %v1491_v8 = vld [vmem:[%s2604_s3 + $0x120] sm:$0xff] }
 0x21e   : > { %1558 = vmatpush.msra.mxu1 %v1481_v63  ;;  %1539 = vmatpush.msra.mxu0 %v1464_v1  ;;  %v1477_v16 = vld [vmem:[%s2604_s3 + $0xb0] sm:$0xff]  ;;  %v1508_v20 = vld [vmem:[%s2604_s3 + $0x1a8] sm:$0xff]  ;;  %v1459_v25 = vld [vmem:[%s2604_s3 + $0x20] sm:$0xff] }
 0x21f   : > { %1599 = vmatpush.msra.mxu3 %v1512_v4  ;;  %1580 = vmatpush.msra.mxu2 %v1495_v6  ;;  %v1476_v21 = vld [vmem:[%s2604_s3 + $0xa8] sm:$0xff]  ;;  %v1440_v19 = vld [vmem:[%s2603_s2] sm:$0xf]  ;;  %v1490_v22 = vld [vmem:[%s2604_s3 + $0x118] sm:$0xff] }
 0x220   : > { %1559 = vmatpush.msra.mxu1 %v1480_v5  ;;  %1540 = vmatpush.msra.mxu0 %v1463_v7  ;;  %v1507_v27 = vld [vmem:[%s2604_s3 + $0x1a0] sm:$0xff]  ;;  %v1442_v29 = vperm.slane %v1440_v19, 0  ;;  %v1443_v24 = vperm.slane %v1440_v19, 1  ;;  %v1444_v30 = vperm.slane %v1440_v19, 2  ;;  %v1445_v26 = vperm.slane %v1440_v19, 3  ;;  %v1458_v32 = vld [vmem:[%s2604_s3 + $0x18] sm:$0xff] }
 0x221   : > { %1600 = vmatpush.msra.mxu3 %v1511_v9  ;;  %1581 = vmatpush.msra.mxu2 %v1494_v11  ;;  %v1475_v17 = vld [vmem:[%s2604_s3 + $0xa0] sm:$0xff]  ;;  %v1506_v23 = vld [vmem:[%s2604_s3 + $0x198] sm:$0xff]  ;;  %v1489_v36 = vld [vmem:[%s2604_s3 + $0x110] sm:$0xff] }
 0x222   : > { %1560 = vmatpush.msra.mxu1 %v1479_v10  ;;  %1541 = vmatpush.msra.mxu0 %v1462_v12  ;;  %v1474_v33 = vld [vmem:[%s2604_s3 + $0x98] sm:$0xff]  ;;  %v1446_v34 = vrot.slane %v1443_v24, 6  ;;  %v1447_v31 = vrot.slane %v1444_v30, 4  ;;  %v1448_v35 = vrot.slane %v1445_v26, 2  ;;  %v1457_v28 = vld [vmem:[%s2604_s3 + $0x10] sm:$0xff]  ;;  %v1439_v38 = vld [vmem:[#allocation2] sm:$0xff] }
 0x223   : > { %1601 = vmatpush.msra.mxu3 %v1510_v61  ;;  %1582 = vmatpush.msra.mxu2 %v1493_v14  ;;  %v1505_v39 = vld [vmem:[%s2604_s3 + $0x190] sm:$0xff]  ;;  %v1488_v45 = vld [vmem:[%s2604_s3 + $0x108] sm:$0xff]  ;;  %v1487_v37 = vld [vmem:[%s2604_s3 + $0x100] sm:$0xff] }
 0x224   : > { %1561 = vmatpush.msra.mxu1 %v1478_v13  ;;  %1542 = vmatpush.msra.mxu0 %v1461_v15  ;;  %v1473_v40 = vld [vmem:[%s2604_s3 + $0x90] sm:$0xff]  ;;  %v1449_v42 = vsel %vm1426_vm0, %v1442_v29, %v1446_v34  ;;  %v1450_v44 = vsel %vm1428_vm1, %v1447_v31, %v1448_v35  ;;  %v1456_v46 = vld [vmem:[%s2604_s3 + $0x8] sm:$0xff]  ;;  %v1455_v51 = vld [vmem:[%s2604_s3] sm:$0xff] }
 0x225   : > { %1602 = vmatpush.msra.mxu3 %v1509_v2  ;;  %1583 = vmatpush.msra.mxu2 %v1492_v3  ;;  %v1451_v47 = vsel %vm1430_vm2, %v1449_v42, %v1450_v44  ;;  %v1504_v49 = vld [vmem:[%s2604_s3 + $0x188] sm:$0xff]  ;;  %v1503_v53 = vld [vmem:[%s2604_s3 + $0x180] sm:$0xff] }
 0x226   : > { %1562 = vmatpush.msra.mxu1 %v1477_v16  ;;  %1543 = vmatpush.msra.mxu0 %v1460_v18  ;;  %v1453_v41 = vadd.f32 %v1451_v47, %v1439_v38  ;;  %v1472_v50 = vld [vmem:[%s2604_s3 + $0x88] sm:$0xff]  ;;  %v1471_v48 = vld [vmem:[%s2604_s3 + $0x80] sm:$0xff] }
 0x227   : > { %1603 = vmatpush.msra.mxu3 %v1508_v20  ;;  %1584 = vmatpush.msra.mxu2 %v1491_v8  ;;  %v1715_v57 = vld [vmem:[%s2605_s4] ss:$0 sm:$0xff] }
 0x228   : > { %1563 = vmatpush.msra.mxu1 %v1476_v21  ;;  %1544 = vmatpush.msra.mxu0 %v1459_v25  ;;  %v1454_v52 = vmax.f32 %v1453_v41, 0.0 }
 0x229   : > { %1604 = vmatpush.msra.mxu3 %v1507_v27  ;;  %1585 = vmatpush.msra.mxu2 %v1490_v22 }
 0x22a   : > { %1564 = vmatpush.msra.mxu1 %v1475_v17  ;;  %1545 = vmatpush.msra.mxu0 %v1458_v32  ;;  %1524 = vst [vmem:[#allocation1] ss:$4 sm:$0xff] %v1454_v52 }
 0x22b   : > { %1605 = vmatpush.msra.mxu3 %v1506_v23  ;;  %1586 = vmatpush.msra.mxu2 %v1489_v36 }
 0x22c   : > { %1565 = vmatpush.msra.mxu1 %v1474_v33  ;;  %1546 = vmatpush.msra.mxu0 %v1457_v28 }
 0x22d   : > { %1606 = vmatpush.msra.mxu3 %v1505_v39  ;;  %1587 = vmatpush.msra.mxu2 %v1488_v45 }
 0x22e   : > { %1566 = vmatpush.msra.mxu1 %v1473_v40  ;;  %1547 = vmatpush.msra.mxu0 %v1456_v46 }
 0x22f   : > { %1607 = vmatpush.msra.mxu3 %v1504_v49  ;;  %1588 = vmatpush.msra.mxu2 %v1487_v37 }
 0x230   : > { %1567 = vmatpush.msra.mxu1 %v1472_v50  ;;  %1548 = vmatpush.msra.mxu0 %v1455_v51 }
 0x231   : > { %1608 = vmatpush.msra.mxu3 %v1503_v53  ;;  %v1527_v54 = vld.sshfl [vmem:[#allocation1 + $0x10] sm:$0xff pattern:$0x73625140]  ;;  %v1525_v43 = vld.sshfl [vmem:[#allocation1] sm:$0xff pattern:$0x73625140] }
 0x232   : > { %1568 = vmatpush.msra.mxu1 %v1471_v48  ;;  %1589 = vmatmul.f32.vlgmr.msra.gmra.mxu2 %v1527_v54  ;;  %v1528_v55 = vld.sshfl [vmem:[#allocation1 + $0x18] sm:$0xff pattern:$0x73625140]  ;;  %v1526_v56 = vld.sshfl [vmem:[#allocation1 + $0x8] sm:$0xff pattern:$0x73625140] }
 0x233   : > { %1549 = vmatmul.f32.vlgmr.msra.gmra.mxu0 %v1525_v43  ;;  %1609 = vmatmul.f32.vlgmr.msra.gmra.mxu3 %v1528_v55 }
 0x234   : > { %1569 = vmatmul.f32.vlgmr.msra.gmra.mxu1 %v1526_v56 }
 0x2b0   : > { %v1550_v58 = vpop.f32.mrf.mxu0 }
 0x2b1   : > { %v1551_v59 = vadd.f32 %v1715_v57, %v1550_v58  ;;  %v1570_v60 = vpop.f32.mrf.mxu1 }
 0x2b3   : > { %v1571_v62 = vadd.f32 %v1570_v60, %v1551_v59 }
 0x2b5   : > { %v1590_v63 = vpop.f32.mrf.mxu2 }
 0x2b6   : > { %v1591_v0 = vadd.f32 %v1590_v63, %v1571_v62  ;;  %v1610_v1 = vpop.f32.mrf.mxu3 }
 0x2b8   : > { %v1611_v4 = vadd.f32 %v1610_v1, %v1591_v0 }
 0x2ba   : > { %1614 = vst.msk [vmem:[#allocation3] sm:$0x3] %vm1613_vm3, %v1611_v4 }
 0x2bb PF: > { %p1695_p7 = scmp.eq.s32.totalorder %s1794_s19, 3  ;;  %s1757_s24 = smov [#allocation3]  }
 0x2bc   : > { %s1621_s25 = sshll.u32 %s1757_s24, 4  ;;  %s1623_s28 = sshll.u32 %s2606_s5, 4  ;;  %s1622_s25 = int_to_ptr.vmem [resolvable:$true] %s1621_s25  ;;  %s1624_s28 = int_to_ptr.hbm [resolvable:$true] %s1623_s28 }
 0x2bd   : > { %1692 = dma.vmem_to_hbm [thread:$0]  (%p1695_p7), %s1622_s25, 32, %s1624_s28, [#allocation4]  }
 0x2be   : > { %1749 = dma.done.wait (%p1695_p7), [#allocation4], 32  }
 0x2bf   : > { %1751 = vsyncadd (%p1695_p7), [#allocation4], 4294967264 }
 0x2c0 PF: > { %s16_s18 = sadd.s32 1, %s1754_s18  }
 0x2c1   : > { %p13_p8 = scmp.ge.s32.totalorder %s16_s18, 6  }
 0x2c3   :  { %15 = sbr.rel (!%p13_p8) target bundleno = 1 (0x1), region = 79 }
 0x2c8   :  { %1637 = vsyncpa [#allocation4], 1 }
 0x2c9   :  { %1639 = vsyncpa [#allocation4 + $0x1], 1 }

</bundles_post_ra>
